<compile_context>
chip_gen: v7x
topology: tpu7x:2x2x1
jax: 0.10.0
libtpu: 0.0.40
codegen_flags: <defaults>
</compile_context>

<pallas_src>
import jax
import jax.numpy as jnp
from jax import lax
from jax.experimental import pallas as pl
from jax.experimental.pallas import tpu as pltpu

# ---------------------------------------------------------------------------
# Config (small, self-consistent stand-ins for ViT-L/14 + LLaVA projector)
# ---------------------------------------------------------------------------
B = 2          # batch
CIN = 3        # image channels
IMG = 16       # image spatial size
PATCH = 4      # patch size -> 4x4 = 16 patches
D = 128        # vision hidden size (stands in for 1024)
HEADS = 4
DH = D // HEADS
MLP = 4 * D
LAYERS = 3     # hidden_states[-2] == output of layer LAYERS-1
PROJ = 256     # mm_projector output dim (stands in for 4096)
NCLS = 2       # classifier classes
OUT_PAD = 128  # lane-dense padded width of the kernel output
NPATCH = (IMG // PATCH) ** 2
SEQ = NPATCH + 1          # +1 CLS token
CPP = CIN * PATCH * PATCH # im2col patch feature size
NUM_USED = LAYERS - 1     # last encoder layer's output is never consumed
SCALE = float(DH) ** -0.5
EPS = 1e-5


# ---------------------------------------------------------------------------
# Fused forward kernel (one grid step == one batch element)
# ---------------------------------------------------------------------------
def _ln(x, g, b):
    mu = jnp.mean(x, axis=-1, keepdims=True)
    var = jnp.mean((x - mu) ** 2, axis=-1, keepdims=True)
    return (x - mu) * lax.rsqrt(var + EPS) * g + b


def _bf(x):
    return x.astype(jnp.bfloat16)


def _fused_forward_kernel(
    xp_ref, patch_w_ref, pos_ref, pre_g_ref, pre_b_ref,
    ln1_g_ref, ln1_b_ref, wqkv_ref, bqkv_ref, wo_ref, bo_ref,
    ln2_g_ref, ln2_b_ref, w1_ref, b1_ref, w2_ref, b2_ref,
    proj_w_ref, proj_b_ref, cls_w_ref, cls_b_ref,
    o_ref,
):
    # ---- patch embedding (+ CLS embedding folded into pos row 0) + pre-LN --
    x = xp_ref[0]                                             # (SEQ, CPP) f32
    h = jnp.dot(_bf(x), patch_w_ref[...],
                preferred_element_type=jnp.float32) + pos_ref[...]
    h = _ln(h, pre_g_ref[...], pre_b_ref[...])                # (SEQ, D)

    # ---- encoder layers feeding hidden_states[-2] (last layer skipped) -----
    for l in range(NUM_USED):
        # --- multi-head attention block ---
        hn = _ln(h, ln1_g_ref[l], ln1_b_ref[l])
        qkv = jnp.dot(_bf(hn), wqkv_ref[l],
                      preferred_element_type=jnp.float32) + bqkv_ref[l]
        wo_l = wo_ref[l]                                      # (D, D) bf16
        attn = jnp.zeros((SEQ, D), jnp.float32)
        for hd in range(HEADS):
            lo = hd * DH
            qh = qkv[:, lo:lo + DH]                           # (SEQ, DH)
            kh = qkv[:, D + lo:D + lo + DH]
            vh = qkv[:, 2 * D + lo:2 * D + lo + DH]
            s = lax.dot_general(qh, kh, (((1,), (1,)), ((), ())),
                                preferred_element_type=jnp.float32) * SCALE
            s = s - jnp.max(s, axis=-1, keepdims=True)
            p = jnp.exp(s)
            p = p * pl.reciprocal(jnp.sum(p, axis=-1, keepdims=True),
                                  approx=True)
            oh = jnp.dot(p, vh, preferred_element_type=jnp.float32)
            # per-head slice of the output projection == concat(heads) @ Wo
            attn = attn + jnp.dot(_bf(oh), wo_l[lo:lo + DH, :],
                                  preferred_element_type=jnp.float32)
        h = h + attn + bo_ref[l]

        # --- MLP block (CLIP quick-GELU) ---
        hn = _ln(h, ln2_g_ref[l], ln2_b_ref[l])
        m = jnp.dot(_bf(hn), w1_ref[l],
                    preferred_element_type=jnp.float32) + b1_ref[l]
        m = m * jax.nn.sigmoid(1.702 * m)
        m = jnp.dot(_bf(m), w2_ref[l],
                    preferred_element_type=jnp.float32) + b2_ref[l]
        h = h + m

    # ---- head: drop CLS, mean over tokens, projector, classifier -----------
    # mean commuted ahead of the (pure linear) projector: exact.
    total = jnp.sum(h, axis=0, keepdims=True)                 # (1, D)
    pooled = (total - h[0:1, :]) * (1.0 / NPATCH)             # mean of rows 1:
    pr = jnp.dot(_bf(pooled), proj_w_ref[...],
                 preferred_element_type=jnp.float32) + proj_b_ref[...]
    logits = jnp.dot(_bf(pr), cls_w_ref[...],
                     preferred_element_type=jnp.float32) + cls_b_ref[...]
    o_ref[0] = logits                                         # (1, OUT_PAD)


# ---------------------------------------------------------------------------
# Wrapper: glue (im2col, param packing) + pallas_call
# ---------------------------------------------------------------------------
def _w_spec(arr):
    nd = arr.ndim
    return pl.BlockSpec(arr.shape, lambda b, _nd=nd: (0,) * _nd)


def _forward_impl(xp, pk):
    Bx = xp.shape[0]
    in_specs = [
        pl.BlockSpec((1, SEQ, CPP), lambda b: (b, 0, 0)),
        _w_spec(pk["patch_w"]), _w_spec(pk["pos_cls"]),
        _w_spec(pk["pre_g"]), _w_spec(pk["pre_b"]),
        _w_spec(pk["ln1_g"]), _w_spec(pk["ln1_b"]),
        _w_spec(pk["wqkv"]), _w_spec(pk["bqkv"]),
        _w_spec(pk["wo"]), _w_spec(pk["bo"]),
        _w_spec(pk["ln2_g"]), _w_spec(pk["ln2_b"]),
        _w_spec(pk["w1"]), _w_spec(pk["b1"]),
        _w_spec(pk["w2"]), _w_spec(pk["b2"]),
        _w_spec(pk["proj_w"]), _w_spec(pk["proj_b"]),
        _w_spec(pk["cls_w"]), _w_spec(pk["cls_b"]),
    ]
    out = pl.pallas_call(
        _fused_forward_kernel,
        grid=(Bx,),
        out_shape=jax.ShapeDtypeStruct((Bx, 1, OUT_PAD), jnp.float32),
        in_specs=in_specs,
        out_specs=pl.BlockSpec((1, 1, OUT_PAD), lambda b: (b, 0, 0)),
        compiler_params=pltpu.CompilerParams(
            dimension_semantics=("parallel",),
            vmem_limit_bytes=64 << 20),
    )(xp, pk["patch_w"], pk["pos_cls"], pk["pre_g"], pk["pre_b"],
      pk["ln1_g"], pk["ln1_b"], pk["wqkv"], pk["bqkv"], pk["wo"], pk["bo"],
      pk["ln2_g"], pk["ln2_b"], pk["w1"], pk["b1"], pk["w2"], pk["b2"],
      pk["proj_w"], pk["proj_b"], pk["cls_w"], pk["cls_b"])
    return out[:, 0, :NCLS]


@jax.jit
def _forward_adapter(x_nchw, pk):
    Bx = x_nchw.shape[0]
    p = PATCH
    # im2col for the (no-bias) patch conv; row 0 is an all-zero "CLS slot"
    # whose embedding is exactly 0, so the real CLS embedding is folded into
    # pos_cls row 0 (bit-exact with concat(cls, patches) + pos).
    xp = x_nchw.reshape(Bx, CIN, IMG // p, p, IMG // p, p)
    xp = xp.transpose(0, 2, 4, 1, 3, 5).reshape(Bx, NPATCH, CPP)
    xp = jnp.concatenate([jnp.zeros((Bx, 1, CPP), jnp.float32), xp], axis=1)
    return _forward_impl(xp, pk)


def clip_mofrl_forward(x_nchw, packed, add_adapter=True):
    """Mirrors CLIP_MOFRL.forward (add_adapter == 'True' path)."""
    if not add_adapter:
        # TODO(synk): add_adapter=False branch (classifier directly on the
        # D-dim mean-pooled features) not exercised in this synthetic script.
        raise NotImplementedError
    return _forward_adapter(x_nchw, packed)


# ---------------------------------------------------------------------------
# Deterministic parameter init + one-time packing (QKV fuse, layer stacking,
# CLS-into-pos fold, bf16 matmul weights, classifier padded to 128 lanes)
# ---------------------------------------------------------------------------
def make_params():
    keys = iter(jax.random.split(jax.random.PRNGKey(0), 8 + LAYERS * 8))
    nrm = lambda k, shp, s=0.02: jax.random.normal(k, shp, jnp.float32) * s

    params = {
        "patch_w": nrm(next(keys), (CPP, D)),
        "cls_emb": nrm(next(keys), (D,)),
        "pos_emb": nrm(next(keys), (1, SEQ, D)),
        "pre_ln_g": jnp.ones((1, D), jnp.float32),
        "pre_ln_b": jnp.zeros((1, D), jnp.float32),
        "proj_w": nrm(next(keys), (D, PROJ)),
        "proj_b": nrm(next(keys), (1, PROJ)),
        "cls_w": nrm(next(keys), (PROJ, NCLS)),
        "cls_b": jnp.zeros((1, NCLS), jnp.float32),
        "layers": [],
    }
    for _ in range(LAYERS):
        lp = {
            "ln1_g": jnp.ones((1, D), jnp.float32),
            "ln1_b": jnp.zeros((1, D), jnp.float32),
            "wq": nrm(next(keys), (D, D)), "bq": jnp.zeros((1, D), jnp.float32),
            "wk": nrm(next(keys), (D, D)), "bk": jnp.zeros((1, D), jnp.float32),
            "wv": nrm(next(keys), (D, D)), "bv": jnp.zeros((1, D), jnp.float32),
            "wo": nrm(next(keys), (D, D)), "bo": jnp.zeros((1, D), jnp.float32),
            "ln2_g": jnp.ones((1, D), jnp.float32),
            "ln2_b": jnp.zeros((1, D), jnp.float32),
            "w1": nrm(next(keys), (D, MLP)), "b1": jnp.zeros((1, MLP), jnp.float32),
            "w2": nrm(next(keys), (MLP, D)), "b2": jnp.zeros((1, D), jnp.float32),
        }
        params["layers"].append(lp)
    return params


def pack_params(params):
    bf16 = jnp.bfloat16
    used = params["layers"][:NUM_USED]   # last layer feeds hidden_states[-1]: unused
    stack = lambda key: jnp.stack([lp[key] for lp in used], axis=0)

    wqkv = jnp.stack(
        [jnp.concatenate([lp["wq"], lp["wk"], lp["wv"]], axis=1) for lp in used],
        axis=0).astype(bf16)                                  # (L, D, 3D)
    bqkv = jnp.stack(
        [jnp.concatenate([lp["bq"], lp["bk"], lp["bv"]], axis=1) for lp in used],
        axis=0)                                               # (L, 1, 3D) f32

    pos_cls = params["pos_emb"][0].at[0].add(params["cls_emb"])  # (SEQ, D)

    # Zero-pad the classifier to 128 output lanes -> unmasked full-lane store.
    cls_w_pad = jnp.zeros((PROJ, OUT_PAD), jnp.float32).at[:, :NCLS].set(
        params["cls_w"])
    cls_b_pad = jnp.zeros((1, OUT_PAD), jnp.float32).at[:, :NCLS].set(
        params["cls_b"])

    return dict(
        patch_w=params["patch_w"].astype(bf16),
        pos_cls=pos_cls,
        pre_g=params["pre_ln_g"], pre_b=params["pre_ln_b"],
        ln1_g=stack("ln1_g"), ln1_b=stack("ln1_b"),
        wqkv=wqkv, bqkv=bqkv,
        wo=stack("wo").astype(bf16), bo=stack("bo"),
        ln2_g=stack("ln2_g"), ln2_b=stack("ln2_b"),
        w1=stack("w1").astype(bf16), b1=stack("b1"),
        w2=stack("w2").astype(bf16), b2=stack("b2"),
        proj_w=params["proj_w"].astype(bf16), proj_b=params["proj_b"],
        cls_w=cls_w_pad.astype(bf16), cls_b=cls_b_pad,
    )


if __name__ == "__main__":
    params = make_params()
    packed = pack_params(params)
    x = jax.random.normal(jax.random.PRNGKey(0), (B, CIN, IMG, IMG), jnp.float32)

    out = clip_mofrl_forward(x, packed, add_adapter=True)
    out = jax.block_until_ready(out)

    assert out.shape == (B, NCLS), out.shape
    assert bool(jnp.all(jnp.isfinite(out)))
    print("KERNEL_OK")
</pallas_src>

<mosaic_0001>
module attributes {stable_mosaic.version = 11 : i64} {
  func.func @_fused_forward_kernel(%arg0: i32, %arg1: memref<1x17x48xf32, #tpu.memory_space<vmem>>, %arg2: memref<48x128xbf16, #tpu.memory_space<vmem>>, %arg3: memref<17x128xf32, #tpu.memory_space<vmem>>, %arg4: memref<1x128xf32, #tpu.memory_space<vmem>>, %arg5: memref<1x128xf32, #tpu.memory_space<vmem>>, %arg6: memref<2x1x128xf32, #tpu.memory_space<vmem>>, %arg7: memref<2x1x128xf32, #tpu.memory_space<vmem>>, %arg8: memref<2x128x384xbf16, #tpu.memory_space<vmem>>, %arg9: memref<2x1x384xf32, #tpu.memory_space<vmem>>, %arg10: memref<2x128x128xbf16, #tpu.memory_space<vmem>>, %arg11: memref<2x1x128xf32, #tpu.memory_space<vmem>>, %arg12: memref<2x1x128xf32, #tpu.memory_space<vmem>>, %arg13: memref<2x1x128xf32, #tpu.memory_space<vmem>>, %arg14: memref<2x128x512xbf16, #tpu.memory_space<vmem>>, %arg15: memref<2x1x512xf32, #tpu.memory_space<vmem>>, %arg16: memref<2x512x128xbf16, #tpu.memory_space<vmem>>, %arg17: memref<2x1x128xf32, #tpu.memory_space<vmem>>, %arg18: memref<128x256xbf16, #tpu.memory_space<vmem>>, %arg19: memref<1x256xf32, #tpu.memory_space<vmem>>, %arg20: memref<256x128xbf16, #tpu.memory_space<vmem>>, %arg21: memref<1x128xf32, #tpu.memory_space<vmem>>, %arg22: memref<1x1x128xf32, #tpu.memory_space<vmem>>) attributes {dimension_semantics = [#tpu.dimension_semantics<parallel>], iteration_bounds = array<i64: 2>, scalar_prefetch = 0 : i64, scratch_operands = 0 : i64, tpu.core_type = #tpu.core_type<tc>, window_params = [{transform_indices = @transform_0, window_bounds = array<i64: 1, 17, 48>}, {pipeline_mode = #tpu.pipeline_mode<synchronous>, transform_indices = @transform_1, window_bounds = array<i64: 48, 128>}, {pipeline_mode = #tpu.pipeline_mode<synchronous>, transform_indices = @transform_2, window_bounds = array<i64: 17, 128>}, {pipeline_mode = #tpu.pipeline_mode<synchronous>, transform_indices = @transform_3, window_bounds = array<i64: 1, 128>}, {pipeline_mode = #tpu.pipeline_mode<synchronous>, transform_indices = @transform_4, window_bounds = array<i64: 1, 128>}, {pipeline_mode = #tpu.pipeline_mode<synchronous>, transform_indices = @transform_5, window_bounds = array<i64: 2, 1, 128>}, {pipeline_mode = #tpu.pipeline_mode<synchronous>, transform_indices = @transform_6, window_bounds = array<i64: 2, 1, 128>}, {pipeline_mode = #tpu.pipeline_mode<synchronous>, transform_indices = @transform_7, window_bounds = array<i64: 2, 128, 384>}, {pipeline_mode = #tpu.pipeline_mode<synchronous>, transform_indices = @transform_8, window_bounds = array<i64: 2, 1, 384>}, {pipeline_mode = #tpu.pipeline_mode<synchronous>, transform_indices = @transform_9, window_bounds = array<i64: 2, 128, 128>}, {pipeline_mode = #tpu.pipeline_mode<synchronous>, transform_indices = @transform_10, window_bounds = array<i64: 2, 1, 128>}, {pipeline_mode = #tpu.pipeline_mode<synchronous>, transform_indices = @transform_11, window_bounds = array<i64: 2, 1, 128>}, {pipeline_mode = #tpu.pipeline_mode<synchronous>, transform_indices = @transform_12, window_bounds = array<i64: 2, 1, 128>}, {pipeline_mode = #tpu.pipeline_mode<synchronous>, transform_indices = @transform_13, window_bounds = array<i64: 2, 128, 512>}, {pipeline_mode = #tpu.pipeline_mode<synchronous>, transform_indices = @transform_14, window_bounds = array<i64: 2, 1, 512>}, {pipeline_mode = #tpu.pipeline_mode<synchronous>, transform_indices = @transform_15, window_bounds = array<i64: 2, 512, 128>}, {pipeline_mode = #tpu.pipeline_mode<synchronous>, transform_indices = @transform_16, window_bounds = array<i64: 2, 1, 128>}, {pipeline_mode = #tpu.pipeline_mode<synchronous>, transform_indices = @transform_17, window_bounds = array<i64: 128, 256>}, {pipeline_mode = #tpu.pipeline_mode<synchronous>, transform_indices = @transform_18, window_bounds = array<i64: 1, 256>}, {pipeline_mode = #tpu.pipeline_mode<synchronous>, transform_indices = @transform_19, window_bounds = array<i64: 256, 128>}, {pipeline_mode = #tpu.pipeline_mode<synchronous>, transform_indices = @transform_20, window_bounds = array<i64: 1, 128>}, {transform_indices = @transform_21, window_bounds = array<i64: 1, 1, 128>}]} {
    %c0 = arith.constant 0 : index
    %c0_0 = arith.constant 0 : index
    %c0_1 = arith.constant 0 : index
    %0 = vector.load %arg1[%c0, %c0_0, %c0_1] : memref<1x17x48xf32, #tpu.memory_space<vmem>>, vector<1x17x48xf32>
    %1 = vector.shape_cast %0 : vector<1x17x48xf32> to vector<17x48xf32>
    %2 = arith.truncf %1 : vector<17x48xf32> to vector<17x48xbf16>
    %c0_2 = arith.constant 0 : index
    %c0_3 = arith.constant 0 : index
    %3 = vector.load %arg2[%c0_2, %c0_3] : memref<48x128xbf16, #tpu.memory_space<vmem>>, vector<48x128xbf16>
    %cst = arith.constant dense<0.000000e+00> : vector<17x128xf32>
    %4 = tpu.matmul %2, %3, %cst {dimension_numbers = #tpu.dot_dimension_numbers<[1], [0], [0], [1], [0, 0, 1, 1], [], []>} : vector<17x48xbf16>, vector<48x128xbf16>, vector<17x128xf32> -> vector<17x128xf32>
    %c0_4 = arith.constant 0 : index
    %c0_5 = arith.constant 0 : index
    %5 = vector.load %arg3[%c0_4, %c0_5] : memref<17x128xf32, #tpu.memory_space<vmem>>, vector<17x128xf32>
    %6 = arith.addf %4, %5 : vector<17x128xf32>
    %c0_6 = arith.constant 0 : index
    %c0_7 = arith.constant 0 : index
    %7 = vector.load %arg4[%c0_6, %c0_7] : memref<1x128xf32, #tpu.memory_space<vmem>>, vector<1x128xf32>
    %c0_8 = arith.constant 0 : index
    %c0_9 = arith.constant 0 : index
    %8 = vector.load %arg5[%c0_8, %c0_9] : memref<1x128xf32, #tpu.memory_space<vmem>>, vector<1x128xf32>
    %cst_10 = arith.constant dense<0.000000e+00> : vector<17xf32>
    %9 = vector.multi_reduction <add>, %6, %cst_10 [1] : vector<17x128xf32> to vector<17xf32>
    %10 = vector.shape_cast %9 : vector<17xf32> to vector<17x1xf32>
    %cst_11 = arith.constant 1.280000e+02 : f32
    %11 = vector.broadcast %cst_11 : f32 to vector<17x1xf32>
    %12 = arith.divf %10, %11 : vector<17x1xf32>
    %13 = vector.broadcast %12 : vector<17x1xf32> to vector<17x128xf32>
    %14 = arith.subf %6, %13 : vector<17x128xf32>
    %15 = arith.mulf %14, %14 : vector<17x128xf32>
    %cst_12 = arith.constant dense<0.000000e+00> : vector<17xf32>
    %16 = vector.multi_reduction <add>, %15, %cst_12 [1] : vector<17x128xf32> to vector<17xf32>
    %17 = vector.shape_cast %16 : vector<17xf32> to vector<17x1xf32>
    %cst_13 = arith.constant 1.280000e+02 : f32
    %18 = vector.broadcast %cst_13 : f32 to vector<17x1xf32>
    %19 = arith.divf %17, %18 : vector<17x1xf32>
    %20 = vector.broadcast %12 : vector<17x1xf32> to vector<17x128xf32>
    %21 = arith.subf %6, %20 : vector<17x128xf32>
    %cst_14 = arith.constant 9.99999974E-6 : f32
    %22 = vector.broadcast %cst_14 : f32 to vector<17x1xf32>
    %23 = arith.addf %19, %22 : vector<17x1xf32>
    %24 = math.rsqrt %23 : vector<17x1xf32>
    %25 = vector.broadcast %24 : vector<17x1xf32> to vector<17x128xf32>
    %26 = arith.mulf %21, %25 : vector<17x128xf32>
    %27 = vector.broadcast %7 : vector<1x128xf32> to vector<17x128xf32>
    %28 = arith.mulf %26, %27 : vector<17x128xf32>
    %29 = vector.broadcast %8 : vector<1x128xf32> to vector<17x128xf32>
    %30 = arith.addf %28, %29 : vector<17x128xf32>
    %c0_15 = arith.constant 0 : index
    %c0_16 = arith.constant 0 : index
    %c0_17 = arith.constant 0 : index
    %31 = vector.load %arg6[%c0_15, %c0_16, %c0_17] : memref<2x1x128xf32, #tpu.memory_space<vmem>>, vector<1x1x128xf32>
    %32 = vector.shape_cast %31 : vector<1x1x128xf32> to vector<1x128xf32>
    %c0_18 = arith.constant 0 : index
    %c0_19 = arith.constant 0 : index
    %c0_20 = arith.constant 0 : index
    %33 = vector.load %arg7[%c0_18, %c0_19, %c0_20] : memref<2x1x128xf32, #tpu.memory_space<vmem>>, vector<1x1x128xf32>
    %34 = vector.shape_cast %33 : vector<1x1x128xf32> to vector<1x128xf32>
    %cst_21 = arith.constant dense<0.000000e+00> : vector<17xf32>
    %35 = vector.multi_reduction <add>, %30, %cst_21 [1] : vector<17x128xf32> to vector<17xf32>
    %36 = vector.shape_cast %35 : vector<17xf32> to vector<17x1xf32>
    %cst_22 = arith.constant 1.280000e+02 : f32
    %37 = vector.broadcast %cst_22 : f32 to vector<17x1xf32>
    %38 = arith.divf %36, %37 : vector<17x1xf32>
    %39 = vector.broadcast %38 : vector<17x1xf32> to vector<17x128xf32>
    %40 = arith.subf %30, %39 : vector<17x128xf32>
    %41 = arith.mulf %40, %40 : vector<17x128xf32>
    %cst_23 = arith.constant dense<0.000000e+00> : vector<17xf32>
    %42 = vector.multi_reduction <add>, %41, %cst_23 [1] : vector<17x128xf32> to vector<17xf32>
    %43 = vector.shape_cast %42 : vector<17xf32> to vector<17x1xf32>
    %cst_24 = arith.constant 1.280000e+02 : f32
    %44 = vector.broadcast %cst_24 : f32 to vector<17x1xf32>
    %45 = arith.divf %43, %44 : vector<17x1xf32>
    %46 = vector.broadcast %38 : vector<17x1xf32> to vector<17x128xf32>
    %47 = arith.subf %30, %46 : vector<17x128xf32>
    %cst_25 = arith.constant 9.99999974E-6 : f32
    %48 = vector.broadcast %cst_25 : f32 to vector<17x1xf32>
    %49 = arith.addf %45, %48 : vector<17x1xf32>
    %50 = math.rsqrt %49 : vector<17x1xf32>
    %51 = vector.broadcast %50 : vector<17x1xf32> to vector<17x128xf32>
    %52 = arith.mulf %47, %51 : vector<17x128xf32>
    %53 = vector.broadcast %32 : vector<1x128xf32> to vector<17x128xf32>
    %54 = arith.mulf %52, %53 : vector<17x128xf32>
    %55 = vector.broadcast %34 : vector<1x128xf32> to vector<17x128xf32>
    %56 = arith.addf %54, %55 : vector<17x128xf32>
    %57 = arith.truncf %56 : vector<17x128xf32> to vector<17x128xbf16>
    %c0_26 = arith.constant 0 : index
    %c0_27 = arith.constant 0 : index
    %c0_28 = arith.constant 0 : index
    %58 = vector.load %arg8[%c0_26, %c0_27, %c0_28] : memref<2x128x384xbf16, #tpu.memory_space<vmem>>, vector<1x128x384xbf16>
    %59 = vector.shape_cast %58 : vector<1x128x384xbf16> to vector<128x384xbf16>
    %cst_29 = arith.constant dense<0.000000e+00> : vector<17x384xf32>
    %60 = tpu.matmul %57, %59, %cst_29 {dimension_numbers = #tpu.dot_dimension_numbers<[1], [0], [0], [1], [0, 0, 1, 1], [], []>} : vector<17x128xbf16>, vector<128x384xbf16>, vector<17x384xf32> -> vector<17x384xf32>
    %c0_30 = arith.constant 0 : index
    %c0_31 = arith.constant 0 : index
    %c0_32 = arith.constant 0 : index
    %61 = vector.load %arg9[%c0_30, %c0_31, %c0_32] : memref<2x1x384xf32, #tpu.memory_space<vmem>>, vector<1x1x384xf32>
    %62 = vector.shape_cast %61 : vector<1x1x384xf32> to vector<1x384xf32>
    %63 = vector.broadcast %62 : vector<1x384xf32> to vector<17x384xf32>
    %64 = arith.addf %60, %63 : vector<17x384xf32>
    %c0_33 = arith.constant 0 : index
    %c0_34 = arith.constant 0 : index
    %c0_35 = arith.constant 0 : index
    %65 = vector.load %arg10[%c0_33, %c0_34, %c0_35] : memref<2x128x128xbf16, #tpu.memory_space<vmem>>, vector<1x128x128xbf16>
    %66 = vector.shape_cast %65 : vector<1x128x128xbf16> to vector<128x128xbf16>
    %cst_36 = arith.constant 0.000000e+00 : f32
    %67 = vector.broadcast %cst_36 : f32 to vector<17x128xf32>
    %68 = vector.extract_strided_slice %64 {offsets = [0, 0], sizes = [17, 32], strides = [1, 1]} : vector<17x384xf32> to vector<17x32xf32>
    %69 = vector.extract_strided_slice %64 {offsets = [0, 128], sizes = [17, 32], strides = [1, 1]} : vector<17x384xf32> to vector<17x32xf32>
    %70 = vector.extract_strided_slice %64 {offsets = [0, 256], sizes = [17, 32], strides = [1, 1]} : vector<17x384xf32> to vector<17x32xf32>
    %cst_37 = arith.constant dense<0.000000e+00> : vector<17x17xf32>
    %71 = tpu.matmul %68, %69, %cst_37 {dimension_numbers = #tpu.dot_dimension_numbers<[1], [1], [0], [0], [0, 0, 1, 0], [], []>} : vector<17x32xf32>, vector<17x32xf32>, vector<17x17xf32> -> vector<17x17xf32>
    %cst_38 = arith.constant 0.176776692 : f32
    %72 = vector.broadcast %cst_38 : f32 to vector<17x17xf32>
    %73 = arith.mulf %71, %72 : vector<17x17xf32>
    %cst_39 = arith.constant dense<0xFF800000> : vector<17xf32>
    %74 = vector.multi_reduction <maximumf>, %73, %cst_39 [1] : vector<17x17xf32> to vector<17xf32>
    %75 = vector.shape_cast %74 : vector<17xf32> to vector<17x1xf32>
    %76 = vector.broadcast %75 : vector<17x1xf32> to vector<17x17xf32>
    %77 = arith.subf %73, %76 : vector<17x17xf32>
    %78 = math.exp %77 : vector<17x17xf32>
    %cst_40 = arith.constant dense<0.000000e+00> : vector<17xf32>
    %79 = vector.multi_reduction <add>, %78, %cst_40 [1] : vector<17x17xf32> to vector<17xf32>
    %80 = vector.shape_cast %79 : vector<17xf32> to vector<17x1xf32>
    %81 = tpu.reciprocal %80 {approx = true} : vector<17x1xf32> -> vector<17x1xf32>
    %82 = vector.broadcast %81 : vector<17x1xf32> to vector<17x17xf32>
    %83 = arith.mulf %78, %82 : vector<17x17xf32>
    %cst_41 = arith.constant dense<0.000000e+00> : vector<17x32xf32>
    %84 = tpu.matmul %83, %70, %cst_41 {dimension_numbers = #tpu.dot_dimension_numbers<[1], [0], [0], [1], [0, 0, 1, 1], [], []>} : vector<17x17xf32>, vector<17x32xf32>, vector<17x32xf32> -> vector<17x32xf32>
    %85 = arith.truncf %84 : vector<17x32xf32> to vector<17x32xbf16>
    %86 = vector.extract_strided_slice %66 {offsets = [0, 0], sizes = [32, 128], strides = [1, 1]} : vector<128x128xbf16> to vector<32x128xbf16>
    %cst_42 = arith.constant dense<0.000000e+00> : vector<17x128xf32>
    %87 = tpu.matmul %85, %86, %cst_42 {dimension_numbers = #tpu.dot_dimension_numbers<[1], [0], [0], [1], [0, 0, 1, 1], [], []>} : vector<17x32xbf16>, vector<32x128xbf16>, vector<17x128xf32> -> vector<17x128xf32>
    %88 = arith.addf %67, %87 : vector<17x128xf32>
    %89 = vector.extract_strided_slice %64 {offsets = [0, 32], sizes = [17, 32], strides = [1, 1]} : vector<17x384xf32> to vector<17x32xf32>
    %90 = vector.extract_strided_slice %64 {offsets = [0, 160], sizes = [17, 32], strides = [1, 1]} : vector<17x384xf32> to vector<17x32xf32>
    %91 = vector.extract_strided_slice %64 {offsets = [0, 288], sizes = [17, 32], strides = [1, 1]} : vector<17x384xf32> to vector<17x32xf32>
    %cst_43 = arith.constant dense<0.000000e+00> : vector<17x17xf32>
    %92 = tpu.matmul %89, %90, %cst_43 {dimension_numbers = #tpu.dot_dimension_numbers<[1], [1], [0], [0], [0, 0, 1, 0], [], []>} : vector<17x32xf32>, vector<17x32xf32>, vector<17x17xf32> -> vector<17x17xf32>
    %cst_44 = arith.constant 0.176776692 : f32
    %93 = vector.broadcast %cst_44 : f32 to vector<17x17xf32>
    %94 = arith.mulf %92, %93 : vector<17x17xf32>
    %cst_45 = arith.constant dense<0xFF800000> : vector<17xf32>
    %95 = vector.multi_reduction <maximumf>, %94, %cst_45 [1] : vector<17x17xf32> to vector<17xf32>
    %96 = vector.shape_cast %95 : vector<17xf32> to vector<17x1xf32>
    %97 = vector.broadcast %96 : vector<17x1xf32> to vector<17x17xf32>
    %98 = arith.subf %94, %97 : vector<17x17xf32>
    %99 = math.exp %98 : vector<17x17xf32>
    %cst_46 = arith.constant dense<0.000000e+00> : vector<17xf32>
    %100 = vector.multi_reduction <add>, %99, %cst_46 [1] : vector<17x17xf32> to vector<17xf32>
    %101 = vector.shape_cast %100 : vector<17xf32> to vector<17x1xf32>
    %102 = tpu.reciprocal %101 {approx = true} : vector<17x1xf32> -> vector<17x1xf32>
    %103 = vector.broadcast %102 : vector<17x1xf32> to vector<17x17xf32>
    %104 = arith.mulf %99, %103 : vector<17x17xf32>
    %cst_47 = arith.constant dense<0.000000e+00> : vector<17x32xf32>
    %105 = tpu.matmul %104, %91, %cst_47 {dimension_numbers = #tpu.dot_dimension_numbers<[1], [0], [0], [1], [0, 0, 1, 1], [], []>} : vector<17x17xf32>, vector<17x32xf32>, vector<17x32xf32> -> vector<17x32xf32>
    %106 = arith.truncf %105 : vector<17x32xf32> to vector<17x32xbf16>
    %107 = vector.extract_strided_slice %66 {offsets = [32, 0], sizes = [32, 128], strides = [1, 1]} : vector<128x128xbf16> to vector<32x128xbf16>
    %cst_48 = arith.constant dense<0.000000e+00> : vector<17x128xf32>
    %108 = tpu.matmul %106, %107, %cst_48 {dimension_numbers = #tpu.dot_dimension_numbers<[1], [0], [0], [1], [0, 0, 1, 1], [], []>} : vector<17x32xbf16>, vector<32x128xbf16>, vector<17x128xf32> -> vector<17x128xf32>
    %109 = arith.addf %88, %108 : vector<17x128xf32>
    %110 = vector.extract_strided_slice %64 {offsets = [0, 64], sizes = [17, 32], strides = [1, 1]} : vector<17x384xf32> to vector<17x32xf32>
    %111 = vector.extract_strided_slice %64 {offsets = [0, 192], sizes = [17, 32], strides = [1, 1]} : vector<17x384xf32> to vector<17x32xf32>
    %112 = vector.extract_strided_slice %64 {offsets = [0, 320], sizes = [17, 32], strides = [1, 1]} : vector<17x384xf32> to vector<17x32xf32>
    %cst_49 = arith.constant dense<0.000000e+00> : vector<17x17xf32>
    %113 = tpu.matmul %110, %111, %cst_49 {dimension_numbers = #tpu.dot_dimension_numbers<[1], [1], [0], [0], [0, 0, 1, 0], [], []>} : vector<17x32xf32>, vector<17x32xf32>, vector<17x17xf32> -> vector<17x17xf32>
    %cst_50 = arith.constant 0.176776692 : f32
    %114 = vector.broadcast %cst_50 : f32 to vector<17x17xf32>
    %115 = arith.mulf %113, %114 : vector<17x17xf32>
    %cst_51 = arith.constant dense<0xFF800000> : vector<17xf32>
    %116 = vector.multi_reduction <maximumf>, %115, %cst_51 [1] : vector<17x17xf32> to vector<17xf32>
    %117 = vector.shape_cast %116 : vector<17xf32> to vector<17x1xf32>
    %118 = vector.broadcast %117 : vector<17x1xf32> to vector<17x17xf32>
    %119 = arith.subf %115, %118 : vector<17x17xf32>
    %120 = math.exp %119 : vector<17x17xf32>
    %cst_52 = arith.constant dense<0.000000e+00> : vector<17xf32>
    %121 = vector.multi_reduction <add>, %120, %cst_52 [1] : vector<17x17xf32> to vector<17xf32>
    %122 = vector.shape_cast %121 : vector<17xf32> to vector<17x1xf32>
    %123 = tpu.reciprocal %122 {approx = true} : vector<17x1xf32> -> vector<17x1xf32>
    %124 = vector.broadcast %123 : vector<17x1xf32> to vector<17x17xf32>
    %125 = arith.mulf %120, %124 : vector<17x17xf32>
    %cst_53 = arith.constant dense<0.000000e+00> : vector<17x32xf32>
    %126 = tpu.matmul %125, %112, %cst_53 {dimension_numbers = #tpu.dot_dimension_numbers<[1], [0], [0], [1], [0, 0, 1, 1], [], []>} : vector<17x17xf32>, vector<17x32xf32>, vector<17x32xf32> -> vector<17x32xf32>
    %127 = arith.truncf %126 : vector<17x32xf32> to vector<17x32xbf16>
    %128 = vector.extract_strided_slice %66 {offsets = [64, 0], sizes = [32, 128], strides = [1, 1]} : vector<128x128xbf16> to vector<32x128xbf16>
    %cst_54 = arith.constant dense<0.000000e+00> : vector<17x128xf32>
    %129 = tpu.matmul %127, %128, %cst_54 {dimension_numbers = #tpu.dot_dimension_numbers<[1], [0], [0], [1], [0, 0, 1, 1], [], []>} : vector<17x32xbf16>, vector<32x128xbf16>, vector<17x128xf32> -> vector<17x128xf32>
    %130 = arith.addf %109, %129 : vector<17x128xf32>
    %131 = vector.extract_strided_slice %64 {offsets = [0, 96], sizes = [17, 32], strides = [1, 1]} : vector<17x384xf32> to vector<17x32xf32>
    %132 = vector.extract_strided_slice %64 {offsets = [0, 224], sizes = [17, 32], strides = [1, 1]} : vector<17x384xf32> to vector<17x32xf32>
    %133 = vector.extract_strided_slice %64 {offsets = [0, 352], sizes = [17, 32], strides = [1, 1]} : vector<17x384xf32> to vector<17x32xf32>
    %cst_55 = arith.constant dense<0.000000e+00> : vector<17x17xf32>
    %134 = tpu.matmul %131, %132, %cst_55 {dimension_numbers = #tpu.dot_dimension_numbers<[1], [1], [0], [0], [0, 0, 1, 0], [], []>} : vector<17x32xf32>, vector<17x32xf32>, vector<17x17xf32> -> vector<17x17xf32>
    %cst_56 = arith.constant 0.176776692 : f32
    %135 = vector.broadcast %cst_56 : f32 to vector<17x17xf32>
    %136 = arith.mulf %134, %135 : vector<17x17xf32>
    %cst_57 = arith.constant dense<0xFF800000> : vector<17xf32>
    %137 = vector.multi_reduction <maximumf>, %136, %cst_57 [1] : vector<17x17xf32> to vector<17xf32>
    %138 = vector.shape_cast %137 : vector<17xf32> to vector<17x1xf32>
    %139 = vector.broadcast %138 : vector<17x1xf32> to vector<17x17xf32>
    %140 = arith.subf %136, %139 : vector<17x17xf32>
    %141 = math.exp %140 : vector<17x17xf32>
    %cst_58 = arith.constant dense<0.000000e+00> : vector<17xf32>
    %142 = vector.multi_reduction <add>, %141, %cst_58 [1] : vector<17x17xf32> to vector<17xf32>
    %143 = vector.shape_cast %142 : vector<17xf32> to vector<17x1xf32>
    %144 = tpu.reciprocal %143 {approx = true} : vector<17x1xf32> -> vector<17x1xf32>
    %145 = vector.broadcast %144 : vector<17x1xf32> to vector<17x17xf32>
    %146 = arith.mulf %141, %145 : vector<17x17xf32>
    %cst_59 = arith.constant dense<0.000000e+00> : vector<17x32xf32>
    %147 = tpu.matmul %146, %133, %cst_59 {dimension_numbers = #tpu.dot_dimension_numbers<[1], [0], [0], [1], [0, 0, 1, 1], [], []>} : vector<17x17xf32>, vector<17x32xf32>, vector<17x32xf32> -> vector<17x32xf32>
    %148 = arith.truncf %147 : vector<17x32xf32> to vector<17x32xbf16>
    %149 = vector.extract_strided_slice %66 {offsets = [96, 0], sizes = [32, 128], strides = [1, 1]} : vector<128x128xbf16> to vector<32x128xbf16>
    %cst_60 = arith.constant dense<0.000000e+00> : vector<17x128xf32>
    %150 = tpu.matmul %148, %149, %cst_60 {dimension_numbers = #tpu.dot_dimension_numbers<[1], [0], [0], [1], [0, 0, 1, 1], [], []>} : vector<17x32xbf16>, vector<32x128xbf16>, vector<17x128xf32> -> vector<17x128xf32>
    %151 = arith.addf %130, %150 : vector<17x128xf32>
    %152 = arith.addf %30, %151 : vector<17x128xf32>
    %c0_61 = arith.constant 0 : index
    %c0_62 = arith.constant 0 : index
    %c0_63 = arith.constant 0 : index
    %153 = vector.load %arg11[%c0_61, %c0_62, %c0_63] : memref<2x1x128xf32, #tpu.memory_space<vmem>>, vector<1x1x128xf32>
    %154 = vector.shape_cast %153 : vector<1x1x128xf32> to vector<1x128xf32>
    %155 = vector.broadcast %154 : vector<1x128xf32> to vector<17x128xf32>
    %156 = arith.addf %152, %155 : vector<17x128xf32>
    %c0_64 = arith.constant 0 : index
    %c0_65 = arith.constant 0 : index
    %c0_66 = arith.constant 0 : index
    %157 = vector.load %arg12[%c0_64, %c0_65, %c0_66] : memref<2x1x128xf32, #tpu.memory_space<vmem>>, vector<1x1x128xf32>
    %158 = vector.shape_cast %157 : vector<1x1x128xf32> to vector<1x128xf32>
    %c0_67 = arith.constant 0 : index
    %c0_68 = arith.constant 0 : index
    %c0_69 = arith.constant 0 : index
    %159 = vector.load %arg13[%c0_67, %c0_68, %c0_69] : memref<2x1x128xf32, #tpu.memory_space<vmem>>, vector<1x1x128xf32>
    %160 = vector.shape_cast %159 : vector<1x1x128xf32> to vector<1x128xf32>
    %cst_70 = arith.constant dense<0.000000e+00> : vector<17xf32>
    %161 = vector.multi_reduction <add>, %156, %cst_70 [1] : vector<17x128xf32> to vector<17xf32>
    %162 = vector.shape_cast %161 : vector<17xf32> to vector<17x1xf32>
    %cst_71 = arith.constant 1.280000e+02 : f32
    %163 = vector.broadcast %cst_71 : f32 to vector<17x1xf32>
    %164 = arith.divf %162, %163 : vector<17x1xf32>
    %165 = vector.broadcast %164 : vector<17x1xf32> to vector<17x128xf32>
    %166 = arith.subf %156, %165 : vector<17x128xf32>
    %167 = arith.mulf %166, %166 : vector<17x128xf32>
    %cst_72 = arith.constant dense<0.000000e+00> : vector<17xf32>
    %168 = vector.multi_reduction <add>, %167, %cst_72 [1] : vector<17x128xf32> to vector<17xf32>
    %169 = vector.shape_cast %168 : vector<17xf32> to vector<17x1xf32>
    %cst_73 = arith.constant 1.280000e+02 : f32
    %170 = vector.broadcast %cst_73 : f32 to vector<17x1xf32>
    %171 = arith.divf %169, %170 : vector<17x1xf32>
    %172 = vector.broadcast %164 : vector<17x1xf32> to vector<17x128xf32>
    %173 = arith.subf %156, %172 : vector<17x128xf32>
    %cst_74 = arith.constant 9.99999974E-6 : f32
    %174 = vector.broadcast %cst_74 : f32 to vector<17x1xf32>
    %175 = arith.addf %171, %174 : vector<17x1xf32>
    %176 = math.rsqrt %175 : vector<17x1xf32>
    %177 = vector.broadcast %176 : vector<17x1xf32> to vector<17x128xf32>
    %178 = arith.mulf %173, %177 : vector<17x128xf32>
    %179 = vector.broadcast %158 : vector<1x128xf32> to vector<17x128xf32>
    %180 = arith.mulf %178, %179 : vector<17x128xf32>
    %181 = vector.broadcast %160 : vector<1x128xf32> to vector<17x128xf32>
    %182 = arith.addf %180, %181 : vector<17x128xf32>
    %183 = arith.truncf %182 : vector<17x128xf32> to vector<17x128xbf16>
    %c0_75 = arith.constant 0 : index
    %c0_76 = arith.constant 0 : index
    %c0_77 = arith.constant 0 : index
    %184 = vector.load %arg14[%c0_75, %c0_76, %c0_77] : memref<2x128x512xbf16, #tpu.memory_space<vmem>>, vector<1x128x512xbf16>
    %185 = vector.shape_cast %184 : vector<1x128x512xbf16> to vector<128x512xbf16>
    %cst_78 = arith.constant dense<0.000000e+00> : vector<17x512xf32>
    %186 = tpu.matmul %183, %185, %cst_78 {dimension_numbers = #tpu.dot_dimension_numbers<[1], [0], [0], [1], [0, 0, 1, 1], [], []>} : vector<17x128xbf16>, vector<128x512xbf16>, vector<17x512xf32> -> vector<17x512xf32>
    %c0_79 = arith.constant 0 : index
    %c0_80 = arith.constant 0 : index
    %c0_81 = arith.constant 0 : index
    %187 = vector.load %arg15[%c0_79, %c0_80, %c0_81] : memref<2x1x512xf32, #tpu.memory_space<vmem>>, vector<1x1x512xf32>
    %188 = vector.shape_cast %187 : vector<1x1x512xf32> to vector<1x512xf32>
    %189 = vector.broadcast %188 : vector<1x512xf32> to vector<17x512xf32>
    %190 = arith.addf %186, %189 : vector<17x512xf32>
    %cst_82 = arith.constant 1.702000e+00 : f32
    %191 = vector.broadcast %cst_82 : f32 to vector<17x512xf32>
    %192 = arith.mulf %191, %190 : vector<17x512xf32>
    %193 = arith.negf %192 : vector<17x512xf32>
    %194 = math.exp %193 : vector<17x512xf32>
    %cst_83 = arith.constant 1.000000e+00 : f32
    %195 = vector.broadcast %cst_83 : f32 to vector<17x512xf32>
    %196 = arith.addf %195, %194 : vector<17x512xf32>
    %197 = arith.divf %195, %196 : vector<17x512xf32>
    %198 = arith.mulf %190, %197 : vector<17x512xf32>
    %199 = arith.truncf %198 : vector<17x512xf32> to vector<17x512xbf16>
    %c0_84 = arith.constant 0 : index
    %c0_85 = arith.constant 0 : index
    %c0_86 = arith.constant 0 : index
    %200 = vector.load %arg16[%c0_84, %c0_85, %c0_86] : memref<2x512x128xbf16, #tpu.memory_space<vmem>>, vector<1x512x128xbf16>
    %201 = vector.shape_cast %200 : vector<1x512x128xbf16> to vector<512x128xbf16>
    %cst_87 = arith.constant dense<0.000000e+00> : vector<17x128xf32>
    %202 = tpu.matmul %199, %201, %cst_87 {dimension_numbers = #tpu.dot_dimension_numbers<[1], [0], [0], [1], [0, 0, 1, 1], [], []>} : vector<17x512xbf16>, vector<512x128xbf16>, vector<17x128xf32> -> vector<17x128xf32>
    %c0_88 = arith.constant 0 : index
    %c0_89 = arith.constant 0 : index
    %c0_90 = arith.constant 0 : index
    %203 = vector.load %arg17[%c0_88, %c0_89, %c0_90] : memref<2x1x128xf32, #tpu.memory_space<vmem>>, vector<1x1x128xf32>
    %204 = vector.shape_cast %203 : vector<1x1x128xf32> to vector<1x128xf32>
    %205 = vector.broadcast %204 : vector<1x128xf32> to vector<17x128xf32>
    %206 = arith.addf %202, %205 : vector<17x128xf32>
    %207 = arith.addf %156, %206 : vector<17x128xf32>
    %c1 = arith.constant 1 : index
    %c0_91 = arith.constant 0 : index
    %c0_92 = arith.constant 0 : index
    %208 = vector.load %arg6[%c1, %c0_91, %c0_92] : memref<2x1x128xf32, #tpu.memory_space<vmem>>, vector<1x1x128xf32>
    %209 = vector.shape_cast %208 : vector<1x1x128xf32> to vector<1x128xf32>
    %c1_93 = arith.constant 1 : index
    %c0_94 = arith.constant 0 : index
    %c0_95 = arith.constant 0 : index
    %210 = vector.load %arg7[%c1_93, %c0_94, %c0_95] : memref<2x1x128xf32, #tpu.memory_space<vmem>>, vector<1x1x128xf32>
    %211 = vector.shape_cast %210 : vector<1x1x128xf32> to vector<1x128xf32>
    %cst_96 = arith.constant dense<0.000000e+00> : vector<17xf32>
    %212 = vector.multi_reduction <add>, %207, %cst_96 [1] : vector<17x128xf32> to vector<17xf32>
    %213 = vector.shape_cast %212 : vector<17xf32> to vector<17x1xf32>
    %cst_97 = arith.constant 1.280000e+02 : f32
    %214 = vector.broadcast %cst_97 : f32 to vector<17x1xf32>
    %215 = arith.divf %213, %214 : vector<17x1xf32>
    %216 = vector.broadcast %215 : vector<17x1xf32> to vector<17x128xf32>
    %217 = arith.subf %207, %216 : vector<17x128xf32>
    %218 = arith.mulf %217, %217 : vector<17x128xf32>
    %cst_98 = arith.constant dense<0.000000e+00> : vector<17xf32>
    %219 = vector.multi_reduction <add>, %218, %cst_98 [1] : vector<17x128xf32> to vector<17xf32>
    %220 = vector.shape_cast %219 : vector<17xf32> to vector<17x1xf32>
    %cst_99 = arith.constant 1.280000e+02 : f32
    %221 = vector.broadcast %cst_99 : f32 to vector<17x1xf32>
    %222 = arith.divf %220, %221 : vector<17x1xf32>
    %223 = vector.broadcast %215 : vector<17x1xf32> to vector<17x128xf32>
    %224 = arith.subf %207, %223 : vector<17x128xf32>
    %cst_100 = arith.constant 9.99999974E-6 : f32
    %225 = vector.broadcast %cst_100 : f32 to vector<17x1xf32>
    %226 = arith.addf %222, %225 : vector<17x1xf32>
    %227 = math.rsqrt %226 : vector<17x1xf32>
    %228 = vector.broadcast %227 : vector<17x1xf32> to vector<17x128xf32>
    %229 = arith.mulf %224, %228 : vector<17x128xf32>
    %230 = vector.broadcast %209 : vector<1x128xf32> to vector<17x128xf32>
    %231 = arith.mulf %229, %230 : vector<17x128xf32>
    %232 = vector.broadcast %211 : vector<1x128xf32> to vector<17x128xf32>
    %233 = arith.addf %231, %232 : vector<17x128xf32>
    %234 = arith.truncf %233 : vector<17x128xf32> to vector<17x128xbf16>
    %c1_101 = arith.constant 1 : index
    %c0_102 = arith.constant 0 : index
    %c0_103 = arith.constant 0 : index
    %235 = vector.load %arg8[%c1_101, %c0_102, %c0_103] : memref<2x128x384xbf16, #tpu.memory_space<vmem>>, vector<1x128x384xbf16>
    %236 = vector.shape_cast %235 : vector<1x128x384xbf16> to vector<128x384xbf16>
    %cst_104 = arith.constant dense<0.000000e+00> : vector<17x384xf32>
    %237 = tpu.matmul %234, %236, %cst_104 {dimension_numbers = #tpu.dot_dimension_numbers<[1], [0], [0], [1], [0, 0, 1, 1], [], []>} : vector<17x128xbf16>, vector<128x384xbf16>, vector<17x384xf32> -> vector<17x384xf32>
    %c1_105 = arith.constant 1 : index
    %c0_106 = arith.constant 0 : index
    %c0_107 = arith.constant 0 : index
    %238 = vector.load %arg9[%c1_105, %c0_106, %c0_107] : memref<2x1x384xf32, #tpu.memory_space<vmem>>, vector<1x1x384xf32>
    %239 = vector.shape_cast %238 : vector<1x1x384xf32> to vector<1x384xf32>
    %240 = vector.broadcast %239 : vector<1x384xf32> to vector<17x384xf32>
    %241 = arith.addf %237, %240 : vector<17x384xf32>
    %c1_108 = arith.constant 1 : index
    %c0_109 = arith.constant 0 : index
    %c0_110 = arith.constant 0 : index
    %242 = vector.load %arg10[%c1_108, %c0_109, %c0_110] : memref<2x128x128xbf16, #tpu.memory_space<vmem>>, vector<1x128x128xbf16>
    %243 = vector.shape_cast %242 : vector<1x128x128xbf16> to vector<128x128xbf16>
    %cst_111 = arith.constant 0.000000e+00 : f32
    %244 = vector.broadcast %cst_111 : f32 to vector<17x128xf32>
    %245 = vector.extract_strided_slice %241 {offsets = [0, 0], sizes = [17, 32], strides = [1, 1]} : vector<17x384xf32> to vector<17x32xf32>
    %246 = vector.extract_strided_slice %241 {offsets = [0, 128], sizes = [17, 32], strides = [1, 1]} : vector<17x384xf32> to vector<17x32xf32>
    %247 = vector.extract_strided_slice %241 {offsets = [0, 256], sizes = [17, 32], strides = [1, 1]} : vector<17x384xf32> to vector<17x32xf32>
    %cst_112 = arith.constant dense<0.000000e+00> : vector<17x17xf32>
    %248 = tpu.matmul %245, %246, %cst_112 {dimension_numbers = #tpu.dot_dimension_numbers<[1], [1], [0], [0], [0, 0, 1, 0], [], []>} : vector<17x32xf32>, vector<17x32xf32>, vector<17x17xf32> -> vector<17x17xf32>
    %cst_113 = arith.constant 0.176776692 : f32
    %249 = vector.broadcast %cst_113 : f32 to vector<17x17xf32>
    %250 = arith.mulf %248, %249 : vector<17x17xf32>
    %cst_114 = arith.constant dense<0xFF800000> : vector<17xf32>
    %251 = vector.multi_reduction <maximumf>, %250, %cst_114 [1] : vector<17x17xf32> to vector<17xf32>
    %252 = vector.shape_cast %251 : vector<17xf32> to vector<17x1xf32>
    %253 = vector.broadcast %252 : vector<17x1xf32> to vector<17x17xf32>
    %254 = arith.subf %250, %253 : vector<17x17xf32>
    %255 = math.exp %254 : vector<17x17xf32>
    %cst_115 = arith.constant dense<0.000000e+00> : vector<17xf32>
    %256 = vector.multi_reduction <add>, %255, %cst_115 [1] : vector<17x17xf32> to vector<17xf32>
    %257 = vector.shape_cast %256 : vector<17xf32> to vector<17x1xf32>
    %258 = tpu.reciprocal %257 {approx = true} : vector<17x1xf32> -> vector<17x1xf32>
    %259 = vector.broadcast %258 : vector<17x1xf32> to vector<17x17xf32>
    %260 = arith.mulf %255, %259 : vector<17x17xf32>
    %cst_116 = arith.constant dense<0.000000e+00> : vector<17x32xf32>
    %261 = tpu.matmul %260, %247, %cst_116 {dimension_numbers = #tpu.dot_dimension_numbers<[1], [0], [0], [1], [0, 0, 1, 1], [], []>} : vector<17x17xf32>, vector<17x32xf32>, vector<17x32xf32> -> vector<17x32xf32>
    %262 = arith.truncf %261 : vector<17x32xf32> to vector<17x32xbf16>
    %263 = vector.extract_strided_slice %243 {offsets = [0, 0], sizes = [32, 128], strides = [1, 1]} : vector<128x128xbf16> to vector<32x128xbf16>
    %cst_117 = arith.constant dense<0.000000e+00> : vector<17x128xf32>
    %264 = tpu.matmul %262, %263, %cst_117 {dimension_numbers = #tpu.dot_dimension_numbers<[1], [0], [0], [1], [0, 0, 1, 1], [], []>} : vector<17x32xbf16>, vector<32x128xbf16>, vector<17x128xf32> -> vector<17x128xf32>
    %265 = arith.addf %244, %264 : vector<17x128xf32>
    %266 = vector.extract_strided_slice %241 {offsets = [0, 32], sizes = [17, 32], strides = [1, 1]} : vector<17x384xf32> to vector<17x32xf32>
    %267 = vector.extract_strided_slice %241 {offsets = [0, 160], sizes = [17, 32], strides = [1, 1]} : vector<17x384xf32> to vector<17x32xf32>
    %268 = vector.extract_strided_slice %241 {offsets = [0, 288], sizes = [17, 32], strides = [1, 1]} : vector<17x384xf32> to vector<17x32xf32>
    %cst_118 = arith.constant dense<0.000000e+00> : vector<17x17xf32>
    %269 = tpu.matmul %266, %267, %cst_118 {dimension_numbers = #tpu.dot_dimension_numbers<[1], [1], [0], [0], [0, 0, 1, 0], [], []>} : vector<17x32xf32>, vector<17x32xf32>, vector<17x17xf32> -> vector<17x17xf32>
    %cst_119 = arith.constant 0.176776692 : f32
    %270 = vector.broadcast %cst_119 : f32 to vector<17x17xf32>
    %271 = arith.mulf %269, %270 : vector<17x17xf32>
    %cst_120 = arith.constant dense<0xFF800000> : vector<17xf32>
    %272 = vector.multi_reduction <maximumf>, %271, %cst_120 [1] : vector<17x17xf32> to vector<17xf32>
    %273 = vector.shape_cast %272 : vector<17xf32> to vector<17x1xf32>
    %274 = vector.broadcast %273 : vector<17x1xf32> to vector<17x17xf32>
    %275 = arith.subf %271, %274 : vector<17x17xf32>
    %276 = math.exp %275 : vector<17x17xf32>
    %cst_121 = arith.constant dense<0.000000e+00> : vector<17xf32>
    %277 = vector.multi_reduction <add>, %276, %cst_121 [1] : vector<17x17xf32> to vector<17xf32>
    %278 = vector.shape_cast %277 : vector<17xf32> to vector<17x1xf32>
    %279 = tpu.reciprocal %278 {approx = true} : vector<17x1xf32> -> vector<17x1xf32>
    %280 = vector.broadcast %279 : vector<17x1xf32> to vector<17x17xf32>
    %281 = arith.mulf %276, %280 : vector<17x17xf32>
    %cst_122 = arith.constant dense<0.000000e+00> : vector<17x32xf32>
    %282 = tpu.matmul %281, %268, %cst_122 {dimension_numbers = #tpu.dot_dimension_numbers<[1], [0], [0], [1], [0, 0, 1, 1], [], []>} : vector<17x17xf32>, vector<17x32xf32>, vector<17x32xf32> -> vector<17x32xf32>
    %283 = arith.truncf %282 : vector<17x32xf32> to vector<17x32xbf16>
    %284 = vector.extract_strided_slice %243 {offsets = [32, 0], sizes = [32, 128], strides = [1, 1]} : vector<128x128xbf16> to vector<32x128xbf16>
    %cst_123 = arith.constant dense<0.000000e+00> : vector<17x128xf32>
    %285 = tpu.matmul %283, %284, %cst_123 {dimension_numbers = #tpu.dot_dimension_numbers<[1], [0], [0], [1], [0, 0, 1, 1], [], []>} : vector<17x32xbf16>, vector<32x128xbf16>, vector<17x128xf32> -> vector<17x128xf32>
    %286 = arith.addf %265, %285 : vector<17x128xf32>
    %287 = vector.extract_strided_slice %241 {offsets = [0, 64], sizes = [17, 32], strides = [1, 1]} : vector<17x384xf32> to vector<17x32xf32>
    %288 = vector.extract_strided_slice %241 {offsets = [0, 192], sizes = [17, 32], strides = [1, 1]} : vector<17x384xf32> to vector<17x32xf32>
    %289 = vector.extract_strided_slice %241 {offsets = [0, 320], sizes = [17, 32], strides = [1, 1]} : vector<17x384xf32> to vector<17x32xf32>
    %cst_124 = arith.constant dense<0.000000e+00> : vector<17x17xf32>
    %290 = tpu.matmul %287, %288, %cst_124 {dimension_numbers = #tpu.dot_dimension_numbers<[1], [1], [0], [0], [0, 0, 1, 0], [], []>} : vector<17x32xf32>, vector<17x32xf32>, vector<17x17xf32> -> vector<17x17xf32>
    %cst_125 = arith.constant 0.176776692 : f32
    %291 = vector.broadcast %cst_125 : f32 to vector<17x17xf32>
    %292 = arith.mulf %290, %291 : vector<17x17xf32>
    %cst_126 = arith.constant dense<0xFF800000> : vector<17xf32>
    %293 = vector.multi_reduction <maximumf>, %292, %cst_126 [1] : vector<17x17xf32> to vector<17xf32>
    %294 = vector.shape_cast %293 : vector<17xf32> to vector<17x1xf32>
    %295 = vector.broadcast %294 : vector<17x1xf32> to vector<17x17xf32>
    %296 = arith.subf %292, %295 : vector<17x17xf32>
    %297 = math.exp %296 : vector<17x17xf32>
    %cst_127 = arith.constant dense<0.000000e+00> : vector<17xf32>
    %298 = vector.multi_reduction <add>, %297, %cst_127 [1] : vector<17x17xf32> to vector<17xf32>
    %299 = vector.shape_cast %298 : vector<17xf32> to vector<17x1xf32>
    %300 = tpu.reciprocal %299 {approx = true} : vector<17x1xf32> -> vector<17x1xf32>
    %301 = vector.broadcast %300 : vector<17x1xf32> to vector<17x17xf32>
    %302 = arith.mulf %297, %301 : vector<17x17xf32>
    %cst_128 = arith.constant dense<0.000000e+00> : vector<17x32xf32>
    %303 = tpu.matmul %302, %289, %cst_128 {dimension_numbers = #tpu.dot_dimension_numbers<[1], [0], [0], [1], [0, 0, 1, 1], [], []>} : vector<17x17xf32>, vector<17x32xf32>, vector<17x32xf32> -> vector<17x32xf32>
    %304 = arith.truncf %303 : vector<17x32xf32> to vector<17x32xbf16>
    %305 = vector.extract_strided_slice %243 {offsets = [64, 0], sizes = [32, 128], strides = [1, 1]} : vector<128x128xbf16> to vector<32x128xbf16>
    %cst_129 = arith.constant dense<0.000000e+00> : vector<17x128xf32>
    %306 = tpu.matmul %304, %305, %cst_129 {dimension_numbers = #tpu.dot_dimension_numbers<[1], [0], [0], [1], [0, 0, 1, 1], [], []>} : vector<17x32xbf16>, vector<32x128xbf16>, vector<17x128xf32> -> vector<17x128xf32>
    %307 = arith.addf %286, %306 : vector<17x128xf32>
    %308 = vector.extract_strided_slice %241 {offsets = [0, 96], sizes = [17, 32], strides = [1, 1]} : vector<17x384xf32> to vector<17x32xf32>
    %309 = vector.extract_strided_slice %241 {offsets = [0, 224], sizes = [17, 32], strides = [1, 1]} : vector<17x384xf32> to vector<17x32xf32>
    %310 = vector.extract_strided_slice %241 {offsets = [0, 352], sizes = [17, 32], strides = [1, 1]} : vector<17x384xf32> to vector<17x32xf32>
    %cst_130 = arith.constant dense<0.000000e+00> : vector<17x17xf32>
    %311 = tpu.matmul %308, %309, %cst_130 {dimension_numbers = #tpu.dot_dimension_numbers<[1], [1], [0], [0], [0, 0, 1, 0], [], []>} : vector<17x32xf32>, vector<17x32xf32>, vector<17x17xf32> -> vector<17x17xf32>
    %cst_131 = arith.constant 0.176776692 : f32
    %312 = vector.broadcast %cst_131 : f32 to vector<17x17xf32>
    %313 = arith.mulf %311, %312 : vector<17x17xf32>
    %cst_132 = arith.constant dense<0xFF800000> : vector<17xf32>
    %314 = vector.multi_reduction <maximumf>, %313, %cst_132 [1] : vector<17x17xf32> to vector<17xf32>
    %315 = vector.shape_cast %314 : vector<17xf32> to vector<17x1xf32>
    %316 = vector.broadcast %315 : vector<17x1xf32> to vector<17x17xf32>
    %317 = arith.subf %313, %316 : vector<17x17xf32>
    %318 = math.exp %317 : vector<17x17xf32>
    %cst_133 = arith.constant dense<0.000000e+00> : vector<17xf32>
    %319 = vector.multi_reduction <add>, %318, %cst_133 [1] : vector<17x17xf32> to vector<17xf32>
    %320 = vector.shape_cast %319 : vector<17xf32> to vector<17x1xf32>
    %321 = tpu.reciprocal %320 {approx = true} : vector<17x1xf32> -> vector<17x1xf32>
    %322 = vector.broadcast %321 : vector<17x1xf32> to vector<17x17xf32>
    %323 = arith.mulf %318, %322 : vector<17x17xf32>
    %cst_134 = arith.constant dense<0.000000e+00> : vector<17x32xf32>
    %324 = tpu.matmul %323, %310, %cst_134 {dimension_numbers = #tpu.dot_dimension_numbers<[1], [0], [0], [1], [0, 0, 1, 1], [], []>} : vector<17x17xf32>, vector<17x32xf32>, vector<17x32xf32> -> vector<17x32xf32>
    %325 = arith.truncf %324 : vector<17x32xf32> to vector<17x32xbf16>
    %326 = vector.extract_strided_slice %243 {offsets = [96, 0], sizes = [32, 128], strides = [1, 1]} : vector<128x128xbf16> to vector<32x128xbf16>
    %cst_135 = arith.constant dense<0.000000e+00> : vector<17x128xf32>
    %327 = tpu.matmul %325, %326, %cst_135 {dimension_numbers = #tpu.dot_dimension_numbers<[1], [0], [0], [1], [0, 0, 1, 1], [], []>} : vector<17x32xbf16>, vector<32x128xbf16>, vector<17x128xf32> -> vector<17x128xf32>
    %328 = arith.addf %307, %327 : vector<17x128xf32>
    %329 = arith.addf %207, %328 : vector<17x128xf32>
    %c1_136 = arith.constant 1 : index
    %c0_137 = arith.constant 0 : index
    %c0_138 = arith.constant 0 : index
    %330 = vector.load %arg11[%c1_136, %c0_137, %c0_138] : memref<2x1x128xf32, #tpu.memory_space<vmem>>, vector<1x1x128xf32>
    %331 = vector.shape_cast %330 : vector<1x1x128xf32> to vector<1x128xf32>
    %332 = vector.broadcast %331 : vector<1x128xf32> to vector<17x128xf32>
    %333 = arith.addf %329, %332 : vector<17x128xf32>
    %c1_139 = arith.constant 1 : index
    %c0_140 = arith.constant 0 : index
    %c0_141 = arith.constant 0 : index
    %334 = vector.load %arg12[%c1_139, %c0_140, %c0_141] : memref<2x1x128xf32, #tpu.memory_space<vmem>>, vector<1x1x128xf32>
    %335 = vector.shape_cast %334 : vector<1x1x128xf32> to vector<1x128xf32>
    %c1_142 = arith.constant 1 : index
    %c0_143 = arith.constant 0 : index
    %c0_144 = arith.constant 0 : index
    %336 = vector.load %arg13[%c1_142, %c0_143, %c0_144] : memref<2x1x128xf32, #tpu.memory_space<vmem>>, vector<1x1x128xf32>
    %337 = vector.shape_cast %336 : vector<1x1x128xf32> to vector<1x128xf32>
    %cst_145 = arith.constant dense<0.000000e+00> : vector<17xf32>
    %338 = vector.multi_reduction <add>, %333, %cst_145 [1] : vector<17x128xf32> to vector<17xf32>
    %339 = vector.shape_cast %338 : vector<17xf32> to vector<17x1xf32>
    %cst_146 = arith.constant 1.280000e+02 : f32
    %340 = vector.broadcast %cst_146 : f32 to vector<17x1xf32>
    %341 = arith.divf %339, %340 : vector<17x1xf32>
    %342 = vector.broadcast %341 : vector<17x1xf32> to vector<17x128xf32>
    %343 = arith.subf %333, %342 : vector<17x128xf32>
    %344 = arith.mulf %343, %343 : vector<17x128xf32>
    %cst_147 = arith.constant dense<0.000000e+00> : vector<17xf32>
    %345 = vector.multi_reduction <add>, %344, %cst_147 [1] : vector<17x128xf32> to vector<17xf32>
    %346 = vector.shape_cast %345 : vector<17xf32> to vector<17x1xf32>
    %cst_148 = arith.constant 1.280000e+02 : f32
    %347 = vector.broadcast %cst_148 : f32 to vector<17x1xf32>
    %348 = arith.divf %346, %347 : vector<17x1xf32>
    %349 = vector.broadcast %341 : vector<17x1xf32> to vector<17x128xf32>
    %350 = arith.subf %333, %349 : vector<17x128xf32>
    %cst_149 = arith.constant 9.99999974E-6 : f32
    %351 = vector.broadcast %cst_149 : f32 to vector<17x1xf32>
    %352 = arith.addf %348, %351 : vector<17x1xf32>
    %353 = math.rsqrt %352 : vector<17x1xf32>
    %354 = vector.broadcast %353 : vector<17x1xf32> to vector<17x128xf32>
    %355 = arith.mulf %350, %354 : vector<17x128xf32>
    %356 = vector.broadcast %335 : vector<1x128xf32> to vector<17x128xf32>
    %357 = arith.mulf %355, %356 : vector<17x128xf32>
    %358 = vector.broadcast %337 : vector<1x128xf32> to vector<17x128xf32>
    %359 = arith.addf %357, %358 : vector<17x128xf32>
    %360 = arith.truncf %359 : vector<17x128xf32> to vector<17x128xbf16>
    %c1_150 = arith.constant 1 : index
    %c0_151 = arith.constant 0 : index
    %c0_152 = arith.constant 0 : index
    %361 = vector.load %arg14[%c1_150, %c0_151, %c0_152] : memref<2x128x512xbf16, #tpu.memory_space<vmem>>, vector<1x128x512xbf16>
    %362 = vector.shape_cast %361 : vector<1x128x512xbf16> to vector<128x512xbf16>
    %cst_153 = arith.constant dense<0.000000e+00> : vector<17x512xf32>
    %363 = tpu.matmul %360, %362, %cst_153 {dimension_numbers = #tpu.dot_dimension_numbers<[1], [0], [0], [1], [0, 0, 1, 1], [], []>} : vector<17x128xbf16>, vector<128x512xbf16>, vector<17x512xf32> -> vector<17x512xf32>
    %c1_154 = arith.constant 1 : index
    %c0_155 = arith.constant 0 : index
    %c0_156 = arith.constant 0 : index
    %364 = vector.load %arg15[%c1_154, %c0_155, %c0_156] : memref<2x1x512xf32, #tpu.memory_space<vmem>>, vector<1x1x512xf32>
    %365 = vector.shape_cast %364 : vector<1x1x512xf32> to vector<1x512xf32>
    %366 = vector.broadcast %365 : vector<1x512xf32> to vector<17x512xf32>
    %367 = arith.addf %363, %366 : vector<17x512xf32>
    %cst_157 = arith.constant 1.702000e+00 : f32
    %368 = vector.broadcast %cst_157 : f32 to vector<17x512xf32>
    %369 = arith.mulf %368, %367 : vector<17x512xf32>
    %370 = arith.negf %369 : vector<17x512xf32>
    %371 = math.exp %370 : vector<17x512xf32>
    %cst_158 = arith.constant 1.000000e+00 : f32
    %372 = vector.broadcast %cst_158 : f32 to vector<17x512xf32>
    %373 = arith.addf %372, %371 : vector<17x512xf32>
    %374 = arith.divf %372, %373 : vector<17x512xf32>
    %375 = arith.mulf %367, %374 : vector<17x512xf32>
    %376 = arith.truncf %375 : vector<17x512xf32> to vector<17x512xbf16>
    %c1_159 = arith.constant 1 : index
    %c0_160 = arith.constant 0 : index
    %c0_161 = arith.constant 0 : index
    %377 = vector.load %arg16[%c1_159, %c0_160, %c0_161] : memref<2x512x128xbf16, #tpu.memory_space<vmem>>, vector<1x512x128xbf16>
    %378 = vector.shape_cast %377 : vector<1x512x128xbf16> to vector<512x128xbf16>
    %cst_162 = arith.constant dense<0.000000e+00> : vector<17x128xf32>
    %379 = tpu.matmul %376, %378, %cst_162 {dimension_numbers = #tpu.dot_dimension_numbers<[1], [0], [0], [1], [0, 0, 1, 1], [], []>} : vector<17x512xbf16>, vector<512x128xbf16>, vector<17x128xf32> -> vector<17x128xf32>
    %c1_163 = arith.constant 1 : index
    %c0_164 = arith.constant 0 : index
    %c0_165 = arith.constant 0 : index
    %380 = vector.load %arg17[%c1_163, %c0_164, %c0_165] : memref<2x1x128xf32, #tpu.memory_space<vmem>>, vector<1x1x128xf32>
    %381 = vector.shape_cast %380 : vector<1x1x128xf32> to vector<1x128xf32>
    %382 = vector.broadcast %381 : vector<1x128xf32> to vector<17x128xf32>
    %383 = arith.addf %379, %382 : vector<17x128xf32>
    %384 = arith.addf %333, %383 : vector<17x128xf32>
    %cst_166 = arith.constant dense<0.000000e+00> : vector<128xf32>
    %385 = vector.multi_reduction <add>, %384, %cst_166 [0] : vector<17x128xf32> to vector<128xf32>
    %386 = vector.shape_cast %385 : vector<128xf32> to vector<1x128xf32>
    %387 = vector.extract_strided_slice %384 {offsets = [0, 0], sizes = [1, 128], strides = [1, 1]} : vector<17x128xf32> to vector<1x128xf32>
    %388 = arith.subf %386, %387 : vector<1x128xf32>
    %cst_167 = arith.constant 6.250000e-02 : f32
    %389 = vector.broadcast %cst_167 : f32 to vector<1x128xf32>
    %390 = arith.mulf %388, %389 : vector<1x128xf32>
    %391 = arith.truncf %390 : vector<1x128xf32> to vector<1x128xbf16>
    %c0_168 = arith.constant 0 : index
    %c0_169 = arith.constant 0 : index
    %392 = vector.load %arg18[%c0_168, %c0_169] : memref<128x256xbf16, #tpu.memory_space<vmem>>, vector<128x256xbf16>
    %cst_170 = arith.constant dense<0.000000e+00> : vector<1x256xf32>
    %393 = tpu.matmul %391, %392, %cst_170 {dimension_numbers = #tpu.dot_dimension_numbers<[1], [0], [0], [1], [0, 0, 1, 1], [], []>} : vector<1x128xbf16>, vector<128x256xbf16>, vector<1x256xf32> -> vector<1x256xf32>
    %c0_171 = arith.constant 0 : index
    %c0_172 = arith.constant 0 : index
    %394 = vector.load %arg19[%c0_171, %c0_172] : memref<1x256xf32, #tpu.memory_space<vmem>>, vector<1x256xf32>
    %395 = arith.addf %393, %394 : vector<1x256xf32>
    %396 = arith.truncf %395 : vector<1x256xf32> to vector<1x256xbf16>
    %c0_173 = arith.constant 0 : index
    %c0_174 = arith.constant 0 : index
    %397 = vector.load %arg20[%c0_173, %c0_174] : memref<256x128xbf16, #tpu.memory_space<vmem>>, vector<256x128xbf16>
    %cst_175 = arith.constant dense<0.000000e+00> : vector<1x128xf32>
    %398 = tpu.matmul %396, %397, %cst_175 {dimension_numbers = #tpu.dot_dimension_numbers<[1], [0], [0], [1], [0, 0, 1, 1], [], []>} : vector<1x256xbf16>, vector<256x128xbf16>, vector<1x128xf32> -> vector<1x128xf32>
    %c0_176 = arith.constant 0 : index
    %c0_177 = arith.constant 0 : index
    %399 = vector.load %arg21[%c0_176, %c0_177] : memref<1x128xf32, #tpu.memory_space<vmem>>, vector<1x128xf32>
    %400 = arith.addf %398, %399 : vector<1x128xf32>
    %c0_178 = arith.constant 0 : index
    %c0_179 = arith.constant 0 : index
    %c0_180 = arith.constant 0 : index
    %401 = vector.load %arg22[%c0_178, %c0_179, %c0_180] : memref<1x1x128xf32, #tpu.memory_space<vmem>>, vector<1x1x128xf32>
    %402 = vector.shape_cast %401 : vector<1x1x128xf32> to vector<1x128xf32>
    %403 = vector.shape_cast %400 : vector<1x128xf32> to vector<1x1x128xf32>
    tpu.vector_store %arg22[%c0_178, %c0_179, %c0_180], %403 {strides = array<i32>} : memref<1x1x128xf32, #tpu.memory_space<vmem>>, vector<1x1x128xf32>,
    return
  }
  func.func @transform_0(%arg0: i32) -> (i32, i32, i32) {
    %c0_i32 = arith.constant 0 : i32
    %c0_i32_0 = arith.constant 0 : i32
    %c0_i32_1 = arith.constant 0 : i32
    return %arg0, %c0_i32, %c0_i32_0 : i32, i32, i32
  }
  func.func @transform_1(%arg0: i32) -> (i32, i32) {
    %c0_i32 = arith.constant 0 : i32
    %c0_i32_0 = arith.constant 0 : i32
    %c0_i32_1 = arith.constant 0 : i32
    return %c0_i32, %c0_i32_0 : i32, i32
  }
  func.func @transform_2(%arg0: i32) -> (i32, i32) {
    %c0_i32 = arith.constant 0 : i32
    %c0_i32_0 = arith.constant 0 : i32
    %c0_i32_1 = arith.constant 0 : i32
    return %c0_i32, %c0_i32_0 : i32, i32
  }
  func.func @transform_3(%arg0: i32) -> (i32, i32) {
    %c0_i32 = arith.constant 0 : i32
    %c0_i32_0 = arith.constant 0 : i32
    %c0_i32_1 = arith.constant 0 : i32
    return %c0_i32, %c0_i32_0 : i32, i32
  }
  func.func @transform_4(%arg0: i32) -> (i32, i32) {
    %c0_i32 = arith.constant 0 : i32
    %c0_i32_0 = arith.constant 0 : i32
    %c0_i32_1 = arith.constant 0 : i32
    return %c0_i32, %c0_i32_0 : i32, i32
  }
  func.func @transform_5(%arg0: i32) -> (i32, i32, i32) {
    %c0_i32 = arith.constant 0 : i32
    %c0_i32_0 = arith.constant 0 : i32
    %c0_i32_1 = arith.constant 0 : i32
    %c0_i32_2 = arith.constant 0 : i32
    return %c0_i32, %c0_i32_0, %c0_i32_1 : i32, i32, i32
  }
  func.func @transform_6(%arg0: i32) -> (i32, i32, i32) {
    %c0_i32 = arith.constant 0 : i32
    %c0_i32_0 = arith.constant 0 : i32
    %c0_i32_1 = arith.constant 0 : i32
    %c0_i32_2 = arith.constant 0 : i32
    return %c0_i32, %c0_i32_0, %c0_i32_1 : i32, i32, i32
  }
  func.func @transform_7(%arg0: i32) -> (i32, i32, i32) {
    %c0_i32 = arith.constant 0 : i32
    %c0_i32_0 = arith.constant 0 : i32
    %c0_i32_1 = arith.constant 0 : i32
    %c0_i32_2 = arith.constant 0 : i32
    return %c0_i32, %c0_i32_0, %c0_i32_1 : i32, i32, i32
  }
  func.func @transform_8(%arg0: i32) -> (i32, i32, i32) {
    %c0_i32 = arith.constant 0 : i32
    %c0_i32_0 = arith.constant 0 : i32
    %c0_i32_1 = arith.constant 0 : i32
    %c0_i32_2 = arith.constant 0 : i32
    return %c0_i32, %c0_i32_0, %c0_i32_1 : i32, i32, i32
  }
  func.func @transform_9(%arg0: i32) -> (i32, i32, i32) {
    %c0_i32 = arith.constant 0 : i32
    %c0_i32_0 = arith.constant 0 : i32
    %c0_i32_1 = arith.constant 0 : i32
    %c0_i32_2 = arith.constant 0 : i32
    return %c0_i32, %c0_i32_0, %c0_i32_1 : i32, i32, i32
  }
  func.func @transform_10(%arg0: i32) -> (i32, i32, i32) {
    %c0_i32 = arith.constant 0 : i32
    %c0_i32_0 = arith.constant 0 : i32
    %c0_i32_1 = arith.constant 0 : i32
    %c0_i32_2 = arith.constant 0 : i32
    return %c0_i32, %c0_i32_0, %c0_i32_1 : i32, i32, i32
  }
  func.func @transform_11(%arg0: i32) -> (i32, i32, i32) {
    %c0_i32 = arith.constant 0 : i32
    %c0_i32_0 = arith.constant 0 : i32
    %c0_i32_1 = arith.constant 0 : i32
    %c0_i32_2 = arith.constant 0 : i32
    return %c0_i32, %c0_i32_0, %c0_i32_1 : i32, i32, i32
  }
  func.func @transform_12(%arg0: i32) -> (i32, i32, i32) {
    %c0_i32 = arith.constant 0 : i32
    %c0_i32_0 = arith.constant 0 : i32
    %c0_i32_1 = arith.constant 0 : i32
    %c0_i32_2 = arith.constant 0 : i32
    return %c0_i32, %c0_i32_0, %c0_i32_1 : i32, i32, i32
  }
  func.func @transform_13(%arg0: i32) -> (i32, i32, i32) {
    %c0_i32 = arith.constant 0 : i32
    %c0_i32_0 = arith.constant 0 : i32
    %c0_i32_1 = arith.constant 0 : i32
    %c0_i32_2 = arith.constant 0 : i32
    return %c0_i32, %c0_i32_0, %c0_i32_1 : i32, i32, i32
  }
  func.func @transform_14(%arg0: i32) -> (i32, i32, i32) {
    %c0_i32 = arith.constant 0 : i32
    %c0_i32_0 = arith.constant 0 : i32
    %c0_i32_1 = arith.constant 0 : i32
    %c0_i32_2 = arith.constant 0 : i32
    return %c0_i32, %c0_i32_0, %c0_i32_1 : i32, i32, i32
  }
  func.func @transform_15(%arg0: i32) -> (i32, i32, i32) {
    %c0_i32 = arith.constant 0 : i32
    %c0_i32_0 = arith.constant 0 : i32
    %c0_i32_1 = arith.constant 0 : i32
    %c0_i32_2 = arith.constant 0 : i32
    return %c0_i32, %c0_i32_0, %c0_i32_1 : i32, i32, i32
  }
  func.func @transform_16(%arg0: i32) -> (i32, i32, i32) {
    %c0_i32 = arith.constant 0 : i32
    %c0_i32_0 = arith.constant 0 : i32
    %c0_i32_1 = arith.constant 0 : i32
    %c0_i32_2 = arith.constant 0 : i32
    return %c0_i32, %c0_i32_0, %c0_i32_1 : i32, i32, i32
  }
  func.func @transform_17(%arg0: i32) -> (i32, i32) {
    %c0_i32 = arith.constant 0 : i32
    %c0_i32_0 = arith.constant 0 : i32
    %c0_i32_1 = arith.constant 0 : i32
    return %c0_i32, %c0_i32_0 : i32, i32
  }
  func.func @transform_18(%arg0: i32) -> (i32, i32) {
    %c0_i32 = arith.constant 0 : i32
    %c0_i32_0 = arith.constant 0 : i32
    %c0_i32_1 = arith.constant 0 : i32
    return %c0_i32, %c0_i32_0 : i32, i32
  }
  func.func @transform_19(%arg0: i32) -> (i32, i32) {
    %c0_i32 = arith.constant 0 : i32
    %c0_i32_0 = arith.constant 0 : i32
    %c0_i32_1 = arith.constant 0 : i32
    return %c0_i32, %c0_i32_0 : i32, i32
  }
  func.func @transform_20(%arg0: i32) -> (i32, i32) {
    %c0_i32 = arith.constant 0 : i32
    %c0_i32_0 = arith.constant 0 : i32
    %c0_i32_1 = arith.constant 0 : i32
    return %c0_i32, %c0_i32_0 : i32, i32
  }
  func.func @transform_21(%arg0: i32) -> (i32, i32, i32) {
    %c0_i32 = arith.constant 0 : i32
    %c0_i32_0 = arith.constant 0 : i32
    %c0_i32_1 = arith.constant 0 : i32
    return %arg0, %c0_i32, %c0_i32_0 : i32, i32, i32
  }
}

</mosaic_0001>

<bundles_post_ra>
// kernel: _forward_adapter.1
= control target key start
LH: loop header
LB: loop body
LE: loop exit
PB: predicated region body
PF: predicated region fallthrough
CT: control target
= control target key end

     0   :  { %s10718_s0 = inlined_call_operand.hbm [shape: f32[2,17,48], index: 0, kind: input, shape index: {}]   ;;  %s10719_s1 = inlined_call_operand.hbm [shape: bf16[48,128], index: 1, kind: input, shape index: {}]   ;;  %s10720_s2 = inlined_call_operand.hbm [shape: f32[17,128], index: 2, kind: input, shape index: {}]   ;;  %s10721_s3 = inlined_call_operand.hbm [shape: f32[1,128], index: 3, kind: input, shape index: {}]   ;;  %s10722_s4 = inlined_call_operand.hbm [shape: f32[1,128], index: 4, kind: input, shape index: {}]   ;;  %s10723_s5 = inlined_call_operand.hbm [shape: f32[2,1,128], index: 5, kind: input, shape index: {}]   ;;  %s10724_s6 = inlined_call_operand.hbm [shape: f32[2,1,128], index: 6, kind: input, shape index: {}]   ;;  %s10725_s7 = inlined_call_operand.hbm [shape: bf16[2,128,384], index: 7, kind: input, shape index: {}]   ;;  %s10726_s8 = inlined_call_operand.hbm [shape: f32[2,1,384], index: 8, kind: input, shape index: {}]   ;;  %s10727_s9 = inlined_call_operand.hbm [shape: bf16[2,128,128], index: 9, kind: input, shape index: {}]   ;;  %s10728_s10 = inlined_call_operand.hbm [shape: f32[2,1,128], index: 10, kind: input, shape index: {}]   ;;  %s10729_s11 = inlined_call_operand.hbm [shape: f32[2,1,128], index: 11, kind: input, shape index: {}]   ;;  %s10730_s12 = inlined_call_operand.hbm [shape: f32[2,1,128], index: 12, kind: input, shape index: {}]   ;;  %s10731_s13 = inlined_call_operand.hbm [shape: bf16[2,128,512], index: 13, kind: input, shape index: {}]   ;;  %s10732_s14 = inlined_call_operand.hbm [shape: f32[2,1,512], index: 14, kind: input, shape index: {}]   ;;  %s10733_s15 = inlined_call_operand.hbm [shape: bf16[2,512,128], index: 15, kind: input, shape index: {}]   ;;  %s10734_s16 = inlined_call_operand.hbm [shape: f32[2,1,128], index: 16, kind: input, shape index: {}]   ;;  %s10735_s17 = inlined_call_operand.hbm [shape: bf16[128,256], index: 17, kind: input, shape index: {}]   ;;  %s10736_s18 = inlined_call_operand.hbm [shape: f32[1,256], index: 18, kind: input, shape index: {}]   ;;  %s10737_s19 = inlined_call_operand.hbm [shape: bf16[256,128], index: 19, kind: input, shape index: {}]   ;;  %s10738_s20 = inlined_call_operand.hbm [shape: f32[1,128], index: 20, kind: input, shape index: {}]   ;;  %s10739_s21 = inlined_call_operand.hbm [shape: f32[2,1,128], index: 21, kind: output, shape index: {}]  }
   0x1   :  { %10775 = sst [smem:[#allocation54_spill]] %s10718_s0 }
   0x2   :  { %10776 = sst [smem:[#allocation55_spill]] %s10719_s1 }
   0x3   :  { %10777 = sst [smem:[#allocation56_spill]] %s10720_s2 }
   0x4   :  { %10778 = sst [smem:[#allocation57_spill]] %s10721_s3 }
   0x5   :  { %10779 = sst [smem:[#allocation58_spill]] %s10722_s4 }
   0x6   :  { %10780 = sst [smem:[#allocation59_spill]] %s10723_s5 }
   0x7   :  { %10781 = sst [smem:[#allocation60_spill]] %s10724_s6 }
   0x8   :  { %10782 = sst [smem:[#allocation61_spill]] %s10725_s7 }
   0x9   :  { %10783 = sst [smem:[#allocation62_spill]] %s10727_s9 }
   0xa   :  { %10784 = sst [smem:[#allocation63_spill]] %s10729_s11 }
   0xb   :  { %10785 = sst [smem:[#allocation64_spill]] %s10731_s13 }
   0xc   :  { %10786 = sst [smem:[#allocation65_spill]] %s10733_s15 }
   0xd   :  { %10787 = sst [smem:[#allocation66_spill]] %s10734_s16 }
   0xe   :  { %10788 = sst [smem:[#allocation67_spill]] %s10735_s17 }
   0xf   :  { %10789 = sst [smem:[#allocation68_spill]] %s10736_s18 }
  0x10   :  { %10790 = sst [smem:[#allocation69_spill]] %s10737_s19 }
  0x11   :  { %10791 = sst [smem:[#allocation70_spill]] %s10738_s20 }
  0x12   :  { %10792 = sst [smem:[#allocation71_spill]] %s10739_s21 }
  0x13   :  { %26 = vsyncpa [#allocation3], 0 }
  0x14   :  { %28 = vsyncpa [#allocation3 + $0x1], 0 }
  0x15   :  { %29 = vsyncpa [#allocation6], 0 }
  0x16   :  { %30 = vsyncpa [#allocation9], 0 }
  0x17   :  { %31 = vsyncpa [#allocation12], 0 }
  0x18   :  { %32 = vsyncpa [#allocation15], 0 }
  0x19   :  { %33 = vsyncpa [#allocation18], 0 }
  0x1a   :  { %34 = vsyncpa [#allocation21], 0 }
  0x1b   :  { %35 = vsyncpa [#allocation24], 0 }
  0x1c   :  { %36 = vsyncpa [#allocation27], 0 }
  0x1d   :  { %37 = vsyncpa [#allocation30], 0 }
  0x1e   :  { %38 = vsyncpa [#allocation33], 0 }
  0x1f   :  { %39 = vsyncpa [#allocation4], 0 }
  0x20   :  { %41 = vsyncpa [#allocation4 + $0x1], 0  ;;  %s9355_s2 = smov 0   ;;  %s9357_s25 = smov 0  }
  0x21   :  { %s9359_s26 = smov 0   ;;  %s9361_s27 = smov 0  }
  0x22 LB: > { %10793 = sst [smem:[#allocation48_spill]] %s9191_s2  ;;  %s9205_s3 = smov [#allocation5]   ;;  %s9203_s27 = sphi %s9361_s27, %s9831_s27   ;;  %s9199_s26 = sphi %s9359_s26, %s10875_s26   ;;  %s9195_s25 = sphi %s9357_s25, %s10874_s25   ;;  %s9191_s2 = sphi %s9355_s2, %s10871_s2  }
  0x23   : > { %10794 = sst [smem:[#allocation49_spill]] %s9195_s25  ;;  %s536_s28 = sshll.u32 %s9205_s3, 4  ;;  %s9381_s28 = int_to_ptr.vmem [resolvable:$true] %s536_s28 }
  0x24   : > { %10795 = sst [smem:[#allocation50_spill]] %s9199_s26  ;;  %s9376_s29 = sadd.s32 4294967295, %s9203_s27  }
  0x25   : > { %10796 = sst [smem:[#allocation51_spill]] %s9203_s27  ;;  %p6567_p0 = scmp.ge.s32.totalorder %s9203_s27, 1 }
  0x26   : > { %10797 = sst [smem:[#allocation52_spill]] %s9376_s29  ;;  %p10762_p1 = scmp.eq.s32.totalorder %s9376_s29, 0 }
  0x27   : > { %p524_p2 = scmp.lt.s32.totalorder %s9203_s27, 3  ;;  %s9206_s4 = smov [#allocation8]  }
  0x28   : > { %s563_s30 = sshll.u32 %s9206_s4, 4  ;;  %s9207_s22 = smov [#allocation11]   ;;  %s9396_s30 = int_to_ptr.vmem [resolvable:$true] %s563_s30 }
  0x29   : > { %p9383_p3 = pnand %p6567_p0, %p524_p2  ;;  %s584_s23 = sshll.u32 %s9207_s22, 4  ;;  %s9398_s23 = int_to_ptr.vmem [resolvable:$true] %s584_s23 }
  0x2a   : > { %s10801_s3 = sld [smem:[#allocation55_spill]] }
  0x2b   : > { %s10798_s0 = scalar_select %p9383_p3, 1, 0 }
  0x2c   : > { %p7761_p5 = pneg %p9383_p3 }
  0x2d   : > { %10799 = sst [smem:[#allocation53_spill]] %s10798_s0 }
  0x2e   : > { %p9392_p6 = pnand %p7761_p5, %p10762_p1 }
  0x30   : > { %s8507_s21 = scalar_lea.hbm %s10801_s3, 384  ;;  %p9408_p8 = pneg %p9392_p6 }
  0x31   : > { %p8508_p7 = scmp.ne.s32.totalorder %s10801_s3, %s8507_s21  ;;  %p8514_p11 = scmp.lt.u32.totalorder %s8507_s21, %s10801_s3 }
  0x33   : > { %p8510_p9 = pnand %p9408_p8, %p8508_p7 }
  0x35   : > { %p8511_p10 = pneg %p8510_p9 }
  0x37   : > { %p8516_p12 = pnand %p8514_p11, %p8511_p10 }
  0x39   : > { %8519 = shalt.err (!%p8516_p12)
}
  0x3a   : > { %s8520_s2 = scalar_lea.vmem %s9381_s28, 384  ;;  %p8528_p5 = scmp.lt.s32.totalorder %s9381_s28, %s9381_s28 }
  0x3b   : > { %p8521_p13 = scmp.ne.s32.totalorder %s9381_s28, %s8520_s2  ;;  %p8529_p4 = scmp.lt.s32.totalorder %s8520_s2, %s8520_s2 }
  0x3d   : > { %p8523_p0 = pnand %p8521_p13, %p9408_p8  ;;  %p8530_p7 = por %p8529_p4, %p8528_p5 }
  0x3f   : > { %p8524_p2 = pneg %p8523_p0 }
  0x41   : > { %p8531_p9 = pnand %p8530_p7, %p8524_p2 }
  0x43   : > { %8534 = shalt.err (!%p8531_p9)
}
  0x44   : > { %s10758_s0 = smov 64   ;;  %s10760_s21 = smov 4  }
  0x45   : > { %7764 = dma.hbm_to_vmem [thread:$0]  (!%p9392_p6), %s10801_s3, 384, %s9381_s28, [#allocation6], %s10758_s0, %s10758_s0, %s10760_s21  }
  0x46   : > { %s10803_s25 = sld [smem:[#allocation57_spill]] }
  0x4c   : > { %s10804_s20 = smov %s10803_s25  ;;  %s8535_s2 = scalar_lea.hbm %s10803_s25, 16 }
  0x4d   : > { %p8536_p4 = scmp.ne.s32.totalorder %s10804_s20, %s8535_s2  ;;  %p8542_p12 = scmp.lt.u32.totalorder %s8535_s2, %s10804_s20 }
  0x4f   : > { %p8538_p10 = pnand %p8536_p4, %p9408_p8 }
  0x51   : > { %p8539_p11 = pneg %p8538_p10 }
  0x53   : > { %p8544_p13 = pnand %p8542_p12, %p8539_p11 }
  0x55   : > { %8547 = shalt.err (!%p8544_p13)
}
  0x56   : > { %s8548_s28 = scalar_lea.vmem %s9396_s30, 16  ;;  %s8555_s25 = scalar_lea.vmem %s9396_s30, 32 }
  0x57   : > { %p8549_p0 = scmp.ne.s32.totalorder %s9396_s30, %s8548_s28  ;;  %p8556_p7 = scmp.lt.s32.totalorder %s9396_s30, %s9396_s30 }
  0x58   : > { %p8557_p9 = scmp.lt.s32.totalorder %s8555_s25, %s8548_s28 }
  0x59   : > { %p8551_p2 = pnand %p8549_p0, %p9408_p8 }
  0x5a   : > { %p8558_p4 = por %p8557_p9, %p8556_p7 }
  0x5b   : > { %p8552_p5 = pneg %p8551_p2 }
  0x5d   : > { %p8559_p10 = pnand %p8558_p4, %p8552_p5 }
  0x5f   : > { %8562 = shalt.err (!%p8559_p10)
}
  0x60   : > { %7770 = dma.hbm_to_vmem [thread:$0]  (!%p9392_p6), %s10804_s20, 16, %s9396_s30, [#allocation9]  }
  0x61   : > { %s10805_s29 = sld [smem:[#allocation59_spill]] }
  0x67   : > { %s8563_s1 = scalar_lea.hbm %s10805_s29, 32 }
  0x68   : > { %p8564_p11 = scmp.ne.s32.totalorder %s10805_s29, %s8563_s1  ;;  %p8570_p0 = scmp.lt.u32.totalorder %s8563_s1, %s10805_s29 }
  0x6a   : > { %p8566_p12 = pnand %p8564_p11, %p9408_p8 }
  0x6c   : > { %p8567_p13 = pneg %p8566_p12 }
  0x6e   : > { %p8572_p2 = pnand %p8570_p0, %p8567_p13 }
  0x70   : > { %8575 = shalt.err (!%p8572_p2)
}
  0x71   : > { %s8576_s30 = scalar_lea.vmem %s9398_s23, 32  ;;  %p8584_p4 = scmp.lt.s32.totalorder %s9398_s23, %s9398_s23 }
  0x72   : > { %p8577_p5 = scmp.ne.s32.totalorder %s9398_s23, %s8576_s30  ;;  %p8585_p10 = scmp.lt.s32.totalorder %s8576_s30, %s8576_s30 }
  0x74   : > { %p8579_p7 = pnand %p8577_p5, %p9408_p8  ;;  %p8586_p11 = por %p8585_p10, %p8584_p4 }
  0x76   : > { %p8580_p9 = pneg %p8579_p7 }
  0x78   : > { %p8587_p12 = pnand %p8586_p11, %p8580_p9 }
  0x7a   : > { %8590 = shalt.err (!%p8587_p12)
}
  0x7b   : > { %s10764_s25 = smov 16   ;;  %s10766_s16 = smov 1  }
  0x7c   : > { %7776 = dma.hbm_to_vmem [thread:$0]  (!%p9392_p6), %s10805_s29, 32, %s9398_s23, [#allocation12], %s10764_s25, %s10764_s25, %s10766_s16  }
  0x7d   : > { %s9212_s27 = smov [#allocation14]   ;;  %s10806_s7 = sld [smem:[#allocation61_spill]] }
  0x7e   : > { %s610_s1 = sshll.u32 %s9212_s27, 4  ;;  %s611_s1 = int_to_ptr.vmem [resolvable:$true] %s610_s1 }
  0x83   : > { %s8591_s2 = scalar_lea.hbm %s10806_s7, 6144 }
  0x84   : > { %p8592_p13 = scmp.ne.s32.totalorder %s10806_s7, %s8591_s2  ;;  %p8598_p5 = scmp.lt.u32.totalorder %s8591_s2, %s10806_s7 }
  0x86   : > { %p8594_p0 = pnand %p8592_p13, %p9408_p8 }
  0x88   : > { %p8595_p2 = pneg %p8594_p0 }
  0x8a   : > { %p8600_p7 = pnand %p8598_p5, %p8595_p2 }
  0x8c   : > { %8603 = shalt.err (!%p8600_p7)
}
  0x8d   : > { %s8604_s23 = scalar_lea.vmem %s611_s1, 6144  ;;  %p8612_p11 = scmp.lt.s32.totalorder %s611_s1, %s611_s1 }
  0x8e   : > { %p8605_p9 = scmp.ne.s32.totalorder %s611_s1, %s8604_s23  ;;  %p8613_p12 = scmp.lt.s32.totalorder %s8604_s23, %s8604_s23 }
  0x90   : > { %p8607_p4 = pnand %p8605_p9, %p9408_p8  ;;  %p8614_p1 = por %p8613_p12, %p8612_p11 }
  0x92   : > { %p8608_p10 = pneg %p8607_p4 }
  0x94   : > { %p8615_p3 = pnand %p8614_p1, %p8608_p10 }
  0x96   : > { %8618 = shalt.err (!%p8615_p3)
}
  0x97   : > { %s9213_s18 = smov 192   ;;  %s9214_s26 = smov 12  }
  0x98   : > { %7782 = dma.hbm_to_vmem [thread:$0]  (!%p9392_p6), %s10806_s7, 6144, %s611_s1, [#allocation15], %s9213_s18, %s9213_s18, %s9214_s26  }
  0x99   : > { %s9215_s27 = smov [#allocation17]   ;;  %s9216_s22 = smov [#allocation20]  }
  0x9a   : > { %s636_s24 = sshll.u32 %s9215_s27, 4  ;;  %s662_s2 = sshll.u32 %s9216_s22, 4  ;;  %s637_s24 = int_to_ptr.vmem [resolvable:$true] %s636_s24  ;;  %s9500_s2 = int_to_ptr.vmem [resolvable:$true] %s662_s2 }
  0x9b   : > { %s10807_s9 = sld [smem:[#allocation62_spill]] }
  0xa1   : > { %s8619_s23 = scalar_lea.hbm %s10807_s9, 2048 }
  0xa2   : > { %p8620_p1 = scmp.ne.s32.totalorder %s10807_s9, %s8619_s23  ;;  %p8626_p0 = scmp.lt.u32.totalorder %s8619_s23, %s10807_s9 }
  0xa4   : > { %p8622_p3 = pnand %p8620_p1, %p9408_p8 }
  0xa6   : > { %p8623_p13 = pneg %p8622_p3 }
  0xa8   : > { %p8628_p2 = pnand %p8626_p0, %p8623_p13 }
  0xaa   : > { %8631 = shalt.err (!%p8628_p2)
}
  0xab   : > { %s8632_s18 = scalar_lea.vmem %s637_s24, 2048  ;;  %p8640_p4 = scmp.lt.s32.totalorder %s637_s24, %s637_s24 }
  0xac   : > { %p8633_p5 = scmp.ne.s32.totalorder %s637_s24, %s8632_s18  ;;  %p8641_p10 = scmp.lt.s32.totalorder %s8632_s18, %s8632_s18 }
  0xae   : > { %p8635_p7 = pnand %p8633_p5, %p9408_p8  ;;  %p8642_p11 = por %p8641_p10, %p8640_p4 }
  0xb0   : > { %p8636_p9 = pneg %p8635_p7 }
  0xb2   : > { %p8643_p12 = pnand %p8642_p11, %p8636_p9 }
  0xb4   : > { %8646 = shalt.err (!%p8643_p12)
}
  0xb5   : > { %s10808_s25 = smov 4   ;;  %s10809_s16 = smov 64  }
  0xb6   : > { %7788 = dma.hbm_to_vmem [thread:$0]  (!%p9392_p6), %s10807_s9, 2048, %s637_s24, [#allocation18], %s10809_s16, %s10809_s16, %s10808_s25  }
  0xb7   : > { %s10810_s11 = sld [smem:[#allocation63_spill]] }
  0xbd   : > { %s8647_s28 = scalar_lea.hbm %s10810_s11, 32 }
  0xbe   : > { %p8648_p1 = scmp.ne.s32.totalorder %s10810_s11, %s8647_s28  ;;  %p8654_p0 = scmp.lt.u32.totalorder %s8647_s28, %s10810_s11 }
  0xc0   : > { %p8650_p3 = pnand %p8648_p1, %p9408_p8 }
  0xc2   : > { %p8651_p13 = pneg %p8650_p3 }
  0xc4   : > { %p8656_p2 = pnand %p8654_p0, %p8651_p13 }
  0xc6   : > { %8659 = shalt.err (!%p8656_p2)
}
  0xc7   : > { %s8660_s24 = scalar_lea.vmem %s9500_s2, 32  ;;  %p8668_p4 = scmp.lt.s32.totalorder %s9500_s2, %s9500_s2 }
  0xc8   : > { %p8661_p5 = scmp.ne.s32.totalorder %s9500_s2, %s8660_s24  ;;  %p8669_p10 = scmp.lt.s32.totalorder %s8660_s24, %s8660_s24 }
  0xca   : > { %p8663_p7 = pnand %p8661_p5, %p9408_p8  ;;  %p8670_p11 = por %p8669_p10, %p8668_p4 }
  0xcc   : > { %p8664_p9 = pneg %p8663_p7 }
  0xce   : > { %p8671_p12 = pnand %p8670_p11, %p8664_p9 }
  0xd0   : > { %8674 = shalt.err (!%p8671_p12)
}
  0xd1   : > { %s10811_s18 = smov 1   ;;  %s10812_s26 = smov 16  }
  0xd2   : > { %7794 = dma.hbm_to_vmem [thread:$0]  (!%p9392_p6), %s10810_s11, 32, %s9500_s2, [#allocation21], %s10812_s26, %s10812_s26, %s10811_s18  }
  0xd3   : > { %s9217_s22 = smov [#allocation23]   ;;  %s9218_s30 = smov [#allocation26]  }
  0xd4   : > { %s688_s28 = sshll.u32 %s9217_s22, 4  ;;  %s714_s23 = sshll.u32 %s9218_s30, 4  ;;  %s689_s28 = int_to_ptr.vmem [resolvable:$true] %s688_s28  ;;  %s715_s23 = int_to_ptr.vmem [resolvable:$true] %s714_s23 }
  0xd5   : > { %s10813_s13 = sld [smem:[#allocation64_spill]] }
  0xdb   : > { %s8675_s24 = scalar_lea.hbm %s10813_s13, 8192 }
  0xdc   : > { %p8676_p1 = scmp.ne.s32.totalorder %s10813_s13, %s8675_s24  ;;  %p8682_p0 = scmp.lt.u32.totalorder %s8675_s24, %s10813_s13 }
  0xde   : > { %p8678_p3 = pnand %p8676_p1, %p9408_p8 }
  0xe0   : > { %p8679_p13 = pneg %p8678_p3 }
  0xe2   : > { %p8684_p2 = pnand %p8682_p0, %p8679_p13 }
  0xe4   : > { %8687 = shalt.err (!%p8684_p2)
}
  0xe5   : > { %s8688_s2 = scalar_lea.vmem %s689_s28, 8192  ;;  %p8696_p4 = scmp.lt.s32.totalorder %s689_s28, %s689_s28 }
  0xe6   : > { %p8689_p5 = scmp.ne.s32.totalorder %s689_s28, %s8688_s2  ;;  %p8697_p10 = scmp.lt.s32.totalorder %s8688_s2, %s8688_s2 }
  0xe8   : > { %p8691_p7 = pnand %p8689_p5, %p9408_p8  ;;  %p8698_p11 = por %p8697_p10, %p8696_p4 }
  0xea   : > { %p8692_p9 = pneg %p8691_p7 }
  0xec   : > { %p8699_p12 = pnand %p8698_p11, %p8692_p9 }
  0xee   : > { %8702 = shalt.err (!%p8699_p12)
}
  0xef   : > { %s9219_s7 = smov 256   ;;  %s10814_s15 = sld [smem:[#allocation65_spill]] }
  0xf0   : > { %7800 = dma.hbm_to_vmem [thread:$0]  (!%p9392_p6), %s10813_s13, 8192, %s689_s28, [#allocation24], %s9219_s7, %s9219_s7, %s10812_s26  }
  0xf5   : > { %s8703_s30 = scalar_lea.hbm %s10814_s15, 8192 }
  0xf6   : > { %p8704_p1 = scmp.ne.s32.totalorder %s10814_s15, %s8703_s30  ;;  %p8710_p0 = scmp.lt.u32.totalorder %s8703_s30, %s10814_s15 }
  0xf8   : > { %p8706_p3 = pnand %p8704_p1, %p9408_p8 }
  0xfa   : > { %p8707_p13 = pneg %p8706_p3 }
  0xfc   : > { %p8712_p2 = pnand %p8710_p0, %p8707_p13 }
  0xfe   : > { %8715 = shalt.err (!%p8712_p2)
}
  0xff   : > { %s8716_s2 = scalar_lea.vmem %s715_s23, 8192  ;;  %p8724_p4 = scmp.lt.s32.totalorder %s715_s23, %s715_s23 }
 0x100   : > { %p8717_p5 = scmp.ne.s32.totalorder %s715_s23, %s8716_s2  ;;  %p8725_p10 = scmp.lt.s32.totalorder %s8716_s2, %s8716_s2 }
 0x102   : > { %p8719_p7 = pnand %p8717_p5, %p9408_p8  ;;  %p8726_p11 = por %p8725_p10, %p8724_p4 }
 0x104   : > { %p8720_p9 = pneg %p8719_p7 }
 0x106   : > { %p8727_p12 = pnand %p8726_p11, %p8720_p9 }
 0x108   : > { %8730 = shalt.err (!%p8727_p12)
}
 0x109   : > { %7806 = dma.hbm_to_vmem [thread:$0]  (!%p9392_p6), %s10814_s15, 8192, %s715_s23, [#allocation27], %s10809_s16, %s10809_s16, %s10808_s25  }
 0x10a   : > { %s9220_s3 = smov [#allocation29]   ;;  %s9221_s27 = smov [#allocation32]  }
 0x10b   : > { %s740_s9 = sshll.u32 %s9220_s3, 4  ;;  %s764_s22 = sshll.u32 %s9221_s27, 4  ;;  %s741_s9 = int_to_ptr.vmem [resolvable:$true] %s740_s9  ;;  %s765_s22 = int_to_ptr.vmem [resolvable:$true] %s764_s22 }
 0x10c   : > { %s10815_s17 = sld [smem:[#allocation67_spill]] }
 0x112   : > { %s8731_s1 = scalar_lea.hbm %s10815_s17, 2048 }
 0x113   : > { %p8732_p1 = scmp.ne.s32.totalorder %s10815_s17, %s8731_s1  ;;  %p8738_p0 = scmp.lt.u32.totalorder %s8731_s1, %s10815_s17 }
 0x115   : > { %p8734_p3 = pnand %p8732_p1, %p9408_p8 }
 0x117   : > { %p8735_p13 = pneg %p8734_p3 }
 0x119   : > { %p8740_p2 = pnand %p8738_p0, %p8735_p13 }
 0x11b   : > { %8743 = shalt.err (!%p8740_p2)
}
 0x11c   : > { %s8744_s23 = scalar_lea.vmem %s741_s9, 2048  ;;  %p8752_p4 = scmp.lt.s32.totalorder %s741_s9, %s741_s9 }
 0x11d   : > { %p8745_p5 = scmp.ne.s32.totalorder %s741_s9, %s8744_s23  ;;  %p8753_p10 = scmp.lt.s32.totalorder %s8744_s23, %s8744_s23 }
 0x11f   : > { %p8747_p7 = pnand %p8745_p5, %p9408_p8  ;;  %p8754_p11 = por %p8753_p10, %p8752_p4 }
 0x121   : > { %p8748_p9 = pneg %p8747_p7 }
 0x123   : > { %p8755_p12 = pnand %p8754_p11, %p8748_p9 }
 0x125   : > { %8758 = shalt.err (!%p8755_p12)
}
 0x126   : > { %s10769_s7 = smov 128   ;;  %s10771_s3 = smov 8  }
 0x127   : > { %7812 = dma.hbm_to_vmem [thread:$0]  (!%p9392_p6), %s10815_s17, 2048, %s741_s9, [#allocation30], %s10769_s7, %s10769_s7, %s10771_s3  }
 0x128   : > { %s10816_s19 = sld [smem:[#allocation69_spill]] }
 0x12e   : > { %s8759_s24 = scalar_lea.hbm %s10816_s19, 2048 }
 0x12f   : > { %p8760_p1 = scmp.ne.s32.totalorder %s10816_s19, %s8759_s24  ;;  %p8766_p0 = scmp.lt.u32.totalorder %s8759_s24, %s10816_s19 }
 0x131   : > { %p8762_p3 = pnand %p8760_p1, %p9408_p8 }
 0x133   : > { %p8763_p13 = pneg %p8762_p3 }
 0x135   : > { %p8768_p2 = pnand %p8766_p0, %p8763_p13 }
 0x137   : > { %8771 = shalt.err (!%p8768_p2)
}
 0x138   : > { %s8772_s27 = scalar_lea.vmem %s765_s22, 2048  ;;  %p8780_p4 = scmp.lt.s32.totalorder %s765_s22, %s765_s22 }
 0x139   : > { %p8773_p5 = scmp.ne.s32.totalorder %s765_s22, %s8772_s27  ;;  %p8781_p10 = scmp.lt.s32.totalorder %s8772_s27, %s8772_s27 }
 0x13b   : > { %p8775_p7 = pnand %p8773_p5, %p9408_p8  ;;  %p8782_p11 = por %p8781_p10, %p8780_p4 }
 0x13d   : > { %p8776_p9 = pneg %p8775_p7 }
 0x13f   : > { %p8783_p12 = pnand %p8782_p11, %p8776_p9 }
 0x141   : > { %8786 = shalt.err (!%p8783_p12)
}
 0x142   : > { %7818 = dma.hbm_to_vmem [thread:$0]  (!%p9392_p6), %s10816_s19, 2048, %s765_s22, [#allocation33], %s10809_s16, %s10809_s16, %s10808_s25  }
 0x143   : > { %s9224_s0 = smov [#allocation7]   ;;  %s9225_s24 = smov [#allocation10]  }
 0x144   : > { %s549_s1 = sshll.u32 %s9224_s0, 4  ;;  %s574_s21 = sshll.u32 %s9225_s24, 4  ;;  %s550_s1 = int_to_ptr.vmem [resolvable:$true] %s549_s1  ;;  %s575_s21 = int_to_ptr.vmem [resolvable:$true] %s574_s21 }
 0x145   : > { %s10817_s23 = sld [smem:[#allocation56_spill]] }
 0x14b   : > { %s8787_s27 = scalar_lea.hbm %s10817_s23, 384 }
 0x14c   : > { %p8788_p1 = scmp.ne.s32.totalorder %s10817_s23, %s8787_s27  ;;  %p8794_p0 = scmp.lt.u32.totalorder %s8787_s27, %s10817_s23 }
 0x14e   : > { %p8790_p3 = pnand %p8788_p1, %p9408_p8 }
 0x150   : > { %p8791_p13 = pneg %p8790_p3 }
 0x152   : > { %p8796_p2 = pnand %p8794_p0, %p8791_p13 }
 0x154   : > { %8799 = shalt.err (!%p8796_p2)
}
 0x155   : > { %s8800_s22 = scalar_lea.vmem %s550_s1, 384  ;;  %p8808_p4 = scmp.lt.s32.totalorder %s550_s1, %s550_s1 }
 0x156   : > { %p8801_p5 = scmp.ne.s32.totalorder %s550_s1, %s8800_s22  ;;  %p8809_p10 = scmp.lt.s32.totalorder %s8800_s22, %s8800_s22 }
 0x158   : > { %p8803_p7 = pnand %p8801_p5, %p9408_p8  ;;  %p8810_p11 = por %p8809_p10, %p8808_p4 }
 0x15a   : > { %p8804_p9 = pneg %p8803_p7 }
 0x15c   : > { %p8811_p12 = pnand %p8810_p11, %p8804_p9 }
 0x15e   : > { %8814 = shalt.err (!%p8811_p12)
}
 0x15f   : > { %s10818_s7 = smov 8   ;;  %s10819_s3 = smov 128  }
 0x160   : > { %7767 = dma.hbm_to_vmem [thread:$0]  (!%p9392_p6), %s10817_s23, 384, %s550_s1, [#allocation6], %s10819_s3, %s10819_s3, %s10818_s7  }
 0x161   : > { %s10820_s2 = sld [smem:[#allocation58_spill]] }
 0x167   : > { %s10821_s28 = smov %s10820_s2  ;;  %s8815_s27 = scalar_lea.hbm %s10820_s2, 16 }
 0x168   : > { %p8816_p1 = scmp.ne.s32.totalorder %s10821_s28, %s8815_s27  ;;  %p8822_p0 = scmp.lt.u32.totalorder %s8815_s27, %s10821_s28 }
 0x16a   : > { %p8818_p3 = pnand %p8816_p1, %p9408_p8 }
 0x16c   : > { %p8819_p13 = pneg %p8818_p3 }
 0x16e   : > { %p8824_p2 = pnand %p8822_p0, %p8819_p13 }
 0x170   : > { %8827 = shalt.err (!%p8824_p2)
}
 0x171   : > { %s8828_s11 = scalar_lea.vmem %s575_s21, 16  ;;  %s8835_s1 = scalar_lea.vmem %s575_s21, 32 }
 0x172   : > { %p8829_p5 = scmp.ne.s32.totalorder %s575_s21, %s8828_s11  ;;  %p8836_p4 = scmp.lt.s32.totalorder %s575_s21, %s575_s21 }
 0x173   : > { %p8837_p10 = scmp.lt.s32.totalorder %s8835_s1, %s8828_s11 }
 0x174   : > { %p8831_p7 = pnand %p8829_p5, %p9408_p8 }
 0x175   : > { %p8838_p11 = por %p8837_p10, %p8836_p4 }
 0x176   : > { %p8832_p9 = pneg %p8831_p7 }
 0x178   : > { %p8839_p12 = pnand %p8838_p11, %p8832_p9 }
 0x17a   : > { %8842 = shalt.err (!%p8839_p12)
}
 0x17b   : > { %7773 = dma.hbm_to_vmem [thread:$0]  (!%p9392_p6), %s10821_s28, 16, %s575_s21, [#allocation9]  }
 0x17c   : > { %s9226_s13 = smov [#allocation13]   ;;  %s9227_s24 = smov [#allocation16]  }
 0x17d   : > { %s597_s15 = sshll.u32 %s9226_s13, 4  ;;  %s623_s2 = sshll.u32 %s9227_s24, 4  ;;  %s598_s15 = int_to_ptr.vmem [resolvable:$true] %s597_s15  ;;  %s624_s2 = int_to_ptr.vmem [resolvable:$true] %s623_s2 }
 0x17e   : > { %s10822_s6 = sld [smem:[#allocation60_spill]] }
 0x184   : > { %s8843_s22 = scalar_lea.hbm %s10822_s6, 32 }
 0x185   : > { %p8844_p1 = scmp.ne.s32.totalorder %s10822_s6, %s8843_s22  ;;  %p8850_p0 = scmp.lt.u32.totalorder %s8843_s22, %s10822_s6 }
 0x187   : > { %p8846_p3 = pnand %p8844_p1, %p9408_p8 }
 0x189   : > { %p8847_p13 = pneg %p8846_p3 }
 0x18b   : > { %p8852_p2 = pnand %p8850_p0, %p8847_p13 }
 0x18d   : > { %8855 = shalt.err (!%p8852_p2)
}
 0x18e   : > { %s8856_s21 = scalar_lea.vmem %s598_s15, 32  ;;  %p8864_p4 = scmp.lt.s32.totalorder %s598_s15, %s598_s15 }
 0x18f   : > { %p8857_p5 = scmp.ne.s32.totalorder %s598_s15, %s8856_s21  ;;  %p8865_p10 = scmp.lt.s32.totalorder %s8856_s21, %s8856_s21 }
 0x191   : > { %p8859_p7 = pnand %p8857_p5, %p9408_p8  ;;  %p8866_p11 = por %p8865_p10, %p8864_p4 }
 0x193   : > { %p8860_p9 = pneg %p8859_p7 }
 0x195   : > { %p8867_p12 = pnand %p8866_p11, %p8860_p9 }
 0x197   : > { %8870 = shalt.err (!%p8867_p12)
}
 0x198   : > { %7779 = dma.hbm_to_vmem [thread:$0]  (!%p9392_p6), %s10822_s6, 32, %s598_s15, [#allocation12], %s10812_s26, %s10812_s26, %s10811_s18  }
 0x199   : > { %s8871_s27 = scalar_lea.hbm %s10726_s8, 96 }
 0x19a   : > { %p8872_p1 = scmp.ne.s32.totalorder %s10726_s8, %s8871_s27  ;;  %p8878_p0 = scmp.lt.u32.totalorder %s8871_s27, %s10726_s8 }
 0x19c   : > { %p8874_p3 = pnand %p8872_p1, %p9408_p8 }
 0x19e   : > { %p8875_p13 = pneg %p8874_p3 }
 0x1a0   : > { %p8880_p2 = pnand %p8878_p0, %p8875_p13 }
 0x1a2   : > { %8883 = shalt.err (!%p8880_p2)
}
 0x1a3   : > { %s8884_s30 = scalar_lea.vmem %s624_s2, 96  ;;  %p8892_p4 = scmp.lt.s32.totalorder %s624_s2, %s624_s2 }
 0x1a4   : > { %p8885_p5 = scmp.ne.s32.totalorder %s624_s2, %s8884_s30  ;;  %p8893_p10 = scmp.lt.s32.totalorder %s8884_s30, %s8884_s30 }
 0x1a6   : > { %p8887_p7 = pnand %p8885_p5, %p9408_p8  ;;  %p8894_p11 = por %p8893_p10, %p8892_p4 }
 0x1a8   : > { %p8888_p9 = pneg %p8887_p7 }
 0x1aa   : > { %p8895_p12 = pnand %p8894_p11, %p8888_p9 }
 0x1ac   : > { %8898 = shalt.err (!%p8895_p12)
}
 0x1ad   : > { %s9228_s15 = smov 48   ;;  %s9229_s21 = smov 3  }
 0x1ae   : > { %7785 = dma.hbm_to_vmem [thread:$0]  (!%p9392_p6), %s10726_s8, 96, %s624_s2, [#allocation15], %s9228_s15, %s9228_s15, %s9229_s21  }
 0x1af   : > { %s9230_s13 = smov [#allocation19]   ;;  %s9231_s27 = smov [#allocation22]  }
 0x1b0   : > { %s649_s24 = sshll.u32 %s9230_s13, 4  ;;  %s675_s9 = sshll.u32 %s9231_s27, 4  ;;  %s650_s24 = int_to_ptr.vmem [resolvable:$true] %s649_s24  ;;  %s676_s9 = int_to_ptr.vmem [resolvable:$true] %s675_s9 }
 0x1b1   : > { %s8899_s1 = scalar_lea.hbm %s10728_s10, 32 }
 0x1b2   : > { %p8900_p1 = scmp.ne.s32.totalorder %s10728_s10, %s8899_s1  ;;  %p8906_p0 = scmp.lt.u32.totalorder %s8899_s1, %s10728_s10 }
 0x1b4   : > { %p8902_p3 = pnand %p8900_p1, %p9408_p8 }
 0x1b6   : > { %p8903_p13 = pneg %p8902_p3 }
 0x1b8   : > { %p8908_p2 = pnand %p8906_p0, %p8903_p13 }
 0x1ba   : > { %8911 = shalt.err (!%p8908_p2)
}
 0x1bb   : > { %s8912_s2 = scalar_lea.vmem %s650_s24, 32  ;;  %p8920_p4 = scmp.lt.s32.totalorder %s650_s24, %s650_s24 }
 0x1bc   : > { %p8913_p5 = scmp.ne.s32.totalorder %s650_s24, %s8912_s2  ;;  %p8921_p10 = scmp.lt.s32.totalorder %s8912_s2, %s8912_s2 }
 0x1be   : > { %p8915_p7 = pnand %p8913_p5, %p9408_p8  ;;  %p8922_p11 = por %p8921_p10, %p8920_p4 }
 0x1c0   : > { %p8916_p9 = pneg %p8915_p7 }
 0x1c2   : > { %p8923_p12 = pnand %p8922_p11, %p8916_p9 }
 0x1c4   : > { %8926 = shalt.err (!%p8923_p12)
}
 0x1c5   : > { %7791 = dma.hbm_to_vmem [thread:$0]  (!%p9392_p6), %s10728_s10, 32, %s650_s24, [#allocation18], %s10812_s26, %s10812_s26, %s10811_s18  }
 0x1c6   : > { %s8927_s21 = scalar_lea.hbm %s10730_s12, 32 }
 0x1c7   : > { %p8928_p1 = scmp.ne.s32.totalorder %s10730_s12, %s8927_s21  ;;  %p8934_p0 = scmp.lt.u32.totalorder %s8927_s21, %s10730_s12 }
 0x1c9   : > { %p8930_p3 = pnand %p8928_p1, %p9408_p8 }
 0x1cb   : > { %p8931_p13 = pneg %p8930_p3 }
 0x1cd   : > { %p8936_p2 = pnand %p8934_p0, %p8931_p13 }
 0x1cf   : > { %8939 = shalt.err (!%p8936_p2)
}
 0x1d0   : > { %s8940_s22 = scalar_lea.vmem %s676_s9, 32  ;;  %p8948_p4 = scmp.lt.s32.totalorder %s676_s9, %s676_s9 }
 0x1d1   : > { %p8941_p5 = scmp.ne.s32.totalorder %s676_s9, %s8940_s22  ;;  %p8949_p10 = scmp.lt.s32.totalorder %s8940_s22, %s8940_s22 }
 0x1d3   : > { %p8943_p7 = pnand %p8941_p5, %p9408_p8  ;;  %p8950_p11 = por %p8949_p10, %p8948_p4 }
 0x1d5   : > { %p8944_p9 = pneg %p8943_p7 }
 0x1d7   : > { %p8951_p12 = pnand %p8950_p11, %p8944_p9 }
 0x1d9   : > { %8954 = shalt.err (!%p8951_p12)
}
 0x1da   : > { %7797 = dma.hbm_to_vmem [thread:$0]  (!%p9392_p6), %s10730_s12, 32, %s676_s9, [#allocation21], %s10812_s26, %s10812_s26, %s10811_s18  }
 0x1db   : > { %s9232_s1 = smov [#allocation25]   ;;  %s9233_s2 = smov [#allocation28]  }
 0x1dc   : > { %s701_s30 = sshll.u32 %s9232_s1, 4  ;;  %s727_s6 = sshll.u32 %s9233_s2, 4  ;;  %s702_s30 = int_to_ptr.vmem [resolvable:$true] %s701_s30  ;;  %s728_s6 = int_to_ptr.vmem [resolvable:$true] %s727_s6 }
 0x1dd   : > { %s8955_s15 = scalar_lea.hbm %s10732_s14, 128 }
 0x1de   : > { %p8956_p1 = scmp.ne.s32.totalorder %s10732_s14, %s8955_s15  ;;  %p8962_p0 = scmp.lt.u32.totalorder %s8955_s15, %s10732_s14 }
 0x1e0   : > { %p8958_p3 = pnand %p8956_p1, %p9408_p8 }
 0x1e2   : > { %p8959_p13 = pneg %p8958_p3 }
 0x1e4   : > { %p8964_p2 = pnand %p8962_p0, %p8959_p13 }
 0x1e6   : > { %8967 = shalt.err (!%p8964_p2)
}
 0x1e7   : > { %s8968_s9 = scalar_lea.vmem %s702_s30, 128  ;;  %p8976_p4 = scmp.lt.s32.totalorder %s702_s30, %s702_s30 }
 0x1e8   : > { %p8969_p5 = scmp.ne.s32.totalorder %s702_s30, %s8968_s9  ;;  %p8977_p10 = scmp.lt.s32.totalorder %s8968_s9, %s8968_s9 }
 0x1ea   : > { %p8971_p7 = pnand %p8969_p5, %p9408_p8  ;;  %p8978_p11 = por %p8977_p10, %p8976_p4 }
 0x1ec   : > { %p8972_p9 = pneg %p8971_p7 }
 0x1ee   : > { %p8979_p12 = pnand %p8978_p11, %p8972_p9 }
 0x1f0   : > { %8982 = shalt.err (!%p8979_p12)
}
 0x1f1   : > { %7803 = dma.hbm_to_vmem [thread:$0]  (!%p9392_p6), %s10732_s14, 128, %s702_s30, [#allocation24], %s10809_s16, %s10809_s16, %s10808_s25  }
 0x1f2   : > { %s10823_s1 = sld [smem:[#allocation66_spill]] }
 0x1f8   : > { %s8983_s2 = scalar_lea.hbm %s10823_s1, 32 }
 0x1f9   : > { %p8984_p1 = scmp.ne.s32.totalorder %s10823_s1, %s8983_s2  ;;  %p8990_p0 = scmp.lt.u32.totalorder %s8983_s2, %s10823_s1 }
 0x1fb   : > { %p8986_p3 = pnand %p8984_p1, %p9408_p8 }
 0x1fd   : > { %p8987_p13 = pneg %p8986_p3 }
 0x1ff   : > { %p8992_p2 = pnand %p8990_p0, %p8987_p13 }
 0x201   : > { %8995 = shalt.err (!%p8992_p2)
}
 0x202   : > { %s8996_s17 = scalar_lea.vmem %s728_s6, 32  ;;  %p9004_p4 = scmp.lt.s32.totalorder %s728_s6, %s728_s6 }
 0x203   : > { %p8997_p5 = scmp.ne.s32.totalorder %s728_s6, %s8996_s17  ;;  %p9005_p10 = scmp.lt.s32.totalorder %s8996_s17, %s8996_s17 }
 0x205   : > { %p8999_p7 = pnand %p8997_p5, %p9408_p8  ;;  %p9006_p11 = por %p9005_p10, %p9004_p4 }
 0x207   : > { %p9000_p9 = pneg %p8999_p7 }
 0x209   : > { %p9007_p12 = pnand %p9006_p11, %p9000_p9 }
 0x20b   : > { %9010 = shalt.err (!%p9007_p12)
}
 0x20c   : > { %7809 = dma.hbm_to_vmem [thread:$0]  (!%p9392_p6), %s10823_s1, 32, %s728_s6, [#allocation27], %s10812_s26, %s10812_s26, %s10811_s18  }
 0x20d   : > { %s9234_s30 = smov [#allocation31]   ;;  %s9235_s13 = smov [#allocation34]  }
 0x20e   : > { %s754_s0 = sshll.u32 %s9234_s30, 4  ;;  %s778_s9 = sshll.u32 %s9235_s13, 4  ;;  %s755_s0 = int_to_ptr.vmem [resolvable:$true] %s754_s0  ;;  %s779_s9 = int_to_ptr.vmem [resolvable:$true] %s778_s9 }
 0x20f   : > { %s10824_s24 = sld [smem:[#allocation68_spill]] }
 0x215   : > { %s9011_s11 = scalar_lea.hbm %s10824_s24, 32 }
 0x216   : > { %p9012_p1 = scmp.ne.s32.totalorder %s10824_s24, %s9011_s11  ;;  %p9018_p0 = scmp.lt.u32.totalorder %s9011_s11, %s10824_s24 }
 0x218   : > { %p9014_p3 = pnand %p9012_p1, %p9408_p8 }
 0x21a   : > { %p9015_p13 = pneg %p9014_p3 }
 0x21c   : > { %p9020_p2 = pnand %p9018_p0, %p9015_p13 }
 0x21e   : > { %9023 = shalt.err (!%p9020_p2)
}
 0x21f   : > { %s9024_s18 = scalar_lea.vmem %s755_s0, 32  ;;  %p9032_p4 = scmp.lt.s32.totalorder %s755_s0, %s755_s0 }
 0x220   : > { %p9025_p5 = scmp.ne.s32.totalorder %s755_s0, %s9024_s18  ;;  %p9033_p10 = scmp.lt.s32.totalorder %s9024_s18, %s9024_s18 }
 0x222   : > { %p9027_p7 = pnand %p9025_p5, %p9408_p8  ;;  %p9034_p11 = por %p9033_p10, %p9032_p4 }
 0x224   : > { %p9028_p9 = pneg %p9027_p7 }
 0x226   : > { %p9035_p12 = pnand %p9034_p11, %p9028_p9 }
 0x228   : > { %9038 = shalt.err (!%p9035_p12)
}
 0x229   : > { %7815 = dma.hbm_to_vmem [thread:$0]  (!%p9392_p6), %s10824_s24, 32, %s755_s0, [#allocation30]  }
 0x22a   : > { %s10825_s25 = sld [smem:[#allocation70_spill]] }
 0x230   : > { %s10826_s16 = smov %s10825_s25  ;;  %s9039_s30 = scalar_lea.hbm %s10825_s25, 16 }
 0x231   : > { %p9040_p1 = scmp.ne.s32.totalorder %s10826_s16, %s9039_s30  ;;  %p9046_p0 = scmp.lt.u32.totalorder %s9039_s30, %s10826_s16 }
 0x233   : > { %p9042_p3 = pnand %p9040_p1, %p9408_p8 }
 0x235   : > { %p9043_p13 = pneg %p9042_p3 }
 0x237   : > { %p9048_p2 = pnand %p9046_p0, %p9043_p13 }
 0x239   : > { %9051 = shalt.err (!%p9048_p2)
}
 0x23a   : > { %s9052_s2 = scalar_lea.vmem %s779_s9, 16  ;;  %s9059_s0 = scalar_lea.vmem %s779_s9, 32 }
 0x23b   : > { %p9053_p5 = scmp.ne.s32.totalorder %s779_s9, %s9052_s2  ;;  %p9060_p4 = scmp.lt.s32.totalorder %s779_s9, %s779_s9 }
 0x23c   : > { %p9061_p10 = scmp.lt.s32.totalorder %s9059_s0, %s9052_s2 }
 0x23d   : > { %p9055_p7 = pnand %p9053_p5, %p9408_p8 }
 0x23e   : > { %p9062_p11 = por %p9061_p10, %p9060_p4 }
 0x23f   : > { %p9056_p9 = pneg %p9055_p7 }
 0x241   : > { %p9063_p12 = pnand %p9062_p11, %p9056_p9 }
 0x243   : > { %9066 = shalt.err (!%p9063_p12)
}
 0x244   : > { %s10827_s15 = sld [smem:[#allocation51_spill]]  ;;  %s10828_s18 = sld [smem:[#allocation50_spill]] }
 0x245   : > { %s10829_s26 = sld [smem:[#allocation49_spill]]  ;;  %s10830_s4 = sld [smem:[#allocation48_spill]] }
 0x246   : > { %s10831_s6 = sld [smem:[#allocation52_spill]] }
 0x247   : > { %7821 = dma.hbm_to_vmem [thread:$0]  (!%p9392_p6), %s10826_s16, 16, %s779_s9, [#allocation33]  }
 0x24a   : > { %s6566_s21 = sadd.s32 4294967294, %s10827_s15   ;;  %s9831_s27 = sadd.s32 1, %s10827_s15  }
 0x24b   : > { %s54_s5 = sadd.s32 1, %s10828_s18  ;;  %s51_s17 = ssub.s32 %s10827_s15, %s9831_s27 }
 0x24c   : > { %p61_p8 = scmp.ne.s32.totalorder %s10828_s18, %s10829_s26  ;;  %p52_p1 = scmp.eq.s32.totalorder %s51_s17, 0 }
 0x24d   : > { %p62_p3 = scmp.eq.s32.totalorder %s10827_s15, 0  ;;  %p67_p13 = scmp.ne.s32.totalorder %s10829_s26, %s10830_s4 }
 0x24e   : > { %p511_p0 = scmp.eq.s32.totalorder %s10831_s6, 1  ;;  %p10832_p5 = scmp.eq.s32.totalorder %s10831_s6, 0 }
 0x24f   : > { %s9843_s25 = scalar_select %p52_p1, %s10828_s18, %s54_s5  }
 0x250   : > { %p63_p2 = por %p62_p3, %p61_p8  ;;  %p9847_p7 = por %p10832_p5, %p67_p13 }
 0x251   : > { %p9851_p6 = por %p511_p0, %p61_p8  ;;  %p517_p9 = scmp.eq.s32.totalorder %s6566_s21, 1 }
 0x252   : > { %p7850_p4 = scmp.lt.s32.totalorder %s10827_s15, 2  ;;  %s789_s13 = sand.u32 1, %s10828_s18  }
 0x253   : > { %s10834_s9 = scalar_select %p9851_p6, 1, 0 }
 0x254   : > { %p9857_p10 = por %p517_p9, %p67_p13  ;;  %s7674_s11 = smul.u32 24, %s789_s13 }
 0x255   : > { %p9861_p11 = pnand %p7850_p4, %p63_p2  ;;  %s7675_s0 = smul.u32 384, %s10827_s15 }
 0x256   : > { %s10835_s22 = scalar_select %p9857_p10, 1, 0 }
 0x257   : > { %s10837_s26 = sld [smem:[#allocation54_spill]]  ;;  %s793_s18 = scalar_lea.vmem [#allocation2], %s7674_s11 }
 0x258   : > { %s800_s21 = sshll.u32 %s793_s18, 4  ;;  %s9873_s5 = scalar_lea.sflag [#allocation3], %s789_s13  ;;  %s9871_s21 = int_to_ptr.vmem [resolvable:$true] %s800_s21 }
 0x259   : > { %p9069_p8 = pneg %p9861_p11 }
 0x25d   : > { %s10838_s4 = smov %s10837_s26  ;;  %s9869_s6 = scalar_lea.hbm %s10837_s26, %s7675_s0 }
 0x25e   : > { %s9067_s17 = scalar_lea.hbm %s9869_s6, 384  ;;  %s9072_s19 = scalar_lea.hbm %s10838_s4, 768 }
 0x25f   : > { %p9068_p12 = scmp.ne.s32.totalorder %s9869_s6, %s9067_s17  ;;  %p9073_p13 = scmp.lt.u32.totalorder %s9869_s6, %s10838_s4 }
 0x260   : > { %p9074_p0 = scmp.lt.u32.totalorder %s9072_s19, %s9067_s17  ;;  %p9076_p5 = scmp.lt.u32.totalorder %s9067_s17, %s9869_s6 }
 0x261   : > { %p9070_p1 = pnand %p9069_p8, %p9068_p12 }
 0x262   : > { %p9075_p2 = por %p9074_p0, %p9073_p13 }
 0x263   : > { %p9071_p3 = pneg %p9070_p1 }
 0x264   : > { %p9077_p9 = por %p9076_p5, %p9075_p2 }
 0x266   : > { %p9078_p4 = pnand %p9077_p9, %p9071_p3 }
 0x268   : > { %9081 = shalt.err (!%p9078_p4)
}
 0x269   : > { %s9082_s13 = scalar_lea.vmem %s9871_s21, 384  ;;  %s9236_s11 = smov [#allocation2]  }
 0x26a   : > { %p9083_p12 = scmp.ne.s32.totalorder %s9871_s21, %s9082_s13  ;;  %s9087_s18 = sshll.u32 %s9236_s11, 4  ;;  %s9088_s18 = int_to_ptr.vmem [resolvable:$false] %s9087_s18 }
 0x26b   : > { %s9089_s15 = scalar_lea.vmem %s9088_s18, 768  ;;  %p9090_p6 = scmp.lt.s32.totalorder %s9871_s21, %s9088_s18 }
 0x26c   : > { %p9085_p1 = pnand %p9083_p12, %p9069_p8  ;;  %p9091_p13 = scmp.lt.s32.totalorder %s9089_s15, %s9082_s13 }
 0x26e   : > { %p9086_p10 = pneg %p9085_p1  ;;  %p9092_p0 = por %p9091_p13, %p9090_p6 }
 0x270   : > { %p9093_p2 = pnand %p9092_p0, %p9086_p10 }
 0x272   : > { %9096 = shalt.err (!%p9093_p2)
}
 0x273   : > { %7825 = dma.hbm_to_vmem [thread:$0]  (!%p9861_p11), %s9869_s6, 384, %s9871_s21, %s9873_s5, %s10819_s3, %s10819_s3, %s10818_s7  }
 0x274   : > { %s10839_s17 = sld [smem:[#allocation53_spill]] }
 0x27a   : > { %p10840_p8 = scmp.ne.s32.totalorder %s10839_s17, 0 }
 0x27b   : > { %s10841_s0 = sld [smem:[#allocation49_spill]] (!%p10840_p8) }
 0x27c   : > { %812 = sbr.rel (%p10840_p8) target bundleno = 8968 (0x2308), region = 104 }
 0x281   : > { %s9907_s19 = sand.u32 (!%p10840_p8), 1, %s10841_s0  }
 0x282   : > { %s7676_s20 = smul.u32 (!%p10840_p8), 24, %s9907_s19  ;;  %s815_s26 = scalar_lea.sflag (!%p10840_p8), [#allocation3], %s9907_s19 }
 0x284   : > { %s9911_s13 = scalar_lea.vmem [#allocation2], %s7676_s20 }
 0x285   : > { %9142 = dma.done.wait (%p9847_p7), %s815_s26, 384  }
 0x286   : > { %9144 = vsyncadd (%p9847_p7), %s815_s26, 4294966912  ;;  %s10842_s2 = sld [smem:[#allocation52_spill]] }
 0x28c   : > { %p10843_p6 = scmp.eq.s32.totalorder %s10842_s2, 0 }
 0x28e   : > { %9146 = dma.done.wait (%p10843_p6), [#allocation6], 768   ;;  %p10844_p10 = pmov %p10843_p6 }
 0x28f   : > { %p10845_p11 = pmov %p10843_p6 }
 0x290   : > { %9148 = vsyncadd (%p10844_p10), [#allocation6], 4294966528 }
 0x291   : > { %9150 = dma.done.wait (%p10845_p11), [#allocation9], 32   ;;  %p10846_p3 = pmov %p10843_p6 }
 0x293   : > { %9152 = vsyncadd (%p10846_p3), [#allocation9], 4294967264  ;;  %p10847_p5 = pmov %p10846_p3 }
 0x294   : > { %p10848_p9 = pmov %p10846_p3 }
 0x295   : > { %9154 = dma.done.wait (%p10847_p5), [#allocation12], 64  }
 0x296   : > { %9156 = vsyncadd (%p10848_p9), [#allocation12], 4294967232  ;;  %p10849_p7 = pmov %p10846_p3 }
 0x297   : > { %p10850_p4 = pmov %p10846_p3 }
 0x298   : > { %9158 = dma.done.wait (%p10849_p7), [#allocation15], 6240  }
 0x299   : > { %9160 = vsyncadd (%p10850_p4), [#allocation15], 4294961056  ;;  %p10851_p12 = pmov %p10846_p3 }
 0x29a   : > { %p10852_p1 = pmov %p10846_p3 }
 0x29b   : > { %9162 = dma.done.wait (%p10851_p12), [#allocation18], 2080  }
 0x29c   : > { %9164 = vsyncadd (%p10852_p1), [#allocation18], 4294965216  ;;  %p10853_p13 = pmov %p10852_p1 }
 0x29d   : > { %p10854_p0 = pmov %p10852_p1 }
 0x29e   : > { %9166 = dma.done.wait (%p10853_p13), [#allocation21], 64  }
 0x29f   : > { %9168 = vsyncadd (%p10854_p0), [#allocation21], 4294967232  ;;  %p10855_p2 = pmov %p10854_p0 }
 0x2a0   : > { %p10856_p8 = pmov %p10854_p0 }
 0x2a1   : > { %9170 = dma.done.wait (%p10855_p2), [#allocation24], 8320  }
 0x2a2   : > { %9172 = vsyncadd (%p10856_p8), [#allocation24], 4294958976  ;;  %p10857_p6 = pmov %p10854_p0 }
 0x2a3   : > { %p10858_p10 = pmov %p10854_p0 }
 0x2a4   : > { %9174 = dma.done.wait (%p10857_p6), [#allocation27], 8224  }
 0x2a5   : > { %9176 = vsyncadd (%p10858_p10), [#allocation27], 4294959072  ;;  %p10859_p11 = pmov %p10854_p0 }
 0x2a6   : > { %p10860_p3 = pmov %p10854_p0 }
 0x2a7   : > { %9178 = dma.done.wait (%p10859_p11), [#allocation30], 2080  }
 0x2a8   : > { %9180 = vsyncadd (%p10860_p3), [#allocation30], 4294965216  ;;  %p10861_p5 = pmov %p10854_p0 }
 0x2a9   : > { %p10862_p9 = pmov %p10854_p0 }
 0x2aa   : > { %9182 = dma.done.wait (%p10861_p5), [#allocation33], 2064  }
 0x2ab   : > { %9184 = vsyncadd (%p10862_p9), [#allocation33], 4294965232  ;;  %v8002_v0 = vld [vmem:[#allocation5] sm:$0xff]   ;;  %v8003_v1 = vld [vmem:[#allocation5 + $0x8] sm:$0xff]   ;;  %vm989_vm0 = vcmask 392192   ;;  %vm1050_vm1 = vcmask 1040384  }
 0x2ac   : > { %7264 = vmatprep.subr.bf16.mxu0 %v8002_v0  ;;  %v957_v2 = vld [vmem:[%s9911_s13] sm:$0xff]  ;;  %v958_v3 = vld [vmem:[%s9911_s13 + $0x8] sm:$0xff]  ;;  %v959_v6 = vld [vmem:[%s9911_s13 + $0x10] sm:$0x1]  ;;  %vm9239_vm2 = vmmov 0   ;;  %vm1450_vm3 = vcmask 261120  }
 0x2ad   : > { %7265 = vmatpush3.bf16.msra.mxu0 %v8002_v0  ;;  %v8004_v4 = vld [vmem:[#allocation5 + $0x10] sm:$0xff]   ;;  %v960_v5 = vpack.c.bf16 %v958_v3, %v957_v2  ;;  %v961_v7 = vpack.c.bf16 %v959_v6, %v959_v6  ;;  %v970_v8 = vld [vmem:[#allocation7 + $0x10] sm:$0x1]  ;;  %v968_v9 = vld [vmem:[#allocation7] sm:$0xff]  ;;  %s9241_s7 = smov 96   ;;  %vm1552_vm5 = vcmask 138240  }
 0x2ae   : > { %7266 = vmatprep.subr.bf16.mxu0 %v8003_v1  ;;  %v969_v16 = vld [vmem:[#allocation7 + $0x8] sm:$0xff]  ;;  %v6616_v42 = vld [vmem:[#allocation8] ss:$0 sm:$0xff]  ;;  %v6617_v44 = vld [vmem:[#allocation10] ss:$0 sm:$0xff]  ;;  %vm1559_vm6 = vcmask 131072  }
 0x2af   : > { %7270 = vmatprep.mubr.msk.bf16.mxu0 %vm989_vm0, %v960_v5  ;;  %v8005_v56 = vld [vmem:[#allocation14 + $0x4] ss:$12 sps:$4 sm:$0xff]   ;;  %v8007_v57 = vld [vmem:[#allocation14] ss:$12 sps:$4 sm:$0xff]   ;;  %v8008_v58 = vld [vmem:[#allocation14 + $0x8] ss:$12 sps:$4 sm:$0xff]  }
 0x2b0   : > { %v8009_v59 = vld [vmem:[#allocation14 + $0x1c] ss:$12 sps:$4 sm:$0xff]   ;;  %1335 = vmatprep.subr.bf16.mxu1 %v8005_v56  ;;  %vm10015_vm4 = vmpackc.low %vm1450_vm3, %vm1450_vm3  ;;  %s9242_s3 = smov 64   ;;  %s9243_s30 = smov 32  }
 0x2b1   : > { %7267 = vmatpush3.bf16.msra.mxu0 %v8003_v1  ;;  %1336 = vmatpush1.bf16.msra.mxu1 %v8007_v57  ;;  %s6974_s6 = sshll.u32 %s10842_s2, 4  ;;  %s955_s21 = scalar_lea.vmem [#allocation35], %s9907_s19 }
 0x2b2   : > { %7268 = vmatprep.subr.bf16.mxu0 %v8004_v4  ;;  %1337 = vmatprep.subr.bf16.mxu1 %v8009_v59  ;;  %v9240_v59 = vmov 0.0   ;;  %s6310_s5 = sshll.u32 %s955_s21, 4  ;;  %s10865_s15 = sld [smem:[#allocation71_spill]]  ;;  %s10676_s5 = int_to_ptr.vmem [resolvable:$true] %s6310_s5 }
 0x2b3   : > { %s6298_s0 = scalar_lea.sflag [#allocation4], %s9907_s19  ;;  %s9097_s20 = scalar_lea.vmem %s10676_s5, 16 }
 0x2b4   : > { %p9098_p7 = scmp.ne.s32.totalorder %s10676_s5, %s9097_s20  ;;  %p10866_p4 = scmp.ne.s32.totalorder %s10834_s9, 0 }
 0x2b5   : > { %7269 = vmatpush3.bf16.msra.mxu0 %v8004_v4  ;;  %s9244_s26 = smov [#allocation35]  }
 0x2b6   : > { %7274 = vmatprep.subr.bf16.mxu0 %v8008_v58  ;;  %p9099_p12 = pnand %p9098_p7, %p10866_p4  ;;  %s9101_s13 = sshll.u32 %s9244_s26, 4  ;;  %s9102_s13 = int_to_ptr.vmem [resolvable:$false] %s9101_s13 }
 0x2b7   : > { %s9103_s2 = scalar_lea.vmem %s9102_s13, 32  ;;  %p9104_p13 = scmp.lt.s32.totalorder %s10676_s5, %s9102_s13 }
 0x2b8   : > { %7271 = vmatmul.mubr.msk.bf16.vlgmr.msra.gmra.mrb[0].mxu0 %vm989_vm0, %v961_v7  ;;  %s10674_s17 = scalar_lea.hbm %s10865_s15, %s6974_s6  ;;  %p9100_p1 = pneg %p9099_p12 }
 0x2b9   : > { %7275 = vmatpush3.bf16.msra.mxu0 %v8008_v58  ;;  %v9238_v58 = vmov 0.0|0.0   ;;  %p9105_p0 = scmp.lt.s32.totalorder %s9103_s2, %s9097_s20 }
 0x2bb   : > { %p9106_p2 = por %p9105_p0, %p9104_p13 }
 0x2bd   : > { %p9107_p8 = pnand %p9106_p2, %p9100_p1 }
 0x38b   : > { %v7272_v10 = vpop.f32.mrb[0].mxu0 }
 0x38c   : > { %v1039_v11 = vadd.f32 %v7272_v10, %v970_v8  ;;  %v1030_v12 = vpop.f32.mrb[1].mxu0  ;;  %v8012_v10 = vld [vmem:[#allocation14 + $0x20] ss:$12 sps:$4 sm:$0xff]  }
 0x38d   : > { %v1031_v13 = vadd.f32 %v1030_v12, %v968_v9  ;;  %v7273_v14 = vpop.f32.mrb[2].mxu0  ;;  %v8011_v9 = vld [vmem:[#allocation14 + $0x18] ss:$12 sps:$4 sm:$0xff]   ;;  %7276 = vmatprep.subr.bf16.mxu0 %v8012_v10  ;;  %v8015_v12 = vld [vmem:[#allocation14 + $0x30] ss:$12 sps:$4 sm:$0xff]  }
 0x38e   : > { %v1033_v15 = vpop.f32.mrb[3].mxu0  ;;  %v1051_v17 = vsel %vm1050_vm1, %v1039_v11, 0.0  ;;  %1338 = vmatpush1.bf16.msra.mxu1 %v8011_v9  ;;  %7277 = vmatpush3.bf16.msra.mxu0 %v8012_v10  ;;  %v8017_v14 = vld [vmem:[#allocation14 + $0x4c] ss:$12 sps:$4 sm:$0xff]  }
 0x38f   : > { %1052 = vadd.xlane.f32.xlu1 %v1051_v17  ;;  %1046 = vadd.xlane.f32.xlu0 %v1031_v13  ;;  %v1034_v18 = vadd.f32 %v1033_v15, %v969_v16  ;;  %v8019_v15 = vld [vmem:[#allocation14 + $0x48] ss:$12 sps:$4 sm:$0xff]   ;;  %v8020_v16 = vld [vmem:[#allocation14 + $0x50] ss:$12 sps:$4 sm:$0xff]  }
 0x390   : > { %v8021_v17 = vld [vmem:[#allocation14 + $0x64] ss:$12 sps:$4 sm:$0xff]  }
 0x393   : > { %1048 = vadd.xlane.f32.xlu0 %v1034_v18 }
 0x41c   : > { %v1053_v19 = vpop.xlane.xlu1 %1052  ;;  %v1047_v20 = vpop.xlane.xlu0 %1046 }
 0x41d   : > { %v1057_v21 = vmul.f32 0.0078125, %v1053_v19  ;;  %v1055_v22 = vmul.f32 0.0078125, %v1047_v20  ;;  %v8024_v19 = vld [vmem:[#allocation14 + $0x68] ss:$12 sps:$4 sm:$0xff]  }
 0x41e   : > { %v8025_v20 = vld [vmem:[#allocation14 + $0x7c] ss:$12 sps:$4 sm:$0xff]  }
 0x41f   : > { %v1060_v23 = vsub.f32 %v1039_v11, %v1057_v21  ;;  %v1058_v24 = vsub.f32 %v1031_v13, %v1055_v22  ;;  %v8013_v11 = vld [vmem:[#allocation14 + $0x34] ss:$12 sps:$4 sm:$0xff]   ;;  %v8016_v13 = vld [vmem:[#allocation14 + $0x38] ss:$12 sps:$4 sm:$0xff]  }
 0x420   : > { %v1049_v25 = vpop.xlane.xlu0 %1048  ;;  %1339 = vmatprep.subr.bf16.mxu1 %v8013_v11  ;;  %7278 = vmatprep.subr.bf16.mxu0 %v8016_v13  ;;  %v8028_v21 = vld [vmem:[#allocation14 + $0x80] ss:$12 sps:$4 sm:$0xff]   ;;  %v8027_v22 = vld [vmem:[#allocation14 + $0x78] ss:$12 sps:$4 sm:$0xff]  }
 0x421   : > { %v1056_v26 = vmul.f32 0.0078125, %v1049_v25  ;;  %v1061_v27 = vmul.f32 %v1058_v24, %v1058_v24  ;;  %v1063_v28 = vmul.f32 %v1060_v23, %v1060_v23  ;;  %1340 = vmatpush1.bf16.msra.mxu1 %v8015_v12  ;;  %7279 = vmatpush3.bf16.msra.mxu0 %v8016_v13  ;;  %v8032_v25 = vld [vmem:[#allocation14 + $0x98] ss:$12 sps:$4 sm:$0xff]  }
 0x422   : > { %1341 = vmatprep.subr.bf16.mxu1 %v8017_v14  ;;  %7280 = vmatprep.subr.bf16.mxu0 %v8020_v16 }
 0x423   : > { %1064 = vadd.xlane.f32.xlu1 %v1061_v27  ;;  %v1059_v29 = vsub.f32 %v1034_v18, %v1056_v26  ;;  %v1068_v31 = vsel %vm1050_vm1, %v1063_v28, 0.0  ;;  %v8023_v18 = vld [vmem:[#allocation14 + $0x60] ss:$12 sps:$4 sm:$0xff]   ;;  %v8031_v26 = vld [vmem:[#allocation14 + $0x90] ss:$12 sps:$4 sm:$0xff]  }
 0x424   : > { %v8033_v27 = vld [vmem:[#allocation14 + $0xac] ss:$12 sps:$4 sm:$0xff]   ;;  %v8036_v28 = vld [vmem:[#allocation14 + $0xb0] ss:$12 sps:$4 sm:$0xff]  }
 0x425   : > { %v1062_v30 = vmul.f32 %v1059_v29, %v1059_v29  ;;  %1342 = vmatpush1.bf16.msra.mxu1 %v8019_v15  ;;  %7281 = vmatpush3.bf16.msra.mxu0 %v8020_v16 }
 0x426   : > { %1343 = vmatprep.subr.bf16.mxu1 %v8021_v17  ;;  %7282 = vmatprep.subr.bf16.mxu0 %v8024_v19 }
 0x427   : > { %1069 = vadd.xlane.f32.xlu1 %v1068_v31  ;;  %1066 = vadd.xlane.f32.xlu0 %v1062_v30 }
 0x429   : > { %1344 = vmatpush1.bf16.msra.mxu1 %v8023_v18  ;;  %7283 = vmatpush3.bf16.msra.mxu0 %v8024_v19 }
 0x42a   : > { %1345 = vmatprep.subr.bf16.mxu1 %v8025_v20  ;;  %7284 = vmatprep.subr.bf16.mxu0 %v8028_v21 }
 0x42d   : > { %1346 = vmatpush1.bf16.msra.mxu1 %v8027_v22  ;;  %7285 = vmatpush3.bf16.msra.mxu0 %v8028_v21 }
 0x42e   : > { %7286 = vmatprep.subr.bf16.mxu0 %v8032_v25 }
 0x431   : > { %7287 = vmatpush3.bf16.msra.mxu0 %v8032_v25 }
 0x432   : > { %7288 = vmatprep.subr.bf16.mxu0 %v8036_v28 }
 0x435   : > { %7289 = vmatpush3.bf16.msra.mxu0 %v8036_v28 }
 0x436   : > { %7622 = vmatprep.subr.bf16.mxu0 %v9238_v58 }
 0x4b0   : > { %v1065_v32 = vpop.xlane.xlu1 %1064 }
 0x4b1   : > { %v1071_v33 = vmul.f32 0.0078125, %v1065_v32 }
 0x4b3   : > { %v1074_v34 = vadd.f32 1e-05, %v1071_v33 }
 0x4b4   : > { %v1070_v35 = vpop.xlane.xlu1 %1069  ;;  %v1067_v36 = vpop.xlane.xlu0 %1066 }
 0x4b5   : > { %8285 = vrsqrt.f32 %v1074_v34  ;;  %v1073_v37 = vmul.f32 0.0078125, %v1070_v35  ;;  %v1072_v38 = vmul.f32 0.0078125, %v1067_v36 }
 0x4b7   : > { %v1076_v39 = vadd.f32 1e-05, %v1073_v37  ;;  %v1075_v40 = vadd.f32 1e-05, %v1072_v38 }
 0x4b9   : > { %8287 = vrsqrt.f32 %v1076_v39 }
 0x4ba   : > { %8289 = vrsqrt.f32 %v1075_v40 }
 0x4bf   : > { %v8286_v41 = vpop.eup %8285 }
 0x4c0   : > { %v1080_v43 = vmul.f32 %v8286_v41, %v1058_v24  ;;  %v9237_v24 = vmov 0   ;;  %v6618_v41 = vld [vmem:[#allocation11] ss:$0 sm:$0xff] }
 0x4c1   : > { %1367 = vmatprep.mubr.bf16.mxu1 %v9237_v24 }
 0x4c2   : > { %v1089_v45 = vmul.f32 %v6616_v42, %v1080_v43 }
 0x4c3   : > { %v8288_v46 = vpop.eup %8287 }
 0x4c4   : > { %v8290_v47 = vpop.eup %8289  ;;  %v9962_v48 = vadd.f32 %v6617_v44, %v1089_v45  ;;  %v1082_v49 = vmul.f32 %v8288_v46, %v1060_v23  ;;  %v8029_v23 = vld [vmem:[#allocation14 + $0x94] ss:$12 sps:$4 sm:$0xff]   ;;  %v6619_v46 = vld [vmem:[#allocation13] ss:$0 sm:$0xff] }
 0x4c5   : > { %v1081_v50 = vmul.f32 %v8290_v47, %v1059_v29  ;;  %1347 = vmatprep.subr.bf16.mxu1 %v8029_v23  ;;  %v8035_v29 = vld [vmem:[#allocation14 + $0xa8] ss:$12 sps:$4 sm:$0xff]  }
 0x4c6   : > { %1103 = vadd.xlane.f32.xlu0 %v9962_v48  ;;  %v1091_v51 = vmul.f32 %v6616_v42, %v1082_v49  ;;  %1348 = vmatpush1.bf16.msra.mxu1 %v8031_v26 }
 0x4c7   : > { %v1090_v52 = vmul.f32 %v6616_v42, %v1081_v50  ;;  %1349 = vmatprep.subr.bf16.mxu1 %v8033_v27 }
 0x4c8   : > { %v9965_v53 = vadd.f32 %v6617_v44, %v1091_v51 }
 0x4c9   : > { %v9967_v54 = vadd.f32 %v6617_v44, %v1090_v52 }
 0x4ca   : > { %v1107_v55 = vsel %vm1050_vm1, %v9965_v53, 0.0  ;;  %1350 = vmatpush1.bf16.msra.mxu1 %v8035_v29 }
 0x4cb   : > { %1105 = vadd.xlane.f32.xlu1 %v9967_v54  ;;  %1108 = vadd.xlane.f32.xlu0 %v1107_v55 }
 0x4cc   : > { %7618 = vmatprep.subr.bf16.mxu1 %v9238_v58 }
 0x553   : > { %v1104_v60 = vpop.xlane.xlu0 %1103 }
 0x554   : > { %v1110_v61 = vmul.f32 0.0078125, %v1104_v60  ;;  %v1192_v60 = vlaneseq }
 0x556   : > { %v9973_v62 = vsub.f32 %v9962_v48, %v1110_v61  ;;  %v9999_v61 = vshrl.u32 %v1192_v60, 7 }
 0x558   : > { %v1106_v63 = vpop.xlane.xlu1 %1105  ;;  %v1109_v0 = vpop.xlane.xlu0 %1108  ;;  %v1116_v1 = vmul.f32 %v9973_v62, %v9973_v62 }
 0x559   : > { %v1111_v2 = vmul.f32 0.0078125, %v1106_v63  ;;  %v1112_v3 = vmul.f32 0.0078125, %v1109_v0  ;;  %v1190_v63 = vld [vmem:[#allocation16] sm:$0x7]  ;;  %v10005_v0 = vsub.s32 2, %v9999_v61 }
 0x55a   : > { %1119 = vadd.xlane.f32.xlu1 %v1116_v1 }
 0x55b   : > { %v9978_v4 = vsub.f32 %v9965_v53, %v1112_v3  ;;  %v9981_v5 = vsub.f32 %v9967_v54, %v1111_v2  ;;  %v10009_v3 = vsub.s32 0, %v9999_v61 }
 0x55d   : > { %v1117_v6 = vmul.f32 %v9981_v5, %v9981_v5  ;;  %v1118_v7 = vmul.f32 %v9978_v4, %v9978_v4  ;;  %v1195_v14 = vrot.slane %v1190_v63, %v10009_v3 }
 0x55f   : > { %1121 = vadd.xlane.f32.xlu0 %v1117_v6  ;;  %v1123_v8 = vsel %vm1050_vm1, %v1118_v7, 0.0 }
 0x560   : > { %1124 = vadd.xlane.f32.xlu1 %v1123_v8 }
 0x5e7   : > { %v1120_v30 = vpop.xlane.xlu1 %1119 }
 0x5e8   : > { %v1126_v31 = vmul.f32 0.0078125, %v1120_v30 }
 0x5ea   : > { %v1129_v32 = vadd.f32 1e-05, %v1126_v31 }
 0x5ec   : > { %8291 = vrsqrt.f32 %v1129_v32  ;;  %v1122_v33 = vpop.xlane.xlu0 %1121 }
 0x5ed   : > { %v1127_v34 = vmul.f32 0.0078125, %v1122_v33  ;;  %v1125_v35 = vpop.xlane.xlu1 %1124 }
 0x5ee   : > { %v1128_v36 = vmul.f32 0.0078125, %v1125_v35 }
 0x5ef   : > { %v1130_v37 = vadd.f32 1e-05, %v1127_v34 }
 0x5f0   : > { %v1131_v38 = vadd.f32 1e-05, %v1128_v36 }
 0x5f1   : > { %8293 = vrsqrt.f32 %v1130_v37 }
 0x5f2   : > { %8295 = vrsqrt.f32 %v1131_v38 }
 0x5f6   : > { %v8292_v39 = vpop.eup %8291 }
 0x5f7   : > { %v1135_v40 = vmul.f32 %v8292_v39, %v9973_v62  ;;  %v10002_v62 = vsub.s32 1, %v9999_v61 }
 0x5f9   : > { %v1144_v45 = vmul.f32 %v6618_v41, %v1135_v40  ;;  %v1199_v2 = vrot.slane %v1190_v63, %v10002_v62 }
 0x5fb   : > { %v8294_v42 = vpop.eup %8293  ;;  %v1153_v51 = vadd.f32 %v6619_v46, %v1144_v45 }
 0x5fc   : > { %v8296_v43 = vpop.eup %8295  ;;  %v1136_v44 = vmul.f32 %v8294_v42, %v9981_v5  ;;  %v1203_v5 = vrot.slane %v1190_v63, %v10005_v0 }
 0x5fd   : > { %v1137_v47 = vmul.f32 %v8296_v43, %v9978_v4 }
 0x5fe   : > { %v1145_v49 = vmul.f32 %v6618_v41, %v1136_v44 }
 0x5ff   : > { %v1146_v50 = vmul.f32 %v6618_v41, %v1137_v47 }
 0x600   : > { %v1154_v52 = vadd.f32 %v6619_v46, %v1145_v49 }
 0x601   : > { %v1155_v55 = vadd.f32 %v6619_v46, %v1146_v50 }
 0x602   : > { %v1156_v56 = vpack.c.bf16 %v1154_v52, %v1153_v51 }
 0x603   : > { %v1157_v57 = vpack.c.bf16 %v1155_v55, %v1155_v55 }
 0x604   : > { %1368 = vmatmul.mubr.bf16.vlgmr.msra.gmra.mrb[0].mxu1 %v1156_v56  ;;  %7290 = vmatprep.mubr.bf16.mxu0 %v1156_v56 }
 0x605   : > { %7291 = vmatmul.mubr.bf16.vlgmr.msra.gmra.mrb[4].mxu0 %v1157_v57  ;;  %1377 = vmatprep.mubr.bf16.mxu1 %v9237_v24 }
 0x606   : > { %7315 = vmatprep.mubr.msk.f32.mxu0 %vm9239_vm2, %v9240_v59 }
 0x60c   : > { %1378 = vmatmul.mubr.bf16.gmra.mrb[4].mxu1 %v1157_v57 }
 0x60d   : > { %7300 = vmatprep.mubr.msk.f32.mxu1 %vm9239_vm2, %v9240_v59 }
 0x6d7   : > { %v1369_v1 = vpop.f32.mrb[0].mxu1 }
 0x6d8   : > { %v1371_v4 = vpop.f32.mrb[1].mxu1  ;;  %v7292_v6 = vpop.f32.mrb[4].mxu0  ;;  %v10041_v30 = vadd.f32 %v1369_v1, %v1195_v14 }
 0x6d9   : > { %v1373_v7 = vpop.f32.mrb[2].mxu1  ;;  %v1420_v8 = vpop.f32.mrb[5].mxu0  ;;  %v1372_v11 = vadd.f32 %v1371_v4, %v1199_v2  ;;  %v10033_v28 = vadd.f32 %v7292_v6, %v1203_v5 }
 0x6da   : > { %v1375_v9 = vpop.f32.mrb[3].mxu1  ;;  %v7293_v10 = vpop.f32.mrb[6].mxu0  ;;  %v1421_v15 = vadd.f32 %v1420_v8, %v1203_v5  ;;  %v10049_v31 = vadd.f32 %v1373_v7, %v1195_v14 }
 0x6db   : > { %v1376_v12 = vadd.f32 %v1375_v9, %v1199_v2  ;;  %v1423_v13 = vpop.f32.mrb[7].mxu0 }
 0x6dc   : > { %v1424_v16 = vadd.f32 %v1423_v13, %v1203_v5 }
 0x6dd   : > { %v7619_v18 = vpack.c.bf16 %v1376_v12, %v1372_v11  ;;  %v10019_v19 = vpack.i.bf16 %v1376_v12, %v1372_v11 }
 0x6de   : > { %v7623_v20 = vpack.c.bf16 %v1424_v16, %v1421_v15  ;;  %v10021_v21 = vpack.i.bf16 %v1424_v16, %v1421_v15 }
 0x6df   : > { %v1379_v22 = vpop.f32.mrb[4].mxu1  ;;  %7943 = vrot.lane.b32.xlu0 %v10019_v19, %s9241_s7  ;;  %7621 = vmatpush3.bf16.xpose.msk.msra.mxu1 %vm10015_vm4, %v7619_v18 }
 0x6e0   : > { %v10027_v23 = vadd.f32 %v1379_v22, %v1195_v14  ;;  %v1381_v25 = vpop.f32.mrb[5].mxu1  ;;  %7624 = vmatpush3.bf16.msra.mxu0 %v7623_v20  ;;  %7298 = vmatprep.subr.mxu1 %v9240_v59 }
 0x6e1   : > { %v10030_v26 = vadd.f32 %v1381_v25, %v1199_v2  ;;  %v1383_v27 = vpop.f32.mrb[6].mxu1  ;;  %7313 = vmatprep.subr.mxu0 %v9240_v59 }
 0x6e2   : > { %v1384_v29 = vpop.f32.mrb[7].mxu1 }
 0x6e3   : > { %1691 = vrot.lane.b32.xlu1 %v10030_v26, %s9241_s7  ;;  %1685 = vrot.lane.b32.xlu0 %v10027_v23, %s9241_s7 }
 0x6e4   : > { %7314 = vmatpush3.msk.msra.mxu0 %vm1050_vm1, %v10033_v28 }
 0x6e5   : > { %7629 = vmatprep.subr.bf16.mxu0 %v9238_v58 }
 0x6e7   : > { %7299 = vmatpush3.xpose.msk.msra.mxu1 %vm1450_vm3, %v10030_v26  ;;  %1681 = vrot.lane.b32.xlu1 %v10041_v30, %s9241_s7 }
 0x6e8   : > { %7625 = vmatprep.subr.bf16.mxu1 %v9238_v58 }
 0x6ea   : > { %7301 = vmatmul.mubr.msk.f32.vlgmr.msra.gmra.mrb[8].mxu1 %vm1450_vm3, %v10041_v30 }
 0x6eb   : > { %1683 = vrot.lane.b32.xlu1 %v10049_v31, %s9241_s7  ;;  %7303 = vmatprep.mubr.msk.f32.mxu1 %vm9239_vm2, %v9240_v59 }
 0x6ee   : > { %7304 = vmatmul.mubr.msk.f32.gmra.mrb[10].mxu1 %vm1450_vm3, %v10049_v31 }
 0x6ef   : > { %7306 = vmatprep.mubr.msk.f32.mxu1 %vm9239_vm2, %v9240_v59 }
 0x6f2   : > { %7307 = vmatmul.mubr.msk.f32.gmra.mrb[12].mxu1 %vm1450_vm3, %v10027_v23 }
 0x6f3   : > { %7330 = vmatprep.mubr.msk.f32.mxu1 %vm9239_vm2, %v9240_v59 }
 0x751   : > { %v7944_v32 = vpop.permute.xlu0 %7943 }
 0x752   : > { %v7946_v33 = vunpack.i.h.bf16 %v7944_v32  ;;  %v7945_v34 = vunpack.i.l.bf16 %v7944_v32 }
 0x754   : > { %v7626_v35 = vpack.c.bf16 %v7946_v33, %v7945_v34 }
 0x755   : > { %v1692_v36 = vpop.permute.xlu1 %1691  ;;  %v1686_v39 = vpop.permute.xlu0 %1685 }
 0x756   : > { %7628 = vmatpush3.bf16.xpose.msk.msra.mxu1 %vm10015_vm4, %v7626_v35 }
 0x757   : > { %7328 = vmatprep.subr.mxu1 %v9240_v59 }
 0x759   : > { %v1682_v37 = vpop.permute.xlu1 %1681 }
 0x75d   : > { %v1684_v38 = vpop.permute.xlu1 %1683 }
 0x75e   : > { %7329 = vmatpush3.xpose.msk.msra.mxu1 %vm1450_vm3, %v1692_v36 }
 0x761   : > { %7331 = vmatmul.mubr.msk.f32.vlgmr.msra.gmra.mrb[14].mxu1 %vm1450_vm3, %v1682_v37 }
 0x762   : > { %7333 = vmatprep.mubr.msk.f32.mxu1 %vm9239_vm2, %v9240_v59 }
 0x765   : > { %7334 = vmatmul.mubr.msk.f32.gmra.mrb[16].mxu1 %vm1450_vm3, %v1684_v38 }
 0x766   : > { %7336 = vmatprep.mubr.msk.f32.mxu1 %vm9239_vm2, %v9240_v59 }
 0x769   : > { %7337 = vmatmul.mubr.msk.f32.gmra.mrb[18].mxu1 %vm1450_vm3, %v1686_v39 }
 0x7bd   : > { %v1535_v40 = vpop.f32.mrb[8].mxu1 }
 0x7be   : > { %v1549_v41 = vmul.f32 0.17677669, %v1535_v40  ;;  %v7302_v42 = vpop.f32.mrb[9].mxu1 }
 0x7c0   : > { %v1553_v43 = vsel %vm1552_vm5, %v1549_v41, -inf }
 0x7c1   : > { %1554 = vmax.xlane.f32.xlu1 %v1553_v43  ;;  %v1540_v44 = vpop.f32.mrb[10].mxu1 }
 0x7c2   : > { %v1550_v45 = vmul.f32 0.17677669, %v1540_v44  ;;  %v7305_v46 = vpop.f32.mrb[11].mxu1 }
 0x7c4   : > { %v1556_v47 = vsel %vm1552_vm5, %v1550_v45, -inf }
 0x7c5   : > { %1557 = vmax.xlane.f32.xlu0 %v1556_v47  ;;  %v1545_v49 = vpop.f32.mrb[12].mxu1 }
 0x7c6   : > { %v1551_v50 = vmul.f32 0.17677669, %v1545_v49  ;;  %v7308_v51 = vpop.f32.mrb[13].mxu1 }
 0x7c8   : > { %v1560_v52 = vsel %vm1559_vm6, %v1551_v50, -inf }
 0x7c9   : > { %1561 = vmax.xlane.f32.xlu0 %v1560_v52 }
 0x834   : > { %v1771_v55 = vpop.f32.mrb[14].mxu1 }
 0x835   : > { %v1785_v56 = vmul.f32 0.17677669, %v1771_v55  ;;  %v7332_v57 = vpop.f32.mrb[15].mxu1 }
 0x837   : > { %v1788_v60 = vsel %vm1552_vm5, %v1785_v56, -inf }
 0x838   : > { %1789 = vmax.xlane.f32.xlu0 %v1788_v60  ;;  %v1776_v63 = vpop.f32.mrb[16].mxu1 }
 0x839   : > { %v1786_v1 = vmul.f32 0.17677669, %v1776_v63  ;;  %v7335_v2 = vpop.f32.mrb[17].mxu1 }
 0x83b   : > { %v1791_v4 = vsel %vm1552_vm5, %v1786_v1, -inf }
 0x83c   : > { %1792 = vmax.xlane.f32.xlu1 %v1791_v4  ;;  %v1781_v5 = vpop.f32.mrb[18].mxu1 }
 0x83d   : > { %v1787_v6 = vmul.f32 0.17677669, %v1781_v5  ;;  %v7338_v7 = vpop.f32.mrb[19].mxu1 }
 0x83e   : > { %v8037_v7 = vld [vmem:[#allocation17] sm:$0xff]  }
 0x83f   : > { %v1794_v8 = vsel %vm1559_vm6, %v1787_v6, -inf }
 0x840   : > { %1795 = vmax.xlane.f32.xlu0 %v1794_v8 }
 0x84e   : > { %v1555_v9 = vpop.xlane.xlu1 %1554 }
 0x84f   : > { %v1563_v10 = vsub.f32 %v1549_v41, %v1555_v9  ;;  %v8038_v9 = vld [vmem:[#allocation17 + $0x8] sm:$0xff]  }
 0x851   : > { %v1566_v11 = vmul.f32 1.442695, %v1563_v10 }
 0x852   : > { %v1558_v12 = vpop.xlane.xlu0 %1557 }
 0x853   : > { %8297 = vpow2.f32 %v1566_v11  ;;  %v1564_v13 = vsub.f32 %v1550_v45, %v1558_v12 }
 0x855   : > { %v1568_v14 = vmul.f32 1.442695, %v1564_v13 }
 0x856   : > { %v1562_v15 = vpop.xlane.xlu0 %1561 }
 0x857   : > { %8299 = vpow2.f32 %v1568_v14  ;;  %v1565_v16 = vsub.f32 %v1551_v50, %v1562_v15  ;;  %v8040_v14 = vld [vmem:[#allocation17 + $0x18] sm:$0xff]  }
 0x859   : > { %v1570_v18 = vmul.f32 1.442695, %v1565_v16 }
 0x85b   : > { %8301 = vpow2.f32 %v1570_v18 }
 0x85d   : > { %v8298_v20 = vpop.eup %8297 }
 0x85e   : > { %v1572_v22 = vsel %vm1552_vm5, %v8298_v20, 0.0 }
 0x85f   : > { %1573 = vadd.xlane.f32.xlu1 %v1572_v22 }
 0x861   : > { %v8300_v25 = vpop.eup %8299 }
 0x862   : > { %v1575_v27 = vsel %vm1552_vm5, %v8300_v25, 0.0 }
 0x863   : > { %1576 = vadd.xlane.f32.xlu0 %v1575_v27 }
 0x865   : > { %v8302_v29 = vpop.eup %8301 }
 0x866   : > { %v1578_v32 = vsel %vm1559_vm6, %v8302_v29, 0.0 }
 0x867   : > { %1579 = vadd.xlane.f32.xlu1 %v1578_v32 }
 0x8c5   : > { %v1790_v33 = vpop.xlane.xlu0 %1789 }
 0x8c6   : > { %v1797_v34 = vsub.f32 %v1785_v56, %v1790_v33 }
 0x8c8   : > { %v1800_v35 = vmul.f32 1.442695, %v1797_v34 }
 0x8c9   : > { %v1793_v36 = vpop.xlane.xlu1 %1792 }
 0x8ca   : > { %8303 = vpow2.f32 %v1800_v35  ;;  %v1798_v37 = vsub.f32 %v1786_v1, %v1793_v36 }
 0x8cc   : > { %v1802_v38 = vmul.f32 1.442695, %v1798_v37 }
 0x8cd   : > { %v1796_v39 = vpop.xlane.xlu0 %1795 }
 0x8ce   : > { %8305 = vpow2.f32 %v1802_v38  ;;  %v1799_v40 = vsub.f32 %v1787_v6, %v1796_v39 }
 0x8d0   : > { %v1804_v41 = vmul.f32 1.442695, %v1799_v40 }
 0x8d2   : > { %8307 = vpow2.f32 %v1804_v41 }
 0x8d4   : > { %v8304_v42 = vpop.eup %8303 }
 0x8d5   : > { %v1806_v43 = vsel %vm1552_vm5, %v8304_v42, 0.0 }
 0x8d6   : > { %1807 = vadd.xlane.f32.xlu0 %v1806_v43 }
 0x8d8   : > { %v10086_v44 = vpop.eup %8305 }
 0x8d9   : > { %v1809_v45 = vsel %vm1552_vm5, %v10086_v44, 0.0 }
 0x8da   : > { %1810 = vadd.xlane.f32.xlu1 %v1809_v45 }
 0x8dc   : > { %v10090_v46 = vpop.eup %8307 }
 0x8dd   : > { %v1812_v47 = vsel %vm1559_vm6, %v10090_v46, 0.0 }
 0x8de   : > { %1813 = vadd.xlane.f32.xlu0 %v1812_v47 }
 0x8eb   : > { %7948 = vrot.lane.b32.xlu1 %v10021_v21, %s9241_s7 }
 0x8ec   : > { %v1574_v49 = vpop.xlane.xlu1 %1573 }
 0x8ed   : > { %8309 = vrcp.f32 %v1574_v49 }
 0x8ef   : > { %7953 = vrot.lane.b32.xlu1 %v10019_v19, %s9242_s3 }
 0x8f0   : > { %v1577_v50 = vpop.xlane.xlu0 %1576 }
 0x8f1   : > { %8311 = vrcp.f32 %v1577_v50 }
 0x8f3   : > { %2066 = vrot.lane.b32.xlu1 %v10030_v26, %s9242_s3 }
 0x8f4   : > { %v1580_v51 = vpop.xlane.xlu1 %1579  ;;  %1827 = vrot.lane.b32.xlu0 %v10033_v28, %s9241_s7 }
 0x8f5   : > { %8313 = vrcp.f32 %v1580_v51 }
 0x8f7   : > { %v8310_v52 = vpop.eup %8309  ;;  %2056 = vrot.lane.b32.xlu1 %v10041_v30, %s9242_s3 }
 0x8f8   : > { %v1584_v55 = vmul.f32 %v8310_v52, %v8298_v20  ;;  %2058 = vrot.lane.b32.xlu0 %v10049_v31, %s9242_s3 }
 0x8fa   : > { %7316 = vmatmul.mubr.msk.f32.vlgmr.msra.gmra.mrb[8].mxu0 %vm1552_vm5, %v1584_v55 }
 0x8fb   : > { %v8312_v56 = vpop.eup %8311  ;;  %2060 = vrot.lane.b32.xlu1 %v10027_v23, %s9242_s3  ;;  %7318 = vmatprep.mubr.msk.f32.mxu0 %vm9239_vm2, %v9240_v59 }
 0x8fc   : > { %7958 = vrot.lane.b32.xlu0 %v10019_v19, %s9243_s30  ;;  %v1585_v57 = vmul.f32 %v8312_v56, %v8300_v25  ;;  %v8039_v19 = vld [vmem:[#allocation17 + $0x10] sm:$0xff]  }
 0x8fd   : > { %7354 = vmatprep.subr.bf16.mxu1 %v8039_v19 }
 0x8fe   : > { %7319 = vmatmul.mubr.msk.f32.gmra.mrb[10].mxu0 %vm1552_vm5, %v1585_v57  ;;  %7355 = vmatpush3.bf16.msra.mxu1 %v8039_v19 }
 0x8ff   : > { %v8314_v60 = vpop.eup %8313  ;;  %2376 = vrot.lane.b32.xlu1 %v10030_v26, %s9243_s30  ;;  %7321 = vmatprep.mubr.msk.f32.mxu0 %vm9239_vm2, %v9240_v59 }
 0x900   : > { %2366 = vrot.lane.b32.xlu0 %v10041_v30, %s9243_s30  ;;  %v1586_v63 = vmul.f32 %v8314_v60, %v8302_v29  ;;  %7356 = vmatprep.subr.bf16.mxu1 %v8040_v14 }
 0x902   : > { %7322 = vmatmul.mubr.msk.f32.gmra.mrb[12].mxu0 %vm1552_vm5, %v1586_v63  ;;  %7357 = vmatpush3.bf16.msra.mxu1 %v8040_v14 }
 0x903   : > { %2368 = vrot.lane.b32.xlu1 %v10049_v31, %s9243_s30  ;;  %7345 = vmatprep.mubr.msk.f32.mxu0 %vm9239_vm2, %v9240_v59 }
 0x904   : > { %2370 = vrot.lane.b32.xlu0 %v10027_v23, %s9243_s30  ;;  %7632 = vmatprep.subr.bf16.mxu1 %v9238_v58 }
 0x963   : > { %v1808_v26 = vpop.xlane.xlu0 %1807 }
 0x964   : > { %8315 = vrcp.f32 %v1808_v26 }
 0x967   : > { %v1811_v1 = vpop.xlane.xlu1 %1810 }
 0x968   : > { %8317 = vrcp.f32 %v1811_v1 }
 0x96b   : > { %v7949_v30 = vpop.permute.xlu1 %7948  ;;  %v1814_v2 = vpop.xlane.xlu0 %1813 }
 0x96c   : > { %v7951_v4 = vunpack.i.h.bf16 %v7949_v30  ;;  %v7950_v5 = vunpack.i.l.bf16 %v7949_v30  ;;  %8319 = vrcp.f32 %v1814_v2 }
 0x96e   : > { %v7630_v6 = vpack.c.bf16 %v7951_v4, %v7950_v5  ;;  %v8316_v31 = vpop.eup %8315 }
 0x96f   : > { %v1818_v8 = vmul.f32 %v8316_v31, %v8304_v42  ;;  %v1828_v23 = vpop.permute.xlu0 %1827  ;;  %v7954_v34 = vpop.permute.xlu1 %7953 }
 0x970   : > { %7631 = vmatpush3.bf16.msra.mxu0 %v7630_v6  ;;  %v7956_v38 = vunpack.i.h.bf16 %v7954_v34  ;;  %v7955_v39 = vunpack.i.l.bf16 %v7954_v34 }
 0x971   : > { %7343 = vmatprep.subr.mxu0 %v9240_v59 }
 0x972   : > { %v8318_v10 = vpop.eup %8317 }
 0x973   : > { %v1819_v11 = vmul.f32 %v8318_v10, %v10086_v44  ;;  %v2059_v41 = vpop.permute.xlu0 %2058  ;;  %v7633_v44 = vpack.c.bf16 %v7956_v38, %v7955_v39  ;;  %v2067_v45 = vpop.permute.xlu1 %2066 }
 0x974   : > { %7344 = vmatpush3.msk.msra.mxu0 %vm1050_vm1, %v1828_v23 }
 0x975   : > { %7346 = vmatmul.mubr.msk.f32.vlgmr.msra.gmra.mrb[14].mxu0 %vm1552_vm5, %v1818_v8  ;;  %7362 = vmatprep.subr.bf16.mxu0 %v8037_v7 }
 0x976   : > { %7348 = vmatprep.mubr.msk.f32.mxu0 %vm9239_vm2, %v9240_v59  ;;  %7363 = vmatpush3.bf16.msra.mxu0 %v8037_v7  ;;  %v8320_v12 = vpop.eup %8319 }
 0x977   : > { %7364 = vmatprep.subr.bf16.mxu0 %v8038_v9  ;;  %v1820_v13 = vmul.f32 %v8320_v12, %v10090_v46  ;;  %v7959_v46 = vpop.permute.xlu0 %7958  ;;  %v2057_v50 = vpop.permute.xlu1 %2056 }
 0x978   : > { %v7961_v47 = vunpack.i.h.bf16 %v7959_v46  ;;  %v7960_v49 = vunpack.i.l.bf16 %v7959_v46 }
 0x979   : > { %7349 = vmatmul.mubr.msk.f32.gmra.mrb[16].mxu0 %vm1552_vm5, %v1819_v11 }
 0x97a   : > { %7351 = vmatprep.mubr.msk.f32.mxu0 %vm9239_vm2, %v9240_v59  ;;  %7365 = vmatpush3.bf16.msra.mxu0 %v8038_v9  ;;  %v7640_v51 = vpack.c.bf16 %v7961_v47, %v7960_v49 }
 0x97b   : > { %7636 = vmatprep.subr.bf16.mxu0 %v9238_v58  ;;  %v2061_v52 = vpop.permute.xlu1 %2060  ;;  %v2367_v56 = vpop.permute.xlu0 %2366 }
 0x97d   : > { %7352 = vmatmul.mubr.msk.f32.gmra.mrb[18].mxu0 %vm1552_vm5, %v1820_v13 }
 0x97f   : > { %v2377_v55 = vpop.permute.xlu1 %2376  ;;  %v2371_v60 = vpop.permute.xlu0 %2370 }
 0x983   : > { %v2369_v57 = vpop.permute.xlu1 %2368 }
 0x9cd   : > { %v1665_v15 = vpop.f32.mrb[8].mxu0 }
 0x9ce   : > { %v7317_v16 = vpop.f32.mrb[9].mxu0 }
 0x9d1   : > { %v1670_v18 = vpop.f32.mrb[10].mxu0 }
 0x9d2   : > { %v1679_v20 = vpack.c.bf16 %v1670_v18, %v1665_v15  ;;  %v7320_v22 = vpop.f32.mrb[11].mxu0 }
 0x9d4   : > { %7366 = vmatprep.mubr.msk.bf16.mxu0 %vm1450_vm3, %v1679_v20 }
 0x9d5   : > { %v1675_v25 = vpop.f32.mrb[12].mxu0 }
 0x9d6   : > { %v1680_v27 = vpack.c.bf16 %v1675_v25, %v1675_v25  ;;  %v7323_v29 = vpop.f32.mrb[13].mxu0 }
 0x9d8   : > { %7367 = vmatmul.mubr.msk.bf16.vlgmr.msra.gmra.mrb[20].mxu0 %vm1450_vm3, %v1680_v27 }
 0x9d9   : > { %7391 = vmatprep.mubr.msk.f32.mxu0 %vm9239_vm2, %v9240_v59 }
 0xa48   : > { %v1908_v32 = vpop.f32.mrb[14].mxu0 }
 0xa49   : > { %v7347_v33 = vpop.f32.mrb[15].mxu0 }
 0xa4c   : > { %v1913_v35 = vpop.f32.mrb[16].mxu0 }
 0xa4d   : > { %v1922_v36 = vpack.c.bf16 %v1913_v35, %v1908_v32  ;;  %v7350_v37 = vpop.f32.mrb[17].mxu0 }
 0xa4f   : > { %7358 = vmatprep.mubr.msk.bf16.mxu1 %vm1450_vm3, %v1922_v36 }
 0xa50   : > { %v1918_v40 = vpop.f32.mrb[18].mxu0 }
 0xa51   : > { %v1923_v42 = vpack.c.bf16 %v1918_v40, %v1918_v40  ;;  %v7353_v43 = vpop.f32.mrb[19].mxu0 }
 0xa53   : > { %7359 = vmatmul.mubr.msk.bf16.vlgmr.msra.gmra.mrb[20].mxu1 %vm1450_vm3, %v1923_v42 }
 0xa54   : > { %7635 = vmatpush3.bf16.xpose.msk.msra.mxu1 %vm10015_vm4, %v7633_v44  ;;  %7376 = vmatprep.mubr.msk.f32.mxu1 %vm9239_vm2, %v9240_v59 }
 0xa55   : > { %7374 = vmatprep.subr.mxu1 %v9240_v59 }
 0xa5c   : > { %7375 = vmatpush3.xpose.msk.msra.mxu1 %vm1450_vm3, %v2067_v45 }
 0xa5d   : > { %7639 = vmatprep.subr.bf16.mxu1 %v9238_v58 }
 0xa5f   : > { %7377 = vmatmul.mubr.msk.f32.vlgmr.msra.gmra.mrb[24].mxu1 %vm1450_vm3, %v2057_v50 }
 0xa60   : > { %7642 = vmatpush3.bf16.xpose.msk.msra.mxu1 %vm10015_vm4, %v7640_v51  ;;  %7379 = vmatprep.mubr.msk.f32.mxu1 %vm9239_vm2, %v9240_v59 }
 0xa61   : > { %7412 = vmatprep.subr.mxu1 %v9240_v59 }
 0xa63   : > { %7380 = vmatmul.mubr.msk.f32.gmra.mrb[26].mxu1 %vm1450_vm3, %v2059_v41 }
 0xa64   : > { %7382 = vmatprep.mubr.msk.f32.mxu1 %vm9239_vm2, %v9240_v59 }
 0xa67   : > { %7383 = vmatmul.mubr.msk.f32.gmra.mrb[28].mxu1 %vm1450_vm3, %v2061_v52 }
 0xa68   : > { %7413 = vmatpush3.xpose.msk.msra.mxu1 %vm1450_vm3, %v2377_v55  ;;  %7414 = vmatprep.mubr.msk.f32.mxu1 %vm9239_vm2, %v9240_v59 }
 0xa6b   : > { %7415 = vmatmul.mubr.msk.f32.vlgmr.msra.gmra.mrb[30].mxu1 %vm1450_vm3, %v2367_v56 }
 0xa6c   : > { %7417 = vmatprep.mubr.msk.f32.mxu1 %vm9239_vm2, %v9240_v59 }
 0xa6f   : > { %7418 = vmatmul.mubr.msk.f32.gmra.mrb[32].mxu1 %vm1450_vm3, %v2369_v57 }
 0xa70   : > { %7420 = vmatprep.mubr.msk.f32.mxu1 %vm9239_vm2, %v9240_v59 }
 0xa73   : > { %7421 = vmatmul.mubr.msk.f32.gmra.mrb[34].mxu1 %vm1450_vm3, %v2371_v60 }
 0xaab   : > { %v7368_v63 = vpop.f32.mrb[20].mxu0 }
 0xaac   : > { %v2042_v19 = vpop.f32.mrb[21].mxu0 }
 0xaad   : > { %v7369_v26 = vpop.f32.mrb[22].mxu0 }
 0xaae   : > { %v2045_v1 = vpop.f32.mrb[23].mxu0 }
 0xb26   : > { %v7360_v30 = vpop.f32.mrb[20].mxu1 }
 0xb27   : > { %v10173_v2 = vadd.f32 %v7368_v63, %v7360_v30  ;;  %v1976_v4 = vpop.f32.mrb[21].mxu1 }
 0xb28   : > { %v10175_v5 = vadd.f32 %v2042_v19, %v1976_v4  ;;  %v7361_v6 = vpop.f32.mrb[22].mxu1 }
 0xb29   : > { %v1979_v31 = vpop.f32.mrb[23].mxu1 }
 0xb2a   : > { %v10177_v7 = vadd.f32 %v2045_v1, %v1979_v31 }
 0xb32   : > { %v2146_v8 = vpop.f32.mrb[24].mxu1 }
 0xb33   : > { %v2160_v23 = vmul.f32 0.17677669, %v2146_v8  ;;  %v7378_v9 = vpop.f32.mrb[25].mxu1 }
 0xb35   : > { %v2163_v10 = vsel %vm1552_vm5, %v2160_v23, -inf }
 0xb36   : > { %2164 = vmax.xlane.f32.xlu1 %v2163_v10  ;;  %v2151_v11 = vpop.f32.mrb[26].mxu1 }
 0xb37   : > { %v2161_v12 = vmul.f32 0.17677669, %v2151_v11  ;;  %v7381_v13 = vpop.f32.mrb[27].mxu1 }
 0xb39   : > { %v2166_v14 = vsel %vm1552_vm5, %v2161_v12, -inf }
 0xb3a   : > { %2167 = vmax.xlane.f32.xlu0 %v2166_v14  ;;  %v2156_v15 = vpop.f32.mrb[28].mxu1 }
 0xb3b   : > { %v2162_v16 = vmul.f32 0.17677669, %v2156_v15  ;;  %v7384_v18 = vpop.f32.mrb[29].mxu1 }
 0xb3d   : > { %v2169_v20 = vsel %vm1559_vm6, %v2162_v16, -inf }
 0xb3e   : > { %2170 = vmax.xlane.f32.xlu0 %v2169_v20  ;;  %v2456_v22 = vpop.f32.mrb[30].mxu1 }
 0xb3f   : > { %v7416_v25 = vpop.f32.mrb[31].mxu1  ;;  %v2470_v50 = vmul.f32 0.17677669, %v2456_v22 }
 0xb41   : > { %v2473_v55 = vsel %vm1552_vm5, %v2470_v50, -inf }
 0xb42   : > { %v2461_v27 = vpop.f32.mrb[32].mxu1 }
 0xb43   : > { %v7419_v29 = vpop.f32.mrb[33].mxu1  ;;  %v2471_v51 = vmul.f32 0.17677669, %v2461_v27 }
 0xb45   : > { %v2476_v56 = vsel %vm1552_vm5, %v2471_v51, -inf }
 0xb46   : > { %v2466_v32 = vpop.f32.mrb[34].mxu1 }
 0xb47   : > { %v7422_v33 = vpop.f32.mrb[35].mxu1  ;;  %v2472_v52 = vmul.f32 0.17677669, %v2466_v32 }
 0xb49   : > { %v2479_v57 = vsel %vm1559_vm6, %v2472_v52, -inf }
 0xbc3   : > { %v2165_v34 = vpop.xlane.xlu1 %2164 }
 0xbc4   : > { %v2172_v35 = vsub.f32 %v2160_v23, %v2165_v34 }
 0xbc6   : > { %v2175_v36 = vmul.f32 1.442695, %v2172_v35 }
 0xbc7   : > { %v2168_v37 = vpop.xlane.xlu0 %2167 }
 0xbc8   : > { %8321 = vpow2.f32 %v2175_v36  ;;  %v2173_v38 = vsub.f32 %v2161_v12, %v2168_v37  ;;  %v8041_v36 = vld [vmem:[#allocation17 + $0x20] sm:$0xff]   ;;  %v8042_v37 = vld [vmem:[#allocation17 + $0x28] sm:$0xff]  }
 0xbca   : > { %v2177_v39 = vmul.f32 1.442695, %v2173_v38 }
 0xbcb   : > { %v2171_v40 = vpop.xlane.xlu0 %2170 }
 0xbcc   : > { %8323 = vpow2.f32 %v2177_v39  ;;  %v2174_v41 = vsub.f32 %v2162_v16, %v2171_v40 }
 0xbce   : > { %v2179_v42 = vmul.f32 1.442695, %v2174_v41 }
 0xbd0   : > { %8325 = vpow2.f32 %v2179_v42 }
 0xbd2   : > { %v8322_v43 = vpop.eup %8321 }
 0xbd3   : > { %v2181_v44 = vsel %vm1552_vm5, %v8322_v43, 0.0 }
 0xbd4   : > { %2182 = vadd.xlane.f32.xlu0 %v2181_v44 }
 0xbd6   : > { %v8324_v45 = vpop.eup %8323 }
 0xbd7   : > { %v2184_v46 = vsel %vm1552_vm5, %v8324_v45, 0.0 }
 0xbd8   : > { %2185 = vadd.xlane.f32.xlu1 %v2184_v46 }
 0xbda   : > { %v8326_v47 = vpop.eup %8325 }
 0xbdb   : > { %v2187_v49 = vsel %vm1559_vm6, %v8326_v47, 0.0 }
 0xbdc   : > { %2188 = vadd.xlane.f32.xlu0 %v2187_v49 }
 0xbe9   : > { %7963 = vrot.lane.b32.xlu1 %v10021_v21, %s9242_s3 }
 0xbf2   : > { %2200 = vrot.lane.b32.xlu0 %v10033_v28, %s9242_s3 }
 0xc0d   : > { %2474 = vmax.xlane.f32.xlu1 %v2473_v55 }
 0xc11   : > { %2477 = vmax.xlane.f32.xlu0 %v2476_v56  ;;  %2480 = vmax.xlane.f32.xlu1 %v2479_v57 }
 0xc61   : > { %v2183_v60 = vpop.xlane.xlu0 %2182 }
 0xc62   : > { %8327 = vrcp.f32 %v2183_v60 }
 0xc65   : > { %v2186_v63 = vpop.xlane.xlu1 %2185 }
 0xc66   : > { %8329 = vrcp.f32 %v2186_v63 }
 0xc69   : > { %v7964_v19 = vpop.permute.xlu1 %7963  ;;  %v2189_v26 = vpop.xlane.xlu0 %2188 }
 0xc6a   : > { %v7966_v1 = vunpack.i.h.bf16 %v7964_v19  ;;  %v7965_v30 = vunpack.i.l.bf16 %v7964_v19  ;;  %8331 = vrcp.f32 %v2189_v26  ;;  %v8043_v26 = vld [vmem:[#allocation17 + $0x30] sm:$0xff]  }
 0xc6b   : > { %7438 = vmatprep.subr.bf16.mxu1 %v8043_v26 }
 0xc6c   : > { %v7637_v4 = vpack.c.bf16 %v7966_v1, %v7965_v30  ;;  %v8328_v6 = vpop.eup %8327  ;;  %7439 = vmatpush3.bf16.msra.mxu1 %v8043_v26  ;;  %v8044_v1 = vld [vmem:[#allocation17 + $0x38] sm:$0xff]  }
 0xc6d   : > { %v2193_v31 = vmul.f32 %v8328_v6, %v8322_v43  ;;  %v2201_v8 = vpop.permute.xlu0 %2200  ;;  %7440 = vmatprep.subr.bf16.mxu1 %v8044_v1  ;;  %v8060_v26 = vld [vmem:[#allocation23 + $0x48] ss:$16 sps:$4 sm:$0xff]  }
 0xc6e   : > { %7638 = vmatpush3.bf16.msra.mxu0 %v7637_v4 }
 0xc6f   : > { %7389 = vmatprep.subr.mxu0 %v9240_v59 }
 0xc70   : > { %v8330_v23 = vpop.eup %8329  ;;  %7441 = vmatpush3.bf16.msra.mxu1 %v8044_v1  ;;  %v8065_v1 = vld [vmem:[#allocation23 + $0x64] ss:$16 sps:$4 sm:$0xff]  }
 0xc71   : > { %v2194_v9 = vmul.f32 %v8330_v23, %v8324_v45 }
 0xc72   : > { %7390 = vmatpush3.msk.msra.mxu0 %vm1050_vm1, %v2201_v8 }
 0xc73   : > { %7392 = vmatmul.mubr.msk.f32.vlgmr.msra.gmra.mrb[24].mxu0 %vm1552_vm5, %v2193_v31  ;;  %7400 = vmatprep.subr.bf16.mxu0 %v8041_v36 }
 0xc74   : > { %7394 = vmatprep.mubr.msk.f32.mxu0 %vm9239_vm2, %v9240_v59  ;;  %v8332_v10 = vpop.eup %8331  ;;  %7401 = vmatpush3.bf16.msra.mxu0 %v8041_v36 }
 0xc75   : > { %v2195_v11 = vmul.f32 %v8332_v10, %v8326_v47  ;;  %7402 = vmatprep.subr.bf16.mxu0 %v8042_v37 }
 0xc77   : > { %7395 = vmatmul.mubr.msk.f32.gmra.mrb[26].mxu0 %vm1552_vm5, %v2194_v9 }
 0xc78   : > { %7397 = vmatprep.mubr.msk.f32.mxu0 %vm9239_vm2, %v9240_v59  ;;  %7403 = vmatpush3.bf16.msra.mxu0 %v8042_v37 }
 0xc79   : > { %7643 = vmatprep.subr.bf16.mxu0 %v9238_v58 }
 0xc7b   : > { %7398 = vmatmul.mubr.msk.f32.gmra.mrb[28].mxu0 %vm1552_vm5, %v2195_v11 }
 0xc9a   : > { %v2475_v12 = vpop.xlane.xlu1 %2474 }
 0xc9b   : > { %v2482_v13 = vsub.f32 %v2470_v50, %v2475_v12 }
 0xc9d   : > { %v2485_v14 = vmul.f32 1.442695, %v2482_v13 }
 0xc9e   : > { %v2478_v15 = vpop.xlane.xlu0 %2477  ;;  %v2481_v16 = vpop.xlane.xlu1 %2480 }
 0xc9f   : > { %8333 = vpow2.f32 %v2485_v14  ;;  %v2483_v18 = vsub.f32 %v2471_v51, %v2478_v15  ;;  %v2484_v20 = vsub.f32 %v2472_v52, %v2481_v16 }
 0xca1   : > { %v2487_v22 = vmul.f32 1.442695, %v2483_v18  ;;  %v2489_v25 = vmul.f32 1.442695, %v2484_v20 }
 0xca3   : > { %8335 = vpow2.f32 %v2487_v22 }
 0xca4   : > { %8337 = vpow2.f32 %v2489_v25 }
 0xca9   : > { %v8334_v27 = vpop.eup %8333 }
 0xcaa   : > { %v2491_v29 = vsel %vm1552_vm5, %v8334_v27, 0.0 }
 0xcab   : > { %2492 = vadd.xlane.f32.xlu0 %v2491_v29 }
 0xcad   : > { %v8336_v32 = vpop.eup %8335 }
 0xcae   : > { %v8338_v33 = vpop.eup %8337  ;;  %v2494_v34 = vsel %vm1552_vm5, %v8336_v32, 0.0 }
 0xcaf   : > { %2495 = vadd.xlane.f32.xlu1 %v2494_v34  ;;  %v2497_v35 = vsel %vm1559_vm6, %v8338_v33, 0.0 }
 0xcb0   : > { %2498 = vadd.xlane.f32.xlu0 %v2497_v35 }
 0xcc0   : > { %7968 = vrot.lane.b32.xlu1 %v10021_v21, %s9243_s30 }
 0xcc6   : > { %2510 = vrot.lane.b32.xlu0 %v10033_v28, %s9243_s30 }
 0xd38   : > { %v2493_v40 = vpop.xlane.xlu0 %2492 }
 0xd39   : > { %8339 = vrcp.f32 %v2493_v40  ;;  %v8050_v40 = vld [vmem:[#allocation23 + $0xc] ss:$16 sps:$4 sm:$0xff]  }
 0xd3a   : > { %3011 = vmatprep.subr.bf16.mxu1 %v8050_v40 }
 0xd3c   : > { %v2496_v38 = vpop.xlane.xlu1 %2495 }
 0xd3d   : > { %8341 = vrcp.f32 %v2496_v38  ;;  %v2499_v47 = vpop.xlane.xlu0 %2498  ;;  %v8045_v38 = vld [vmem:[#allocation23] ss:$16 sps:$4 sm:$0xff]  }
 0xd3e   : > { %8343 = vrcp.f32 %v2499_v47 }
 0xd40   : > { %v7969_v42 = vpop.permute.xlu1 %7968 }
 0xd41   : > { %v7971_v45 = vunpack.i.h.bf16 %v7969_v42  ;;  %v7970_v46 = vunpack.i.l.bf16 %v7969_v42  ;;  %v2511_v55 = vpop.permute.xlu0 %2510  ;;  %v8051_v42 = vld [vmem:[#allocation23 + $0x20] ss:$16 sps:$4 sm:$0xff]  }
 0xd43   : > { %v7644_v51 = vpack.c.bf16 %v7971_v45, %v7970_v46  ;;  %v8340_v52 = vpop.eup %8339 }
 0xd44   : > { %v2503_v56 = vmul.f32 %v8340_v52, %v8334_v27  ;;  %v6700_v27 = vld [vmem:[#allocation19] ss:$0 sm:$0xff] }
 0xd46   : > { %v2281_v39 = vpop.f32.mrb[24].mxu0 }
 0xd47   : > { %v7393_v41 = vpop.f32.mrb[25].mxu0  ;;  %v8342_v57 = vpop.eup %8341 }
 0xd48   : > { %v2504_v60 = vmul.f32 %v8342_v57, %v8336_v32  ;;  %v8344_v63 = vpop.eup %8343  ;;  %v8053_v41 = vld [vmem:[#allocation23 + $0x24] ss:$16 sps:$4 sm:$0xff]  }
 0xd49   : > { %v2505_v19 = vmul.f32 %v8344_v63, %v8338_v33  ;;  %v8062_v63 = vld [vmem:[#allocation23 + $0x4c] ss:$16 sps:$4 sm:$0xff]  }
 0xd4a   : > { %v2286_v43 = vpop.f32.mrb[26].mxu0 }
 0xd4b   : > { %v2295_v44 = vpack.c.bf16 %v2286_v43, %v2281_v39  ;;  %v7396_v21 = vpop.f32.mrb[27].mxu0  ;;  %v8047_v39 = vld [vmem:[#allocation23 + $0x4] ss:$16 sps:$4 sm:$0xff]   ;;  %v8054_v43 = vld [vmem:[#allocation23 + $0x28] ss:$16 sps:$4 sm:$0xff]  }
 0xd4d   : > { %7404 = vmatprep.mubr.msk.bf16.mxu0 %vm1450_vm3, %v2295_v44 }
 0xd4e   : > { %v2291_v28 = vpop.f32.mrb[28].mxu0 }
 0xd4f   : > { %v2296_v49 = vpack.c.bf16 %v2291_v28, %v2291_v28  ;;  %v7399_v50 = vpop.f32.mrb[29].mxu0 }
 0xd51   : > { %7405 = vmatmul.mubr.msk.bf16.vlgmr.msra.gmra.mrb[32].mxu0 %vm1450_vm3, %v2296_v49 }
 0xd52   : > { %7645 = vmatpush3.bf16.msra.mxu0 %v7644_v51  ;;  %7429 = vmatprep.mubr.msk.f32.mxu0 %vm9239_vm2, %v9240_v59 }
 0xd53   : > { %7427 = vmatprep.subr.mxu0 %v9240_v59 }
 0xd56   : > { %7428 = vmatpush3.msk.msra.mxu0 %vm1050_vm1, %v2511_v55 }
 0xd57   : > { %2960 = vmatprep.subr.bf16.mxu0 %v8047_v39 }
 0xd59   : > { %7430 = vmatmul.mubr.msk.f32.vlgmr.msra.gmra.mrb[30].mxu0 %vm1552_vm5, %v2503_v56 }
 0xd5a   : > { %7432 = vmatprep.mubr.msk.f32.mxu0 %vm9239_vm2, %v9240_v59  ;;  %2961 = vmatpush1.bf16.msra.mxu0 %v8045_v38 }
 0xd5b   : > { %2962 = vmatprep.subr.bf16.mxu0 %v8053_v41 }
 0xd5d   : > { %7433 = vmatmul.mubr.msk.f32.gmra.mrb[36].mxu0 %vm1552_vm5, %v2504_v60  ;;  %v8059_v60 = vld [vmem:[#allocation23 + $0x44] ss:$16 sps:$4 sm:$0xff]  }
 0xd5e   : > { %7435 = vmatprep.mubr.msk.f32.mxu0 %vm9239_vm2, %v9240_v59  ;;  %2963 = vmatpush1.bf16.msra.mxu0 %v8051_v42 }
 0xd5f   : > { %2964 = vmatprep.subr.bf16.mxu0 %v8059_v60  ;;  %v8096_v60 = vld [vmem:[#allocation26 + $0x80] sm:$0xff]  }
 0xd61   : > { %7436 = vmatmul.mubr.msk.f32.gmra.mrb[38].mxu0 %vm1552_vm5, %v2505_v19  ;;  %v8057_v19 = vld [vmem:[#allocation23 + $0x40] ss:$16 sps:$4 sm:$0xff]  }
 0xd62   : > { %2992 = vmatprep.mubr.bf16.mxu0 %v9237_v24  ;;  %2965 = vmatpush1.bf16.msra.mxu0 %v8057_v19  ;;  %v8099_v19 = vld [vmem:[#allocation26 + $0x8] sm:$0xff]  }
 0xd63   : > { %2966 = vmatprep.subr.bf16.mxu0 %v8065_v1  ;;  %v8101_v1 = vld [vmem:[#allocation26 + $0x50] sm:$0xff]  }
 0xe24   : > { %v7406_v30 = vpop.f32.mrb[32].mxu0 }
 0xe25   : > { %v2365_v4 = vadd.f32 %v7406_v30, %v10173_v2  ;;  %v2349_v6 = vpop.f32.mrb[33].mxu0  ;;  %v8068_v30 = vld [vmem:[#allocation23 + $0x6c] ss:$16 sps:$4 sm:$0xff]  }
 0xe26   : > { %v2363_v31 = vadd.f32 %v2349_v6, %v10175_v5  ;;  %v7407_v8 = vpop.f32.mrb[34].mxu0  ;;  %v8066_v6 = vld [vmem:[#allocation23 + $0x68] ss:$16 sps:$4 sm:$0xff]  }
 0xe27   : > { %v2352_v23 = vpop.f32.mrb[35].mxu0  ;;  %v8074_v8 = vld [vmem:[#allocation23 + $0x8c] ss:$16 sps:$4 sm:$0xff]  }
 0xe28   : > { %v2364_v9 = vadd.f32 %v2352_v23, %v10177_v7  ;;  %v8069_v23 = vld [vmem:[#allocation23 + $0x80] ss:$16 sps:$4 sm:$0xff]  }
 0xe2c   : > { %v2591_v10 = vpop.f32.mrb[30].mxu0 }
 0xe2d   : > { %v7431_v11 = vpop.f32.mrb[31].mxu0 }
 0xe2e   : > { %v8080_v11 = vld [vmem:[#allocation23 + $0xac] ss:$16 sps:$4 sm:$0xff]  }
 0xe30   : > { %v2596_v12 = vpop.f32.mrb[36].mxu0 }
 0xe31   : > { %v2605_v13 = vpack.c.bf16 %v2596_v12, %v2591_v10  ;;  %v7434_v14 = vpop.f32.mrb[37].mxu0  ;;  %v8077_v10 = vld [vmem:[#allocation23 + $0xa4] ss:$16 sps:$4 sm:$0xff]   ;;  %v8075_v12 = vld [vmem:[#allocation23 + $0xa0] ss:$16 sps:$4 sm:$0xff]  }
 0xe32   : > { %v8083_v14 = vld [vmem:[#allocation23 + $0xc4] ss:$16 sps:$4 sm:$0xff]  }
 0xe33   : > { %7442 = vmatprep.mubr.msk.bf16.mxu1 %vm1450_vm3, %v2605_v13  ;;  %v8078_v13 = vld [vmem:[#allocation23 + $0xa8] ss:$16 sps:$4 sm:$0xff]  }
 0xe34   : > { %v2601_v15 = vpop.f32.mrb[38].mxu0 }
 0xe35   : > { %v2606_v16 = vpack.c.bf16 %v2601_v15, %v2601_v15  ;;  %v7437_v18 = vpop.f32.mrb[39].mxu0  ;;  %v8086_v15 = vld [vmem:[#allocation23 + $0xcc] ss:$16 sps:$4 sm:$0xff]  }
 0xe36   : > { %v8084_v18 = vld [vmem:[#allocation23 + $0xc8] ss:$16 sps:$4 sm:$0xff]  }
 0xe37   : > { %7443 = vmatmul.mubr.msk.bf16.vlgmr.msra.gmra.mrb[36].mxu1 %vm1450_vm3, %v2606_v16  ;;  %v8081_v16 = vld [vmem:[#allocation23 + $0xc0] ss:$16 sps:$4 sm:$0xff]  }
 0xe38   : > { %3043 = vmatprep.mubr.bf16.mxu1 %v9237_v24 }
 0xf0a   : > { %v7444_v2 = vpop.f32.mrb[36].mxu1 }
 0xf0b   : > { %v2675_v5 = vadd.f32 %v7444_v2, %v2365_v4  ;;  %v2659_v20 = vpop.f32.mrb[37].mxu1  ;;  %v8063_v4 = vld [vmem:[#allocation23 + $0x60] ss:$16 sps:$4 sm:$0xff]  }
 0xf0c   : > { %v2673_v22 = vadd.f32 %v2659_v20, %v2363_v31  ;;  %v7445_v25 = vpop.f32.mrb[38].mxu1  ;;  %2967 = vmatpush1.bf16.msra.mxu0 %v8063_v4  ;;  %v8071_v31 = vld [vmem:[#allocation23 + $0x84] ss:$16 sps:$4 sm:$0xff]   ;;  %v8087_v2 = vld [vmem:[#allocation23 + $0xe0] ss:$16 sps:$4 sm:$0xff]   ;;  %v8103_v4 = vld [vmem:[#allocation26 + $0x10] sm:$0xff]  }
 0xf0d   : > { %v2678_v7 = vadd.f32 %v2675_v5, %v9965_v53  ;;  %v2662_v29 = vpop.f32.mrb[39].mxu1  ;;  %2968 = vmatprep.subr.bf16.mxu0 %v8071_v31  ;;  %v8089_v5 = vld [vmem:[#allocation23 + $0xe4] ss:$16 sps:$4 sm:$0xff]   ;;  %v8090_v20 = vld [vmem:[#allocation23 + $0xe8] ss:$16 sps:$4 sm:$0xff]  }
 0xf0e   : > { %v2676_v32 = vadd.f32 %v2673_v22, %v9962_v48  ;;  %v2674_v33 = vadd.f32 %v2662_v29, %v2364_v9  ;;  %v8048_v48 = vld [vmem:[#allocation23 + $0x8] ss:$16 sps:$4 sm:$0xff]   ;;  %v8092_v22 = vld [vmem:[#allocation23 + $0xec] ss:$16 sps:$4 sm:$0xff]   ;;  %v8105_v31 = vld [vmem:[#allocation26 + $0x58] sm:$0xff]  }
 0xf0f   : > { %v10234_v36 = vadd.f32 %v6700_v27, %v2678_v7  ;;  %3012 = vmatpush1.bf16.msra.mxu1 %v8048_v48  ;;  %v8072_v9 = vld [vmem:[#allocation23 + $0x88] ss:$16 sps:$4 sm:$0xff]   ;;  %v6701_v48 = vld [vmem:[#allocation20] ss:$0 sm:$0xff] }
 0xf10   : > { %v2677_v34 = vadd.f32 %v2674_v33, %v9967_v54  ;;  %v10232_v35 = vadd.f32 %v6700_v27, %v2676_v32  ;;  %v8056_v54 = vld [vmem:[#allocation23 + $0x2c] ss:$16 sps:$4 sm:$0xff]   ;;  %2969 = vmatpush1.bf16.msra.mxu0 %v8069_v23  ;;  %v8107_v23 = vld [vmem:[#allocation26 + $0x18] sm:$0xff]  }
 0xf11   : > { %v2695_v53 = vsel %vm1050_vm1, %v10234_v36, 0.0  ;;  %3013 = vmatprep.subr.bf16.mxu1 %v8056_v54  ;;  %2970 = vmatprep.subr.bf16.mxu0 %v8077_v10  ;;  %v8109_v10 = vld [vmem:[#allocation26 + $0x60] sm:$0xff]  }
 0xf12   : > { %2691 = vadd.xlane.f32.xlu1 %v10232_v35  ;;  %v10237_v37 = vadd.f32 %v6700_v27, %v2677_v34 }
 0xf13   : > { %3014 = vmatpush1.bf16.msra.mxu1 %v8054_v43  ;;  %v6702_v43 = vld [vmem:[#allocation22] ss:$0 sm:$0xff] }
 0xf14   : > { %2693 = vadd.xlane.f32.xlu0 %v10237_v37  ;;  %3015 = vmatprep.subr.bf16.mxu1 %v8062_v63  ;;  %v8098_v63 = vld [vmem:[#allocation26 + $0xc8] sm:$0xff]  }
 0xf15   : > { %2971 = vmatpush1.bf16.msra.mxu0 %v8075_v12  ;;  %v8111_v12 = vld [vmem:[#allocation26 + $0x20] sm:$0xff]  }
 0xf16   : > { %2696 = vadd.xlane.f32.xlu1 %v2695_v53  ;;  %2972 = vmatprep.subr.bf16.mxu0 %v8083_v14  ;;  %v8113_v14 = vld [vmem:[#allocation26 + $0x68] sm:$0xff]  }
 0xf17   : > { %3016 = vmatpush1.bf16.msra.mxu1 %v8060_v26  ;;  %v8100_v26 = vld [vmem:[#allocation26 + $0x88] sm:$0xff]  }
 0xf18   : > { %3017 = vmatprep.subr.bf16.mxu1 %v8068_v30  ;;  %v8102_v30 = vld [vmem:[#allocation26 + $0xd0] sm:$0xff]  }
 0xf19   : > { %2973 = vmatpush1.bf16.msra.mxu0 %v8081_v16  ;;  %v8115_v16 = vld [vmem:[#allocation26 + $0x28] sm:$0xff]  }
 0xf1a   : > { %2974 = vmatprep.subr.bf16.mxu0 %v8089_v5  ;;  %v8118_v5 = vld [vmem:[#allocation26 + $0xf0] sm:$0xff]  }
 0xf1b   : > { %3018 = vmatpush1.bf16.msra.mxu1 %v8066_v6  ;;  %v8104_v6 = vld [vmem:[#allocation26 + $0x90] sm:$0xff]  }
 0xf1c   : > { %3019 = vmatprep.subr.bf16.mxu1 %v8074_v8  ;;  %v8106_v8 = vld [vmem:[#allocation26 + $0xd8] sm:$0xff]  }
 0xf1d   : > { %2975 = vmatpush1.bf16.msra.mxu0 %v8087_v2  ;;  %v8117_v2 = vld [vmem:[#allocation26 + $0x70] sm:$0xff]  }
 0xf1f   : > { %3020 = vmatpush1.bf16.msra.mxu1 %v8072_v9  ;;  %v8108_v9 = vld [vmem:[#allocation26 + $0x98] sm:$0xff]  }
 0xf20   : > { %3021 = vmatprep.subr.bf16.mxu1 %v8080_v11  ;;  %v8110_v11 = vld [vmem:[#allocation26 + $0xe0] sm:$0xff]  }
 0xf23   : > { %3022 = vmatpush1.bf16.msra.mxu1 %v8078_v13  ;;  %v8112_v13 = vld [vmem:[#allocation26 + $0xa0] sm:$0xff]  }
 0xf24   : > { %3023 = vmatprep.subr.bf16.mxu1 %v8086_v15  ;;  %v8114_v15 = vld [vmem:[#allocation26 + $0xe8] sm:$0xff]  }
 0xf27   : > { %3024 = vmatpush1.bf16.msra.mxu1 %v8084_v18  ;;  %v8116_v18 = vld [vmem:[#allocation26 + $0xa8] sm:$0xff]  }
 0xf28   : > { %3025 = vmatprep.subr.bf16.mxu1 %v8092_v22  ;;  %v8120_v22 = vld [vmem:[#allocation26 + $0xb0] sm:$0xff]  }
 0xf2b   : > { %3026 = vmatpush1.bf16.msra.mxu1 %v8090_v20  ;;  %v8119_v20 = vld [vmem:[#allocation26 + $0x30] sm:$0xff]  }
 0xf9f   : > { %v2692_v44 = vpop.xlane.xlu1 %2691 }
 0xfa0   : > { %v2698_v21 = vmul.f32 0.0078125, %v2692_v44 }
 0xfa1   : > { %v2694_v45 = vpop.xlane.xlu0 %2693 }
 0xfa2   : > { %v10243_v46 = vsub.f32 %v10232_v35, %v2698_v21  ;;  %v2699_v28 = vmul.f32 0.0078125, %v2694_v45 }
 0xfa3   : > { %v2697_v47 = vpop.xlane.xlu1 %2696 }
 0xfa4   : > { %v10246_v49 = vsub.f32 %v10237_v37, %v2699_v28  ;;  %v2700_v50 = vmul.f32 0.0078125, %v2697_v47  ;;  %v2704_v51 = vmul.f32 %v10243_v46, %v10243_v46 }
 0xfa6   : > { %v10251_v52 = vsub.f32 %v10234_v36, %v2700_v50  ;;  %2707 = vadd.xlane.f32.xlu0 %v2704_v51  ;;  %v2705_v55 = vmul.f32 %v10246_v49, %v10246_v49 }
 0xfa8   : > { %2709 = vadd.xlane.f32.xlu1 %v2705_v55  ;;  %v2706_v56 = vmul.f32 %v10251_v52, %v10251_v52 }
 0xfaa   : > { %v2711_v57 = vsel %vm1050_vm1, %v2706_v56, 0.0  ;;  %v8094_v56 = vld [vmem:[#allocation26 + $0xc0] sm:$0xff]  }
 0xfab   : > { %2712 = vadd.xlane.f32.xlu0 %v2711_v57  ;;  %v8095_v57 = vld [vmem:[#allocation26] sm:$0xff]   ;;  %7084 = vmatprep.subr.bf16.mxu1 %v8094_v56 }
0x1033   : > { %v2708_v25 = vpop.xlane.xlu0 %2707 }
0x1034   : > { %v2714_v7 = vmul.f32 0.0078125, %v2708_v25  ;;  %v8121_v25 = vld [vmem:[#allocation26 + $0x78] sm:$0xff]  }
0x1035   : > { %v2710_v27 = vpop.xlane.xlu1 %2709 }
0x1036   : > { %v2717_v29 = vadd.f32 1e-05, %v2714_v7  ;;  %v2715_v32 = vmul.f32 0.0078125, %v2710_v27  ;;  %v8122_v7 = vld [vmem:[#allocation26 + $0xf8] sm:$0xff]  }
0x1037   : > { %v8123_v27 = vld [vmem:[#allocation26 + $0x38] sm:$0xff]  }
0x1038   : > { %8345 = vrsqrt.f32 %v2717_v29  ;;  %v2718_v33 = vadd.f32 1e-05, %v2715_v32  ;;  %v2713_v34 = vpop.xlane.xlu0 %2712  ;;  %v8124_v29 = vld [vmem:[#allocation26 + $0xb8] sm:$0xff]  }
0x1039   : > { %v2716_v53 = vmul.f32 0.0078125, %v2713_v34  ;;  %v2778_v32 = vld [vmem:[#allocation25] sm:$0xf] }
0x103a   : > { %8347 = vrsqrt.f32 %v2718_v33  ;;  %v2794_v33 = vsub.s32 3, %v9999_v61  ;;  %v2783_v34 = vrot.slane %v2778_v32, %v10009_v3 }
0x103b   : > { %v2719_v38 = vadd.f32 1e-05, %v2716_v53  ;;  %v2791_v53 = vrot.slane %v2778_v32, %v10005_v0 }
0x103d   : > { %8349 = vrsqrt.f32 %v2719_v38  ;;  %v2787_v38 = vrot.slane %v2778_v32, %v10002_v62 }
0x1042   : > { %v8346_v39 = vpop.eup %8345 }
0x1043   : > { %v2723_v40 = vmul.f32 %v8346_v39, %v10243_v46  ;;  %v2795_v39 = vrot.slane %v2778_v32, %v2794_v33 }
0x1044   : > { %v8348_v41 = vpop.eup %8347 }
0x1045   : > { %v2732_v54 = vmul.f32 %v6701_v48, %v2723_v40  ;;  %v2724_v42 = vmul.f32 %v8348_v41, %v10246_v49  ;;  %v8093_v49 = vld [vmem:[#allocation26 + $0x40] sm:$0xff]  }
0x1046   : > { %7056 = vmatprep.subr.bf16.mxu0 %v8093_v49 }
0x1047   : > { %v8350_v44 = vpop.eup %8349  ;;  %v2733_v21 = vmul.f32 %v6701_v48, %v2724_v42  ;;  %v2741_v28 = vadd.f32 %v6702_v43, %v2732_v54 }
0x1048   : > { %v2725_v45 = vmul.f32 %v8350_v44, %v10251_v52  ;;  %v8097_v52 = vld [vmem:[#allocation26 + $0x48] sm:$0xff]  }
0x1049   : > { %v2742_v47 = vadd.f32 %v6702_v43, %v2733_v21 }
0x104a   : > { %v2734_v51 = vmul.f32 %v6701_v48, %v2725_v45 }
0x104b   : > { %v2744_v50 = vpack.c.bf16 %v2742_v47, %v2741_v28 }
0x104c   : > { %v2743_v46 = vadd.f32 %v6702_v43, %v2734_v51 }
0x104d   : > { %2993 = vmatmul.mubr.bf16.vlgmr.msra.gmra.mrb[40].mxu0 %v2744_v50  ;;  %3044 = vmatmul.mubr.bf16.vlgmr.msra.gmra.mrb[40].mxu1 %v2744_v50 }
0x104e   : > { %3002 = vmatprep.mubr.bf16.mxu0 %v9237_v24  ;;  %3053 = vmatprep.mubr.bf16.mxu1 %v9237_v24  ;;  %v2745_v55 = vpack.c.bf16 %v2743_v46, %v2743_v46 }
0x104f   : > { %7057 = vmatpush3.bf16.msra.mxu0 %v8095_v57  ;;  %7085 = vmatpush3.bf16.msra.mxu1 %v8096_v60 }
0x1050   : > { %7058 = vmatprep.subr.bf16.mxu0 %v8097_v52  ;;  %7086 = vmatprep.subr.bf16.mxu1 %v8098_v63 }
0x1053   : > { %7059 = vmatpush3.bf16.msra.mxu0 %v8099_v19  ;;  %7087 = vmatpush3.bf16.msra.mxu1 %v8100_v26 }
0x1054   : > { %7060 = vmatprep.subr.bf16.mxu0 %v8101_v1  ;;  %7088 = vmatprep.subr.bf16.mxu1 %v8102_v30 }
0x1055   : > { %3003 = vmatmul.mubr.bf16.gmra.mrb[44].mxu0 %v2745_v55  ;;  %3054 = vmatmul.mubr.bf16.gmra.mrb[44].mxu1 %v2745_v55 }
0x1057   : > { %7061 = vmatpush3.bf16.msra.mxu0 %v8103_v4  ;;  %7089 = vmatpush3.bf16.msra.mxu1 %v8104_v6 }
0x1058   : > { %7062 = vmatprep.subr.bf16.mxu0 %v8105_v31  ;;  %7090 = vmatprep.subr.bf16.mxu1 %v8106_v8 }
0x105b   : > { %7063 = vmatpush3.bf16.msra.mxu0 %v8107_v23  ;;  %7091 = vmatpush3.bf16.msra.mxu1 %v8108_v9 }
0x105c   : > { %7064 = vmatprep.subr.bf16.mxu0 %v8109_v10  ;;  %7092 = vmatprep.subr.bf16.mxu1 %v8110_v11 }
0x105f   : > { %7065 = vmatpush3.bf16.msra.mxu0 %v8111_v12  ;;  %7093 = vmatpush3.bf16.msra.mxu1 %v8112_v13 }
0x1060   : > { %7066 = vmatprep.subr.bf16.mxu0 %v8113_v14  ;;  %7094 = vmatprep.subr.bf16.mxu1 %v8114_v15 }
0x1063   : > { %7067 = vmatpush3.bf16.msra.mxu0 %v8115_v16  ;;  %7095 = vmatpush3.bf16.msra.mxu1 %v8116_v18 }
0x1064   : > { %7068 = vmatprep.subr.bf16.mxu0 %v8117_v2  ;;  %7096 = vmatprep.subr.bf16.mxu1 %v8118_v5 }
0x1067   : > { %7069 = vmatpush3.bf16.msra.mxu0 %v8119_v20  ;;  %7097 = vmatpush3.bf16.msra.mxu1 %v8120_v22 }
0x1068   : > { %7070 = vmatprep.subr.bf16.mxu0 %v8121_v25  ;;  %7098 = vmatprep.subr.bf16.mxu1 %v8122_v7 }
0x106b   : > { %7071 = vmatpush3.bf16.msra.mxu0 %v8123_v27  ;;  %7099 = vmatpush3.bf16.msra.mxu1 %v8124_v29 }
0x1120   : > { %v2994_v48 = vpop.f32.mrb[40].mxu0  ;;  %v3045_v40 = vpop.f32.mrb[40].mxu1 }
0x1121   : > { %v10269_v41 = vadd.f32 %v2994_v48, %v2783_v34  ;;  %v10271_v54 = vadd.f32 %v3045_v40, %v2791_v53  ;;  %v2996_v42 = vpop.f32.mrb[41].mxu0  ;;  %v3047_v43 = vpop.f32.mrb[41].mxu1 }
0x1122   : > { %v10273_v44 = vadd.f32 %v2996_v42, %v2787_v38  ;;  %v10275_v21 = vadd.f32 %v3047_v43, %v2795_v39  ;;  %v2998_v45 = vpop.f32.mrb[42].mxu0  ;;  %v3049_v28 = vpop.f32.mrb[42].mxu1 }
0x1123   : > { %v6735_v47 = vmul.f32 -1.702, %v10269_v41  ;;  %v6737_v50 = vmul.f32 -1.702, %v10271_v54  ;;  %v10279_v51 = vadd.f32 %v2998_v45, %v2783_v34  ;;  %v10281_v46 = vadd.f32 %v3049_v28, %v2791_v53  ;;  %v3000_v55 = vpop.f32.mrb[43].mxu0  ;;  %v3051_v49 = vpop.f32.mrb[43].mxu1 }
0x1124   : > { %v6736_v56 = vmul.f32 -1.702, %v10273_v44  ;;  %v6738_v57 = vmul.f32 -1.702, %v10275_v21  ;;  %v10285_v60 = vadd.f32 %v3000_v55, %v2787_v38  ;;  %v10287_v52 = vadd.f32 %v3051_v49, %v2795_v39 }
0x1125   : > { %v3086_v63 = vmul.f32 1.442695, %v6735_v47  ;;  %v3090_v19 = vmul.f32 1.442695, %v6737_v50  ;;  %v6739_v26 = vmul.f32 -1.702, %v10279_v51 }
0x1126   : > { %v3088_v1 = vmul.f32 1.442695, %v6736_v56  ;;  %v3092_v30 = vmul.f32 1.442695, %v6738_v57  ;;  %v6741_v4 = vmul.f32 -1.702, %v10281_v46 }
0x1127   : > { %8351 = vpow2.f32 %v3086_v63  ;;  %v3094_v6 = vmul.f32 1.442695, %v6739_v26  ;;  %v6740_v31 = vmul.f32 -1.702, %v10285_v60  ;;  %v6742_v8 = vmul.f32 -1.702, %v10287_v52 }
0x1128   : > { %8353 = vpow2.f32 %v3090_v19  ;;  %v3098_v23 = vmul.f32 1.442695, %v6741_v4  ;;  %v3004_v9 = vpop.f32.mrb[44].mxu0  ;;  %v3055_v10 = vpop.f32.mrb[44].mxu1 }
0x1129   : > { %8355 = vpow2.f32 %v3088_v1  ;;  %v3096_v11 = vmul.f32 1.442695, %v6740_v31  ;;  %v3100_v12 = vmul.f32 1.442695, %v6742_v8  ;;  %v10293_v13 = vadd.f32 %v3004_v9, %v2783_v34  ;;  %v3006_v14 = vpop.f32.mrb[45].mxu0  ;;  %v3057_v15 = vpop.f32.mrb[45].mxu1 }
0x112a   : > { %8357 = vpow2.f32 %v3092_v30  ;;  %v10295_v16 = vadd.f32 %v3055_v10, %v2791_v53  ;;  %v10297_v18 = vadd.f32 %v3006_v14, %v2787_v38  ;;  %v10299_v2 = vadd.f32 %v3057_v15, %v2795_v39  ;;  %v3008_v5 = vpop.f32.mrb[46].mxu0  ;;  %v3059_v20 = vpop.f32.mrb[46].mxu1 }
0x112b   : > { %8359 = vpow2.f32 %v3094_v6  ;;  %v6743_v22 = vmul.f32 -1.702, %v10293_v13  ;;  %v3009_v25 = vpop.f32.mrb[47].mxu0  ;;  %v3060_v7 = vpop.f32.mrb[47].mxu1 }
0x112c   : > { %8361 = vpow2.f32 %v3098_v23  ;;  %v6745_v27 = vmul.f32 -1.702, %v10295_v16  ;;  %v6744_v29 = vmul.f32 -1.702, %v10297_v18  ;;  %v6746_v32 = vmul.f32 -1.702, %v10299_v2 }
0x112d   : > { %8363 = vpow2.f32 %v3096_v11  ;;  %v3102_v34 = vmul.f32 1.442695, %v6743_v22 }
0x112e   : > { %8365 = vpow2.f32 %v3100_v12  ;;  %v3106_v53 = vmul.f32 1.442695, %v6745_v27  ;;  %v3104_v38 = vmul.f32 1.442695, %v6744_v29  ;;  %v3108_v39 = vmul.f32 1.442695, %v6746_v32 }
0x112f   : > { %8367 = vpow2.f32 %v3102_v34 }
0x1130   : > { %8369 = vpow2.f32 %v3106_v53 }
0x1131   : > { %v8352_v48 = vpop.eup %8351  ;;  %8371 = vpow2.f32 %v3104_v38 }
0x1132   : > { %v8354_v40 = vpop.eup %8353  ;;  %v3110_v42 = vadd.f32 1.0, %v8352_v48  ;;  %8373 = vpow2.f32 %v3108_v39 }
0x1133   : > { %v8356_v43 = vpop.eup %8355  ;;  %v3112_v45 = vadd.f32 1.0, %v8354_v40 }
0x1134   : > { %v8358_v28 = vpop.eup %8357  ;;  %8375 = vrcp.f32 %v3110_v42  ;;  %v3111_v47 = vadd.f32 1.0, %v8356_v43 }
0x1135   : > { %v8360_v50 = vpop.eup %8359  ;;  %8377 = vrcp.f32 %v3112_v45  ;;  %v3113_v55 = vadd.f32 1.0, %v8358_v28 }
0x1136   : > { %v8362_v49 = vpop.eup %8361  ;;  %8379 = vrcp.f32 %v3111_v47  ;;  %v3114_v56 = vadd.f32 1.0, %v8360_v50 }
0x1137   : > { %v8364_v57 = vpop.eup %8363  ;;  %8381 = vrcp.f32 %v3113_v55  ;;  %v3116_v63 = vadd.f32 1.0, %v8362_v49 }
0x1138   : > { %v8366_v19 = vpop.eup %8365  ;;  %8383 = vrcp.f32 %v3114_v56  ;;  %v3115_v26 = vadd.f32 1.0, %v8364_v57 }
0x1139   : > { %v8368_v1 = vpop.eup %8367  ;;  %8385 = vrcp.f32 %v3116_v63  ;;  %v3117_v30 = vadd.f32 1.0, %v8366_v19 }
0x113a   : > { %v8370_v4 = vpop.eup %8369  ;;  %8387 = vrcp.f32 %v3115_v26  ;;  %v3118_v6 = vadd.f32 1.0, %v8368_v1 }
0x113b   : > { %v8372_v31 = vpop.eup %8371  ;;  %8389 = vrcp.f32 %v3117_v30  ;;  %v3120_v23 = vadd.f32 1.0, %v8370_v4 }
0x113c   : > { %v8374_v8 = vpop.eup %8373  ;;  %v3119_v9 = vadd.f32 1.0, %v8372_v31  ;;  %8391 = vrcp.f32 %v3118_v6 }
0x113d   : > { %v3121_v10 = vadd.f32 1.0, %v8374_v8 }
0x113e   : > { %v8376_v11 = vpop.eup %8375  ;;  %8393 = vrcp.f32 %v3119_v9 }
0x113f   : > { %v8378_v12 = vpop.eup %8377  ;;  %8395 = vrcp.f32 %v3121_v10  ;;  %v3146_v22 = vmul.f32 %v8376_v11, %v10269_v41 }
0x1140   : > { %v8380_v14 = vpop.eup %8379  ;;  %8397 = vrcp.f32 %v3120_v23  ;;  %v3148_v27 = vmul.f32 %v8378_v12, %v10271_v54 }
0x1141   : > { %v8382_v15 = vpop.eup %8381  ;;  %v3147_v34 = vmul.f32 %v8380_v14, %v10273_v44 }
0x1142   : > { %v8384_v5 = vpop.eup %8383  ;;  %v3149_v39 = vmul.f32 %v8382_v15, %v10275_v21 }
0x1143   : > { %v8386_v20 = vpop.eup %8385  ;;  %v3150_v25 = vmul.f32 %v8384_v5, %v10279_v51 }
0x1144   : > { %v8388_v7 = vpop.eup %8387  ;;  %v3152_v29 = vmul.f32 %v8386_v20, %v10281_v46 }
0x1145   : > { %v8390_v32 = vpop.eup %8389  ;;  %v3158_v53 = vpack.c.bf16 %v3150_v25, %v3146_v22  ;;  %v3151_v38 = vmul.f32 %v8388_v7, %v10285_v60 }
0x1146   : > { %v3160_v48 = vpack.c.bf16 %v3152_v29, %v3148_v27  ;;  %v3153_v40 = vmul.f32 %v8390_v32, %v10287_v52  ;;  %v8392_v42 = vpop.eup %8391 }
0x1147   : > { %v3159_v41 = vpack.c.bf16 %v3151_v38, %v3147_v34  ;;  %v3154_v21 = vmul.f32 %v8392_v42, %v10293_v13  ;;  %v8125_v34 = vld [vmem:[#allocation14 + $0xc0] ss:$12 sps:$4 sm:$0xff]   ;;  %v8130_v38 = vld [vmem:[#allocation14 + $0xdc] ss:$12 sps:$4 sm:$0xff]  }
0x1148   : > { %v8394_v43 = vpop.eup %8393  ;;  %v3161_v51 = vpack.c.bf16 %v3153_v40, %v3149_v39 }
0x1149   : > { %v8396_v45 = vpop.eup %8395  ;;  %v3155_v54 = vmul.f32 %v8394_v43, %v10297_v18  ;;  %3461 = vmatprep.mubr.bf16.mxu0 %v3159_v41  ;;  %v3162_v47 = vpack.c.bf16 %v3154_v21, %v3154_v21  ;;  %v8133_v21 = vld [vmem:[#allocation14 + $0xf4] ss:$12 sps:$4 sm:$0xff]  }
0x114a   : > { %v8398_v46 = vpop.eup %8397  ;;  %v3157_v28 = vmul.f32 %v8396_v45, %v10299_v2  ;;  %3509 = vmatprep.mubr.bf16.mxu1 %v3161_v51  ;;  %3462 = vmatmul.mubr.bf16.vlgmr.msra.gmra.mrb[48].mxu0 %v3158_v53  ;;  %v6747_v2 = vld [vmem:[#allocation28] ss:$0 sm:$0xff]  ;;  %v8127_v53 = vld [vmem:[#allocation14 + $0xc4] ss:$12 sps:$4 sm:$0xff]  }
0x114b   : > { %v3163_v44 = vpack.c.bf16 %v3155_v54, %v3155_v54  ;;  %3510 = vmatmul.mubr.bf16.vlgmr.msra.gmra.mrb[48].mxu1 %v3160_v48  ;;  %v3156_v52 = vmul.f32 %v8398_v46, %v10295_v16  ;;  %3766 = vmatprep.subr.bf16.mxu0 %v8127_v53 }
0x114c   : > { %v3165_v60 = vpack.c.bf16 %v3157_v28, %v3157_v28  ;;  %3767 = vmatpush1.bf16.msra.mxu0 %v8125_v34  ;;  %v6781_v34 = vld [vmem:[#allocation13 + $0x1] ss:$0 sm:$0xff] }
0x114d   : > { %3469 = vmatprep.mubr.bf16.mxu0 %v3163_v44  ;;  %v3164_v50 = vpack.c.bf16 %v3156_v52, %v3156_v52  ;;  %3768 = vmatprep.subr.bf16.mxu0 %v8130_v38  ;;  %v8131_v52 = vld [vmem:[#allocation14 + $0xf0] ss:$12 sps:$4 sm:$0xff]  }
0x114e   : > { %3517 = vmatprep.mubr.bf16.mxu1 %v3165_v60  ;;  %v8134_v60 = vld [vmem:[#allocation14 + $0xc8] ss:$12 sps:$4 sm:$0xff]  }
0x114f   : > { %7446 = vmatprep.subr.bf16.mxu1 %v8134_v60 }
0x1150   : > { %7447 = vmatpush3.bf16.msra.mxu1 %v8134_v60 }
0x1152   : > { %3470 = vmatmul.mubr.bf16.gmra.mrb[52].mxu0 %v3162_v47  ;;  %v8137_v47 = vld [vmem:[#allocation14 + $0x10c] ss:$12 sps:$4 sm:$0xff]  }
0x1153   : > { %3518 = vmatmul.mubr.bf16.gmra.mrb[52].mxu1 %v3164_v50  ;;  %3798 = vmatprep.mubr.bf16.mxu0 %v9237_v24  ;;  %v8138_v50 = vld [vmem:[#allocation14 + $0xe0] ss:$12 sps:$4 sm:$0xff]  }
0x1154   : > { %7448 = vmatprep.subr.bf16.mxu1 %v8138_v50 }
0x1155   : > { %7449 = vmatpush3.bf16.msra.mxu1 %v8138_v50 }
0x121d   : > { %v7072_v18 = vpop.f32.mrb[48].mxu0 }
0x121e   : > { %v7100_v55 = vpop.f32.mrb[48].mxu1  ;;  %v7073_v49 = vpop.f32.mrb[49].mxu0 }
0x121f   : > { %v7074_v56 = vadd.f32 %v7073_v49, %v7072_v18  ;;  %v7101_v57 = vpop.f32.mrb[49].mxu1  ;;  %v7075_v63 = vpop.f32.mrb[50].mxu0  ;;  %v8135_v18 = vld [vmem:[#allocation14 + $0x108] ss:$12 sps:$4 sm:$0xff]   ;;  %v8139_v49 = vld [vmem:[#allocation14 + $0x120] ss:$12 sps:$4 sm:$0xff]  }
0x1220   : > { %v7102_v19 = vadd.f32 %v7101_v57, %v7100_v55  ;;  %v7103_v13 = vpop.f32.mrb[50].mxu1  ;;  %v7076_v26 = vpop.f32.mrb[51].mxu0  ;;  %v8141_v55 = vld [vmem:[#allocation14 + $0x124] ss:$12 sps:$4 sm:$0xff]  }
0x1221   : > { %v3464_v1 = vadd.f32 %v7074_v56, %v6747_v2  ;;  %v7077_v16 = vadd.f32 %v7076_v26, %v7075_v63  ;;  %v7104_v30 = vpop.f32.mrb[51].mxu1  ;;  %v8145_v56 = vld [vmem:[#allocation14 + $0x13c] ss:$12 sps:$4 sm:$0xff]   ;;  %v8143_v63 = vld [vmem:[#allocation14 + $0x138] ss:$12 sps:$4 sm:$0xff]  }
0x1222   : > { %v7105_v4 = vadd.f32 %v7104_v30, %v7103_v13  ;;  %v8146_v57 = vld [vmem:[#allocation14 + $0x110] ss:$12 sps:$4 sm:$0xff]   ;;  %v8150_v13 = vld [vmem:[#allocation14 + $0x128] ss:$12 sps:$4 sm:$0xff]   ;;  %v8154_v30 = vld [vmem:[#allocation14 + $0x140] ss:$12 sps:$4 sm:$0xff]  }
0x1223   : > { %v3512_v6 = vadd.f32 %v7102_v19, %v3464_v1  ;;  %v3467_v31 = vadd.f32 %v7077_v16, %v6747_v2  ;;  %v8149_v19 = vld [vmem:[#allocation14 + $0x154] ss:$12 sps:$4 sm:$0xff]   ;;  %v8147_v26 = vld [vmem:[#allocation14 + $0x150] ss:$12 sps:$4 sm:$0xff]   ;;  %v8153_v16 = vld [vmem:[#allocation14 + $0x16c] ss:$12 sps:$4 sm:$0xff]  }
0x1224   : > { %v8151_v1 = vld [vmem:[#allocation14 + $0x168] ss:$12 sps:$4 sm:$0xff]  }
0x1225   : > { %v3515_v8 = vadd.f32 %v7105_v4, %v3467_v31  ;;  %v7078_v23 = vpop.f32.mrb[52].mxu0  ;;  %v10319_v9 = vadd.f32 %v3512_v6, %v10232_v35  ;;  %v8155_v4 = vld [vmem:[#allocation14 + $0x158] ss:$12 sps:$4 sm:$0xff]   ;;  %v8156_v6 = vld [vmem:[#allocation14 + $0x170] ss:$12 sps:$4 sm:$0xff]  }
0x1226   : > { %v7106_v10 = vpop.f32.mrb[52].mxu1  ;;  %v7079_v11 = vpop.f32.mrb[53].mxu0 }
0x1227   : > { %v7080_v12 = vadd.f32 %v7079_v11, %v7078_v23  ;;  %v7107_v14 = vpop.f32.mrb[53].mxu1  ;;  %3532 = vadd.xlane.f32.xlu1 %v10319_v9  ;;  %v7081_v15 = vpop.f32.mrb[54].mxu0  ;;  %v10323_v5 = vadd.f32 %v3515_v8, %v10237_v37  ;;  %v8128_v37 = vld [vmem:[#allocation14 + $0xd8] ss:$12 sps:$4 sm:$0xff]  }
0x1228   : > { %v7108_v20 = vadd.f32 %v7107_v14, %v7106_v10  ;;  %v7109_v22 = vpop.f32.mrb[54].mxu1  ;;  %v7082_v25 = vpop.f32.mrb[55].mxu0  ;;  %3769 = vmatpush1.bf16.msra.mxu0 %v8128_v37 }
0x1229   : > { %v3472_v7 = vadd.f32 %v7080_v12, %v6747_v2  ;;  %v7110_v27 = vpop.f32.mrb[55].mxu1  ;;  %3534 = vadd.xlane.f32.xlu0 %v10323_v5  ;;  %3770 = vmatprep.subr.bf16.mxu0 %v8133_v21  ;;  %v8142_v2 = vld [vmem:[#allocation14 + $0xf8] ss:$12 sps:$4 sm:$0xff]   ;;  %v6780_v25 = vld [vmem:[#allocation11 + $0x1] ss:$0 sm:$0xff] }
0x122a   : > { %7450 = vmatprep.subr.bf16.mxu1 %v8142_v2 }
0x122b   : > { %v3520_v29 = vadd.f32 %v7108_v20, %v3472_v7  ;;  %7451 = vmatpush3.bf16.msra.mxu1 %v8142_v2 }
0x122c   : > { %3771 = vmatpush1.bf16.msra.mxu0 %v8131_v52  ;;  %7452 = vmatprep.subr.bf16.mxu1 %v8146_v57 }
0x122d   : > { %v10327_v35 = vadd.f32 %v3520_v29, %v10234_v36  ;;  %3772 = vmatprep.subr.bf16.mxu0 %v8137_v47 }
0x122f   : > { %v3536_v32 = vsel %vm1050_vm1, %v10327_v35, 0.0  ;;  %7453 = vmatpush3.bf16.msra.mxu1 %v8146_v57 }
0x1230   : > { %3537 = vadd.xlane.f32.xlu1 %v3536_v32  ;;  %3773 = vmatpush1.bf16.msra.mxu0 %v8135_v18 }
0x1231   : > { %3774 = vmatprep.subr.bf16.mxu0 %v8141_v55  ;;  %7454 = vmatprep.subr.bf16.mxu1 %v8150_v13 }
0x1233   : > { %7455 = vmatpush3.bf16.msra.mxu1 %v8150_v13 }
0x1234   : > { %3775 = vmatpush1.bf16.msra.mxu0 %v8139_v49  ;;  %7456 = vmatprep.subr.bf16.mxu1 %v8154_v30 }
0x1235   : > { %3776 = vmatprep.subr.bf16.mxu0 %v8145_v56 }
0x1237   : > { %7457 = vmatpush3.bf16.msra.mxu1 %v8154_v30 }
0x1238   : > { %3777 = vmatpush1.bf16.msra.mxu0 %v8143_v63  ;;  %7458 = vmatprep.subr.bf16.mxu1 %v8155_v4 }
0x1239   : > { %3778 = vmatprep.subr.bf16.mxu0 %v8149_v19 }
0x123b   : > { %7459 = vmatpush3.bf16.msra.mxu1 %v8155_v4 }
0x123c   : > { %3779 = vmatpush1.bf16.msra.mxu0 %v8147_v26  ;;  %7460 = vmatprep.subr.bf16.mxu1 %v8156_v6 }
0x123d   : > { %3780 = vmatprep.subr.bf16.mxu0 %v8153_v16 }
0x123f   : > { %7461 = vmatpush3.bf16.msra.mxu1 %v8156_v6 }
0x1240   : > { %3781 = vmatpush1.bf16.msra.mxu0 %v8151_v1  ;;  %7650 = vmatprep.subr.bf16.mxu1 %v9238_v58 }
0x1241   : > { %7646 = vmatprep.subr.bf16.mxu0 %v9238_v58 }
0x12b4   : > { %v3533_v39 = vpop.xlane.xlu1 %3532 }
0x12b5   : > { %v3539_v48 = vmul.f32 0.0078125, %v3533_v39 }
0x12b6   : > { %v3535_v40 = vpop.xlane.xlu0 %3534 }
0x12b7   : > { %v10332_v42 = vsub.f32 %v10319_v9, %v3539_v48  ;;  %v3540_v36 = vmul.f32 0.0078125, %v3535_v40 }
0x12b9   : > { %v10335_v41 = vsub.f32 %v10323_v5, %v3540_v36  ;;  %v3545_v43 = vmul.f32 %v10332_v42, %v10332_v42 }
0x12bb   : > { %3548 = vadd.xlane.f32.xlu0 %v3545_v43  ;;  %v3546_v51 = vmul.f32 %v10335_v41, %v10335_v41 }
0x12bd   : > { %3550 = vadd.xlane.f32.xlu1 %v3546_v51  ;;  %v3538_v45 = vpop.xlane.xlu1 %3537 }
0x12be   : > { %v3541_v54 = vmul.f32 0.0078125, %v3538_v45 }
0x12c0   : > { %v10342_v46 = vsub.f32 %v10327_v35, %v3541_v54 }
0x12c2   : > { %v3547_v28 = vmul.f32 %v10342_v46, %v10342_v46 }
0x12c4   : > { %v3552_v44 = vsel %vm1050_vm1, %v3547_v28, 0.0 }
0x12c5   : > { %3553 = vadd.xlane.f32.xlu0 %v3552_v44 }
0x1348   : > { %v3549_v31 = vpop.xlane.xlu0 %3548 }
0x1349   : > { %v3555_v8 = vmul.f32 0.0078125, %v3549_v31 }
0x134a   : > { %v3551_v23 = vpop.xlane.xlu1 %3550 }
0x134b   : > { %v3558_v10 = vadd.f32 1e-05, %v3555_v8  ;;  %v3556_v11 = vmul.f32 0.0078125, %v3551_v23 }
0x134d   : > { %8399 = vrsqrt.f32 %v3558_v10  ;;  %v3559_v12 = vadd.f32 1e-05, %v3556_v11 }
0x134f   : > { %8401 = vrsqrt.f32 %v3559_v12 }
0x1352   : > { %v3554_v14 = vpop.xlane.xlu0 %3553 }
0x1353   : > { %v3557_v15 = vmul.f32 0.0078125, %v3554_v14 }
0x1355   : > { %v3560_v20 = vadd.f32 1e-05, %v3557_v15 }
0x1357   : > { %v8400_v22 = vpop.eup %8399  ;;  %8403 = vrsqrt.f32 %v3560_v20 }
0x1358   : > { %v3564_v7 = vmul.f32 %v8400_v22, %v10332_v42  ;;  %v3621_v42 = vld [vmem:[#allocation16 + $0x3] sm:$0x7] }
0x1359   : > { %v8402_v27 = vpop.eup %8401  ;;  %v3630_v45 = vrot.slane %v3621_v42, %v10002_v62  ;;  %v3634_v50 = vrot.slane %v3621_v42, %v10005_v0  ;;  %v3626_v26 = vrot.slane %v3621_v42, %v10009_v3 }
0x135a   : > { %v3573_v29 = vmul.f32 %v6780_v25, %v3564_v7  ;;  %v3565_v32 = vmul.f32 %v8402_v27, %v10335_v41 }
0x135c   : > { %v3574_v53 = vmul.f32 %v6780_v25, %v3565_v32  ;;  %v3582_v38 = vadd.f32 %v6781_v34, %v3573_v29 }
0x135e   : > { %v3583_v37 = vadd.f32 %v6781_v34, %v3574_v53 }
0x1360   : > { %v3585_v39 = vpack.c.bf16 %v3583_v37, %v3582_v38 }
0x1361   : > { %v8404_v48 = vpop.eup %8403 }
0x1362   : > { %3799 = vmatmul.mubr.bf16.vlgmr.msra.gmra.mrb[56].mxu0 %v3585_v39  ;;  %7462 = vmatprep.mubr.bf16.mxu1 %v3585_v39  ;;  %v3566_v40 = vmul.f32 %v8404_v48, %v10342_v46 }
0x1363   : > { %3808 = vmatprep.mubr.bf16.mxu0 %v9237_v24 }
0x1364   : > { %v3575_v36 = vmul.f32 %v6780_v25, %v3566_v40 }
0x1366   : > { %v3584_v43 = vadd.f32 %v6781_v34, %v3575_v36 }
0x1368   : > { %v3586_v51 = vpack.c.bf16 %v3584_v43, %v3584_v43 }
0x136a   : > { %3809 = vmatmul.mubr.bf16.gmra.mrb[60].mxu0 %v3586_v51  ;;  %7463 = vmatmul.mubr.bf16.vlgmr.msra.gmra.mrb[56].mxu1 %v3586_v51 }
0x136b   : > { %7472 = vmatprep.mubr.msk.f32.mxu0 %vm9239_vm2, %v9240_v59  ;;  %7487 = vmatprep.mubr.msk.f32.mxu1 %vm9239_vm2, %v9240_v59 }
0x1435   : > { %v3800_v41 = vpop.f32.mrb[56].mxu0 }
0x1436   : > { %v3802_v54 = vpop.f32.mrb[57].mxu0  ;;  %v10371_v4 = vadd.f32 %v3800_v41, %v3626_v26 }
0x1437   : > { %v3804_v28 = vpop.f32.mrb[58].mxu0  ;;  %v3803_v44 = vadd.f32 %v3802_v54, %v3630_v45 }
0x1438   : > { %v3806_v46 = vpop.f32.mrb[59].mxu0  ;;  %v10383_v31 = vadd.f32 %v3804_v28, %v3626_v26 }
0x1439   : > { %v3807_v21 = vadd.f32 %v3806_v46, %v3630_v45 }
0x143b   : > { %v7647_v60 = vpack.c.bf16 %v3807_v21, %v3803_v44  ;;  %v10358_v52 = vpack.i.bf16 %v3807_v21, %v3803_v44 }
0x143d   : > { %v3810_v47 = vpop.f32.mrb[60].mxu0  ;;  %v7464_v18 = vpop.f32.mrb[56].mxu1  ;;  %7649 = vmatpush3.bf16.xpose.msk.msra.mxu0 %vm10015_vm4, %v7647_v60 }
0x143e   : > { %v3812_v55 = vpop.f32.mrb[61].mxu0  ;;  %v3851_v2 = vpop.f32.mrb[57].mxu1  ;;  %7470 = vmatprep.subr.mxu0 %v9240_v59  ;;  %v10375_v6 = vadd.f32 %v7464_v18, %v3634_v50  ;;  %v10390_v8 = vadd.f32 %v3810_v47, %v3626_v26 }
0x143f   : > { %v3814_v49 = vpop.f32.mrb[62].mxu0  ;;  %v7465_v56 = vpop.f32.mrb[58].mxu1  ;;  %v3852_v19 = vadd.f32 %v3851_v2, %v3634_v50  ;;  %v10365_v1 = vadd.f32 %v3812_v55, %v3630_v45 }
0x1440   : > { %v3815_v57 = vpop.f32.mrb[63].mxu0  ;;  %v3854_v63 = vpop.f32.mrb[59].mxu1 }
0x1441   : > { %v3855_v13 = vadd.f32 %v3854_v63, %v3634_v50 }
0x1443   : > { %v7651_v16 = vpack.c.bf16 %v3855_v13, %v3852_v19  ;;  %v10367_v30 = vpack.i.bf16 %v3855_v13, %v3852_v19 }
0x1445   : > { %7471 = vmatpush3.xpose.msk.msra.mxu0 %vm1450_vm3, %v10365_v1  ;;  %7652 = vmatpush3.bf16.msra.mxu1 %v7651_v16 }
0x1446   : > { %7485 = vmatprep.subr.mxu1 %v9240_v59  ;;  %7657 = vmatprep.subr.bf16.mxu0 %v9238_v58 }
0x1448   : > { %7473 = vmatmul.mubr.msk.f32.vlgmr.msra.gmra.mrb[64].mxu0 %vm1450_vm3, %v10371_v4 }
0x1449   : > { %7486 = vmatpush3.msk.msra.mxu1 %vm1050_vm1, %v10375_v6  ;;  %7475 = vmatprep.mubr.msk.f32.mxu0 %vm9239_vm2, %v9240_v59 }
0x144a   : > { %7653 = vmatprep.subr.bf16.mxu1 %v9238_v58 }
0x144c   : > { %7476 = vmatmul.mubr.msk.f32.gmra.mrb[66].mxu0 %vm1450_vm3, %v10383_v31 }
0x144d   : > { %7478 = vmatprep.mubr.msk.f32.mxu0 %vm9239_vm2, %v9240_v59 }
0x1450   : > { %7479 = vmatmul.mubr.msk.f32.gmra.mrb[68].mxu0 %vm1450_vm3, %v10390_v8 }
0x1451   : > { %7517 = vmatprep.mubr.msk.f32.mxu0 %vm9239_vm2, %v9240_v59 }
0x151b   : > { %v3966_v23 = vpop.f32.mrb[64].mxu0 }
0x151c   : > { %v3980_v10 = vmul.f32 0.17677669, %v3966_v23  ;;  %v7474_v11 = vpop.f32.mrb[65].mxu0 }
0x151e   : > { %v3983_v12 = vsel %vm1552_vm5, %v3980_v10, -inf }
0x151f   : > { %3984 = vmax.xlane.f32.xlu1 %v3983_v12  ;;  %v3971_v14 = vpop.f32.mrb[66].mxu0 }
0x1520   : > { %v3981_v15 = vmul.f32 0.17677669, %v3971_v14  ;;  %v7477_v20 = vpop.f32.mrb[67].mxu0 }
0x1522   : > { %v3986_v22 = vsel %vm1552_vm5, %v3981_v15, -inf }
0x1523   : > { %3987 = vmax.xlane.f32.xlu0 %v3986_v22  ;;  %v3976_v25 = vpop.f32.mrb[68].mxu0 }
0x1524   : > { %v3982_v7 = vmul.f32 0.17677669, %v3976_v25  ;;  %v7480_v27 = vpop.f32.mrb[69].mxu0 }
0x1526   : > { %v3989_v29 = vsel %vm1559_vm6, %v3982_v7, -inf }
0x1527   : > { %3990 = vmax.xlane.f32.xlu1 %v3989_v29 }
0x1538   : > { %7973 = vrot.lane.b32.xlu1 %v10358_v52, %s9241_s7 }
0x15ac   : > { %v3985_v32 = vpop.xlane.xlu1 %3984 }
0x15ad   : > { %v3992_v34 = vsub.f32 %v3980_v10, %v3985_v32 }
0x15af   : > { %v3995_v53 = vmul.f32 1.442695, %v3992_v34 }
0x15b0   : > { %v3988_v38 = vpop.xlane.xlu0 %3987 }
0x15b1   : > { %8405 = vpow2.f32 %v3995_v53  ;;  %v3993_v37 = vsub.f32 %v3981_v15, %v3988_v38 }
0x15b3   : > { %v3997_v39 = vmul.f32 1.442695, %v3993_v37 }
0x15b4   : > { %v3991_v48 = vpop.xlane.xlu1 %3990 }
0x15b5   : > { %8407 = vpow2.f32 %v3997_v39  ;;  %v3994_v40 = vsub.f32 %v3982_v7, %v3991_v48 }
0x15b7   : > { %v3999_v36 = vmul.f32 1.442695, %v3994_v40 }
0x15b8   : > { %v7974_v28 = vpop.permute.xlu1 %7973 }
0x15b9   : > { %8409 = vpow2.f32 %v3999_v36  ;;  %v7976_v60 = vunpack.i.h.bf16 %v7974_v28  ;;  %v7975_v47 = vunpack.i.l.bf16 %v7974_v28 }
0x15bb   : > { %v8406_v43 = vpop.eup %8405  ;;  %v7654_v55 = vpack.c.bf16 %v7976_v60, %v7975_v47 }
0x15bc   : > { %v4001_v51 = vsel %vm1552_vm5, %v8406_v43, 0.0 }
0x15bd   : > { %4002 = vadd.xlane.f32.xlu0 %v4001_v51 }
0x15bf   : > { %v8408_v42 = vpop.eup %8407 }
0x15c0   : > { %v4004_v41 = vsel %vm1552_vm5, %v8408_v42, 0.0 }
0x15c1   : > { %4005 = vadd.xlane.f32.xlu1 %v4004_v41 }
0x15c3   : > { %v8410_v45 = vpop.eup %8409 }
0x15c4   : > { %v4007_v54 = vsel %vm1559_vm6, %v8410_v45, 0.0 }
0x15c5   : > { %4008 = vadd.xlane.f32.xlu0 %v4007_v54 }
0x15d2   : > { %4110 = vrot.lane.b32.xlu1 %v10371_v4, %s9241_s7 }
0x15d6   : > { %4112 = vrot.lane.b32.xlu1 %v10383_v31, %s9241_s7 }
0x15da   : > { %4114 = vrot.lane.b32.xlu1 %v10390_v8, %s9241_s7 }
0x15db   : > { %4120 = vrot.lane.b32.xlu0 %v10365_v1, %s9241_s7 }
0x164a   : > { %v4003_v46 = vpop.xlane.xlu0 %4002 }
0x164b   : > { %8411 = vrcp.f32 %v4003_v46 }
0x164e   : > { %v4006_v44 = vpop.xlane.xlu1 %4005 }
0x164f   : > { %8413 = vrcp.f32 %v4006_v44 }
0x1652   : > { %v4009_v21 = vpop.xlane.xlu0 %4008  ;;  %v4111_v63 = vpop.permute.xlu1 %4110 }
0x1653   : > { %8415 = vrcp.f32 %v4009_v21 }
0x1655   : > { %v8412_v50 = vpop.eup %8411 }
0x1656   : > { %v4013_v18 = vmul.f32 %v8412_v50, %v8406_v43  ;;  %v4121_v19 = vpop.permute.xlu0 %4120  ;;  %v4113_v13 = vpop.permute.xlu1 %4112  ;;  %v8159_v50 = vld [vmem:[#allocation17 + $0x50] sm:$0xff]  }
0x1658   : > { %7488 = vmatmul.mubr.msk.f32.vlgmr.msra.gmra.mrb[60].mxu1 %vm1552_vm5, %v4013_v18 }
0x1659   : > { %v8414_v2 = vpop.eup %8413  ;;  %7656 = vmatpush3.bf16.xpose.msk.msra.mxu1 %vm10015_vm4, %v7654_v55  ;;  %7490 = vmatprep.mubr.msk.f32.mxu1 %vm9239_vm2, %v9240_v59 }
0x165a   : > { %v4014_v49 = vmul.f32 %v8414_v2, %v8408_v42  ;;  %7500 = vmatprep.subr.mxu1 %v9240_v59  ;;  %v4115_v26 = vpop.permute.xlu1 %4114 }
0x165c   : > { %7491 = vmatmul.mubr.msk.f32.gmra.mrb[62].mxu1 %vm1552_vm5, %v4014_v49 }
0x165d   : > { %v8416_v56 = vpop.eup %8415  ;;  %7493 = vmatprep.mubr.msk.f32.mxu1 %vm9239_vm2, %v9240_v59 }
0x165e   : > { %v4015_v57 = vmul.f32 %v8416_v56, %v8410_v45 }
0x1660   : > { %7494 = vmatmul.mubr.msk.f32.gmra.mrb[64].mxu1 %vm1552_vm5, %v4015_v57 }
0x1661   : > { %7501 = vmatpush3.xpose.msk.msra.mxu1 %vm1450_vm3, %v4121_v19  ;;  %7502 = vmatprep.mubr.msk.f32.mxu1 %vm9239_vm2, %v9240_v59 }
0x1662   : > { %7526 = vmatprep.subr.bf16.mxu1 %v8159_v50 }
0x1664   : > { %7503 = vmatmul.mubr.msk.f32.vlgmr.msra.gmra.mrb[66].mxu1 %vm1450_vm3, %v4111_v63  ;;  %v8158_v63 = vld [vmem:[#allocation17 + $0x48] sm:$0xff]  }
0x1665   : > { %7505 = vmatprep.mubr.msk.f32.mxu1 %vm9239_vm2, %v9240_v59  ;;  %7527 = vmatpush3.bf16.msra.mxu1 %v8159_v50 }
0x1668   : > { %7506 = vmatmul.mubr.msk.f32.gmra.mrb[68].mxu1 %vm1450_vm3, %v4113_v13 }
0x1669   : > { %7508 = vmatprep.mubr.msk.f32.mxu1 %vm9239_vm2, %v9240_v59 }
0x166c   : > { %7509 = vmatmul.mubr.msk.f32.gmra.mrb[70].mxu1 %vm1450_vm3, %v4115_v26 }
0x172b   : > { %v10432_v16 = vpop.f32.mrb[60].mxu1 }
0x172c   : > { %v7489_v23 = vpop.f32.mrb[61].mxu1 }
0x172f   : > { %v10434_v10 = vpop.f32.mrb[62].mxu1 }
0x1730   : > { %v4108_v11 = vpack.c.bf16 %v10434_v10, %v10432_v16  ;;  %v7492_v12 = vpop.f32.mrb[63].mxu1 }
0x1733   : > { %v10438_v14 = vpop.f32.mrb[64].mxu1 }
0x1734   : > { %v7495_v15 = vpop.f32.mrb[65].mxu1  ;;  %v4109_v12 = vpack.c.bf16 %v10438_v14, %v10438_v14 }
0x1735   : > { %v8160_v15 = vld [vmem:[#allocation17 + $0x58] sm:$0xff]  }
0x1736   : > { %7528 = vmatprep.subr.bf16.mxu1 %v8160_v15 }
0x1737   : > { %v4200_v20 = vpop.f32.mrb[66].mxu1  ;;  %7529 = vmatpush3.bf16.msra.mxu1 %v8160_v15 }
0x1738   : > { %v4214_v22 = vmul.f32 0.17677669, %v4200_v20  ;;  %v7504_v25 = vpop.f32.mrb[67].mxu1  ;;  %7660 = vmatprep.subr.bf16.mxu1 %v9238_v58 }
0x173a   : > { %v4217_v7 = vsel %vm1552_vm5, %v4214_v22, -inf }
0x173b   : > { %4218 = vmax.xlane.f32.xlu0 %v4217_v7  ;;  %v4205_v27 = vpop.f32.mrb[68].mxu1 }
0x173c   : > { %v4215_v29 = vmul.f32 0.17677669, %v4205_v27  ;;  %v7507_v32 = vpop.f32.mrb[69].mxu1 }
0x173e   : > { %v4220_v34 = vsel %vm1552_vm5, %v4215_v29, -inf }
0x173f   : > { %4221 = vmax.xlane.f32.xlu1 %v4220_v34  ;;  %v4210_v53 = vpop.f32.mrb[70].mxu1 }
0x1740   : > { %v4216_v38 = vmul.f32 0.17677669, %v4210_v53  ;;  %v7510_v37 = vpop.f32.mrb[71].mxu1 }
0x1742   : > { %v4223_v39 = vsel %vm1559_vm6, %v4216_v38, -inf }
0x1743   : > { %4224 = vmax.xlane.f32.xlu0 %v4223_v39 }
0x17c8   : > { %v4219_v48 = vpop.xlane.xlu0 %4218 }
0x17c9   : > { %v4226_v40 = vsub.f32 %v4214_v22, %v4219_v48 }
0x17cb   : > { %v4229_v36 = vmul.f32 1.442695, %v4226_v40 }
0x17cc   : > { %v4222_v43 = vpop.xlane.xlu1 %4221 }
0x17cd   : > { %8417 = vpow2.f32 %v4229_v36  ;;  %v4227_v51 = vsub.f32 %v4215_v29, %v4222_v43 }
0x17cf   : > { %v4231_v42 = vmul.f32 1.442695, %v4227_v51 }
0x17d0   : > { %v4225_v41 = vpop.xlane.xlu0 %4224 }
0x17d1   : > { %8419 = vpow2.f32 %v4231_v42  ;;  %v4228_v45 = vsub.f32 %v4216_v38, %v4225_v41 }
0x17d3   : > { %v4233_v54 = vmul.f32 1.442695, %v4228_v45 }
0x17d5   : > { %8421 = vpow2.f32 %v4233_v54 }
0x17d7   : > { %v8418_v28 = vpop.eup %8417 }
0x17d8   : > { %v4235_v46 = vsel %vm1552_vm5, %v8418_v28, 0.0 }
0x17d9   : > { %4236 = vadd.xlane.f32.xlu0 %v4235_v46 }
0x17db   : > { %v8420_v44 = vpop.eup %8419 }
0x17dc   : > { %v4238_v21 = vsel %vm1552_vm5, %v8420_v44, 0.0 }
0x17dd   : > { %4239 = vadd.xlane.f32.xlu0 %v4238_v21 }
0x17df   : > { %v8422_v60 = vpop.eup %8421 }
0x17e0   : > { %v4241_v47 = vsel %vm1559_vm6, %v8422_v60, 0.0 }
0x17e1   : > { %4242 = vadd.xlane.f32.xlu1 %v4241_v47 }
0x17f2   : > { %4256 = vrot.lane.b32.xlu1 %v10375_v6, %s9241_s7 }
0x17f3   : > { %7978 = vrot.lane.b32.xlu0 %v10367_v30, %s9241_s7 }
0x17f6   : > { %7983 = vrot.lane.b32.xlu1 %v10358_v52, %s9242_s3 }
0x17f7   : > { %4485 = vrot.lane.b32.xlu0 %v10371_v4, %s9242_s3 }
0x17fa   : > { %4495 = vrot.lane.b32.xlu1 %v10365_v1, %s9242_s3 }
0x17fb   : > { %4489 = vrot.lane.b32.xlu0 %v10390_v8, %s9242_s3 }
0x17fe   : > { %4487 = vrot.lane.b32.xlu1 %v10383_v31, %s9242_s3 }
0x17ff   : > { %4805 = vrot.lane.b32.xlu0 %v10365_v1, %s9243_s30 }
0x1802   : > { %7988 = vrot.lane.b32.xlu1 %v10358_v52, %s9243_s30 }
0x1803   : > { %4797 = vrot.lane.b32.xlu0 %v10383_v31, %s9243_s30 }
0x1806   : > { %4795 = vrot.lane.b32.xlu1 %v10371_v4, %s9243_s30  ;;  %v8157_v4 = vld [vmem:[#allocation17 + $0x40] sm:$0xff]  }
0x180a   : > { %4799 = vrot.lane.b32.xlu1 %v10390_v8, %s9243_s30 }
0x1866   : > { %v4237_v18 = vpop.xlane.xlu0 %4236 }
0x1867   : > { %8423 = vrcp.f32 %v4237_v18 }
0x186a   : > { %v4240_v55 = vpop.xlane.xlu0 %4239 }
0x186b   : > { %8425 = vrcp.f32 %v4240_v55 }
0x186e   : > { %v4243_v1 = vpop.xlane.xlu1 %4242  ;;  %v7979_v2 = vpop.permute.xlu0 %7978 }
0x186f   : > { %v7981_v49 = vunpack.i.h.bf16 %v7979_v2  ;;  %v7980_v52 = vunpack.i.l.bf16 %v7979_v2  ;;  %8427 = vrcp.f32 %v4243_v1 }
0x1871   : > { %v7658_v56 = vpack.c.bf16 %v7981_v49, %v7980_v52  ;;  %v8424_v31 = vpop.eup %8423 }
0x1872   : > { %v4247_v57 = vmul.f32 %v8424_v31, %v8418_v28  ;;  %v4257_v8 = vpop.permute.xlu1 %4256  ;;  %v4486_v42 = vpop.permute.xlu0 %4485 }
0x1873   : > { %7659 = vmatpush3.bf16.msra.mxu0 %v7658_v56 }
0x1874   : > { %7515 = vmatprep.subr.mxu0 %v9240_v59 }
0x1875   : > { %v8426_v19 = vpop.eup %8425 }
0x1876   : > { %v4248_v13 = vmul.f32 %v8426_v19, %v8420_v44  ;;  %v7984_v20 = vpop.permute.xlu1 %7983  ;;  %v4490_v45 = vpop.permute.xlu0 %4489 }
0x1877   : > { %7516 = vmatpush3.msk.msra.mxu0 %vm1050_vm1, %v4257_v8  ;;  %v7986_v27 = vunpack.i.h.bf16 %v7984_v20  ;;  %v7985_v29 = vunpack.i.l.bf16 %v7984_v20 }
0x1878   : > { %7518 = vmatmul.mubr.msk.f32.vlgmr.msra.gmra.mrb[70].mxu0 %vm1552_vm5, %v4247_v57  ;;  %7534 = vmatprep.subr.bf16.mxu0 %v8157_v4 }
0x1879   : > { %7520 = vmatprep.mubr.msk.f32.mxu0 %vm9239_vm2, %v9240_v59  ;;  %7535 = vmatpush3.bf16.msra.mxu0 %v8157_v4  ;;  %v8428_v26 = vpop.eup %8427  ;;  %v7661_v38 = vpack.c.bf16 %v7986_v27, %v7985_v29 }
0x187a   : > { %7536 = vmatprep.subr.bf16.mxu0 %v8158_v63  ;;  %v4249_v23 = vmul.f32 %v8428_v26, %v8422_v60  ;;  %v4496_v7 = vpop.permute.xlu1 %4495  ;;  %v4806_v54 = vpop.permute.xlu0 %4805 }
0x187c   : > { %7521 = vmatmul.mubr.msk.f32.gmra.mrb[72].mxu0 %vm1552_vm5, %v4248_v13 }
0x187d   : > { %7523 = vmatprep.mubr.msk.f32.mxu0 %vm9239_vm2, %v9240_v59  ;;  %7537 = vmatpush3.bf16.msra.mxu0 %v8158_v63 }
0x187e   : > { %7664 = vmatprep.subr.bf16.mxu0 %v9238_v58  ;;  %v4488_v32 = vpop.permute.xlu1 %4487  ;;  %v4798_v28 = vpop.permute.xlu0 %4797 }
0x1880   : > { %7524 = vmatmul.mubr.msk.f32.gmra.mrb[74].mxu0 %vm1552_vm5, %v4249_v23 }
0x1881   : > { %7538 = vmatprep.mubr.msk.bf16.mxu0 %vm1450_vm3, %v4108_v11 }
0x1882   : > { %v7989_v40 = vpop.permute.xlu1 %7988 }
0x1883   : > { %v7991_v43 = vunpack.i.h.bf16 %v7989_v40  ;;  %v7990_v51 = vunpack.i.l.bf16 %v7989_v40 }
0x1884   : > { %7539 = vmatmul.mubr.msk.bf16.vlgmr.msra.gmra.mrb[76].mxu0 %vm1450_vm3, %v4109_v12 }
0x1885   : > { %7563 = vmatprep.mubr.msk.f32.mxu0 %vm9239_vm2, %v9240_v59  ;;  %v7668_v41 = vpack.c.bf16 %v7991_v43, %v7990_v51 }
0x1886   : > { %v4796_v17 = vpop.permute.xlu1 %4795 }
0x188a   : > { %v4800_v46 = vpop.permute.xlu1 %4799 }
0x194b   : > { %v4337_v22 = vpop.f32.mrb[70].mxu0 }
0x194c   : > { %v7519_v25 = vpop.f32.mrb[71].mxu0 }
0x194f   : > { %v4342_v16 = vpop.f32.mrb[72].mxu0 }
0x1950   : > { %v4351_v10 = vpack.c.bf16 %v4342_v16, %v4337_v22  ;;  %v7522_v11 = vpop.f32.mrb[73].mxu0 }
0x1952   : > { %7530 = vmatprep.mubr.msk.bf16.mxu1 %vm1450_vm3, %v4351_v10 }
0x1953   : > { %v4347_v14 = vpop.f32.mrb[74].mxu0 }
0x1954   : > { %v4352_v34 = vpack.c.bf16 %v4347_v14, %v4347_v14  ;;  %v7525_v53 = vpop.f32.mrb[75].mxu0 }
0x1956   : > { %7531 = vmatmul.mubr.msk.bf16.vlgmr.msra.gmra.mrb[72].mxu1 %vm1450_vm3, %v4352_v34 }
0x1957   : > { %7663 = vmatpush3.bf16.xpose.msk.msra.mxu1 %vm10015_vm4, %v7661_v38  ;;  %v7540_v37 = vpop.f32.mrb[76].mxu0  ;;  %7548 = vmatprep.mubr.msk.f32.mxu1 %vm9239_vm2, %v9240_v59 }
0x1958   : > { %v4471_v39 = vpop.f32.mrb[77].mxu0  ;;  %7546 = vmatprep.subr.mxu1 %v9240_v59 }
0x1959   : > { %v7541_v48 = vpop.f32.mrb[78].mxu0 }
0x195a   : > { %v4474_v36 = vpop.f32.mrb[79].mxu0 }
0x195f   : > { %7547 = vmatpush3.xpose.msk.msra.mxu1 %vm1450_vm3, %v4496_v7 }
0x1960   : > { %7667 = vmatprep.subr.bf16.mxu1 %v9238_v58 }
0x1962   : > { %7549 = vmatmul.mubr.msk.f32.vlgmr.msra.gmra.mrb[76].mxu1 %vm1450_vm3, %v4486_v42 }
0x1963   : > { %7670 = vmatpush3.bf16.xpose.msk.msra.mxu1 %vm10015_vm4, %v7668_v41  ;;  %7551 = vmatprep.mubr.msk.f32.mxu1 %vm9239_vm2, %v9240_v59 }
0x1964   : > { %7584 = vmatprep.subr.mxu1 %v9240_v59 }
0x1966   : > { %7552 = vmatmul.mubr.msk.f32.gmra.mrb[78].mxu1 %vm1450_vm3, %v4488_v32 }
0x1967   : > { %7554 = vmatprep.mubr.msk.f32.mxu1 %vm9239_vm2, %v9240_v59 }
0x196a   : > { %7555 = vmatmul.mubr.msk.f32.gmra.mrb[80].mxu1 %vm1450_vm3, %v4490_v45 }
0x196b   : > { %7585 = vmatpush3.xpose.msk.msra.mxu1 %vm1450_vm3, %v4806_v54  ;;  %7586 = vmatprep.mubr.msk.f32.mxu1 %vm9239_vm2, %v9240_v59 }
0x196e   : > { %7587 = vmatmul.mubr.msk.f32.vlgmr.msra.gmra.mrb[82].mxu1 %vm1450_vm3, %v4796_v17 }
0x196f   : > { %7589 = vmatprep.mubr.msk.f32.mxu1 %vm9239_vm2, %v9240_v59 }
0x1972   : > { %7590 = vmatmul.mubr.msk.f32.gmra.mrb[84].mxu1 %vm1450_vm3, %v4798_v28 }
0x1973   : > { %7592 = vmatprep.mubr.msk.f32.mxu1 %vm9239_vm2, %v9240_v59 }
0x1976   : > { %7593 = vmatmul.mubr.msk.f32.gmra.mrb[86].mxu1 %vm1450_vm3, %v4800_v46 }
0x1a29   : > { %v7532_v44 = vpop.f32.mrb[72].mxu1 }
0x1a2a   : > { %v10519_v21 = vadd.f32 %v7540_v37, %v7532_v44  ;;  %v4405_v60 = vpop.f32.mrb[73].mxu1 }
0x1a2b   : > { %v10521_v47 = vadd.f32 %v4471_v39, %v4405_v60  ;;  %v7533_v50 = vpop.f32.mrb[74].mxu1 }
0x1a2c   : > { %v4408_v18 = vpop.f32.mrb[75].mxu1 }
0x1a2d   : > { %v10523_v55 = vadd.f32 %v4474_v36, %v4408_v18 }
0x1a35   : > { %v4575_v1 = vpop.f32.mrb[76].mxu1 }
0x1a36   : > { %v4589_v2 = vmul.f32 0.17677669, %v4575_v1  ;;  %v7550_v49 = vpop.f32.mrb[77].mxu1 }
0x1a38   : > { %v4592_v52 = vsel %vm1552_vm5, %v4589_v2, -inf }
0x1a39   : > { %4593 = vmax.xlane.f32.xlu0 %v4592_v52  ;;  %v4580_v56 = vpop.f32.mrb[78].mxu1 }
0x1a3a   : > { %v4590_v31 = vmul.f32 0.17677669, %v4580_v56  ;;  %v7553_v4 = vpop.f32.mrb[79].mxu1 }
0x1a3c   : > { %v4595_v57 = vsel %vm1552_vm5, %v4590_v31, -inf }
0x1a3d   : > { %4596 = vmax.xlane.f32.xlu1 %v4595_v57  ;;  %v4585_v8 = vpop.f32.mrb[80].mxu1 }
0x1a3e   : > { %v4591_v63 = vmul.f32 0.17677669, %v4585_v8  ;;  %v7556_v19 = vpop.f32.mrb[81].mxu1 }
0x1a40   : > { %v4598_v13 = vsel %vm1559_vm6, %v4591_v63, -inf }
0x1a41   : > { %4599 = vmax.xlane.f32.xlu0 %v4598_v13  ;;  %v4885_v26 = vpop.f32.mrb[82].mxu1 }
0x1a42   : > { %v7588_v23 = vpop.f32.mrb[83].mxu1  ;;  %v4899_v36 = vmul.f32 0.17677669, %v4885_v26 }
0x1a44   : > { %v4902_v42 = vsel %vm1552_vm5, %v4899_v36, -inf }
0x1a45   : > { %v4890_v12 = vpop.f32.mrb[84].mxu1 }
0x1a46   : > { %v7591_v15 = vpop.f32.mrb[85].mxu1  ;;  %v4900_v40 = vmul.f32 0.17677669, %v4890_v12 }
0x1a48   : > { %v4905_v51 = vsel %vm1552_vm5, %v4900_v40, -inf }
0x1a49   : > { %v4895_v20 = vpop.f32.mrb[86].mxu1 }
0x1a4a   : > { %v7594_v22 = vpop.f32.mrb[87].mxu1  ;;  %v4901_v43 = vmul.f32 0.17677669, %v4895_v20 }
0x1a4c   : > { %v4908_v41 = vsel %vm1559_vm6, %v4901_v43, -inf }
0x1ac6   : > { %v4594_v25 = vpop.xlane.xlu0 %4593 }
0x1ac7   : > { %v4601_v7 = vsub.f32 %v4589_v2, %v4594_v25 }
0x1ac9   : > { %v4604_v16 = vmul.f32 1.442695, %v4601_v7 }
0x1aca   : > { %v4597_v10 = vpop.xlane.xlu1 %4596 }
0x1acb   : > { %8429 = vpow2.f32 %v4604_v16  ;;  %v4602_v11 = vsub.f32 %v4590_v31, %v4597_v10  ;;  %v8161_v16 = vld [vmem:[#allocation17 + $0x60] sm:$0xff]   ;;  %v8162_v10 = vld [vmem:[#allocation17 + $0x68] sm:$0xff]  }
0x1acd   : > { %v4606_v27 = vmul.f32 1.442695, %v4602_v11 }
0x1ace   : > { %v4600_v29 = vpop.xlane.xlu0 %4599 }
0x1acf   : > { %8431 = vpow2.f32 %v4606_v27  ;;  %v4603_v14 = vsub.f32 %v4591_v63, %v4600_v29 }
0x1ad1   : > { %v4608_v32 = vmul.f32 1.442695, %v4603_v14 }
0x1ad3   : > { %8433 = vpow2.f32 %v4608_v32 }
0x1ad5   : > { %v8430_v34 = vpop.eup %8429 }
0x1ad6   : > { %v4610_v53 = vsel %vm1552_vm5, %v8430_v34, 0.0 }
0x1ad7   : > { %4611 = vadd.xlane.f32.xlu0 %v4610_v53 }
0x1ad9   : > { %v8432_v38 = vpop.eup %8431 }
0x1ada   : > { %v4613_v37 = vsel %vm1552_vm5, %v8432_v38, 0.0 }
0x1adb   : > { %4614 = vadd.xlane.f32.xlu0 %v4613_v37 }
0x1add   : > { %v8434_v39 = vpop.eup %8433 }
0x1ade   : > { %v4616_v48 = vsel %vm1559_vm6, %v8434_v39, 0.0 }
0x1adf   : > { %4617 = vadd.xlane.f32.xlu1 %v4616_v48 }
0x1af0   : > { %4629 = vrot.lane.b32.xlu1 %v10375_v6, %s9242_s3 }
0x1af1   : > { %7993 = vrot.lane.b32.xlu0 %v10367_v30, %s9242_s3 }
0x1b10   : > { %4906 = vmax.xlane.f32.xlu0 %v4905_v51 }
0x1b14   : > { %4903 = vmax.xlane.f32.xlu1 %v4902_v42  ;;  %4909 = vmax.xlane.f32.xlu0 %v4908_v41 }
0x1b64   : > { %v4612_v45 = vpop.xlane.xlu0 %4611 }
0x1b65   : > { %8435 = vrcp.f32 %v4612_v45 }
0x1b68   : > { %v4615_v54 = vpop.xlane.xlu0 %4614 }
0x1b69   : > { %8437 = vrcp.f32 %v4615_v54 }
0x1b6c   : > { %v4618_v17 = vpop.xlane.xlu1 %4617  ;;  %v7994_v28 = vpop.permute.xlu0 %7993 }
0x1b6d   : > { %v7996_v46 = vunpack.i.h.bf16 %v7994_v28  ;;  %v7995_v44 = vunpack.i.l.bf16 %v7994_v28  ;;  %8439 = vrcp.f32 %v4618_v17  ;;  %v8163_v17 = vld [vmem:[#allocation17 + $0x70] sm:$0xff]   ;;  %v8164_v28 = vld [vmem:[#allocation17 + $0x78] sm:$0xff]  }
0x1b6e   : > { %7610 = vmatprep.subr.bf16.mxu1 %v8163_v17 }
0x1b6f   : > { %v7665_v60 = vpack.c.bf16 %v7996_v46, %v7995_v44  ;;  %v8436_v50 = vpop.eup %8435  ;;  %7611 = vmatpush3.bf16.msra.mxu1 %v8163_v17  ;;  %v8188_v17 = vld [vmem:[#allocation23 + $0x16c] ss:$16 sps:$4 sm:$0xff]  }
0x1b70   : > { %v4622_v18 = vmul.f32 %v8436_v50, %v8430_v34  ;;  %v4630_v1 = vpop.permute.xlu1 %4629  ;;  %7612 = vmatprep.subr.bf16.mxu1 %v8164_v28 }
0x1b71   : > { %7666 = vmatpush3.bf16.msra.mxu0 %v7665_v60 }
0x1b72   : > { %7561 = vmatprep.subr.mxu0 %v9240_v59 }
0x1b73   : > { %v8438_v2 = vpop.eup %8437  ;;  %7613 = vmatpush3.bf16.msra.mxu1 %v8164_v28  ;;  %v8183_v28 = vld [vmem:[#allocation23 + $0x160] ss:$16 sps:$4 sm:$0xff]  }
0x1b74   : > { %v4623_v49 = vmul.f32 %v8438_v2, %v8432_v38 }
0x1b75   : > { %7562 = vmatpush3.msk.msra.mxu0 %vm1050_vm1, %v4630_v1 }
0x1b76   : > { %7564 = vmatmul.mubr.msk.f32.vlgmr.msra.gmra.mrb[80].mxu0 %vm1552_vm5, %v4622_v18  ;;  %7572 = vmatprep.subr.bf16.mxu0 %v8161_v16 }
0x1b77   : > { %7566 = vmatprep.mubr.msk.f32.mxu0 %vm9239_vm2, %v9240_v59  ;;  %v8440_v52 = vpop.eup %8439  ;;  %7573 = vmatpush3.bf16.msra.mxu0 %v8161_v16 }
0x1b78   : > { %v4624_v56 = vmul.f32 %v8440_v52, %v8434_v39  ;;  %7574 = vmatprep.subr.bf16.mxu0 %v8162_v10 }
0x1b7a   : > { %7567 = vmatmul.mubr.msk.f32.gmra.mrb[82].mxu0 %vm1552_vm5, %v4623_v49 }
0x1b7b   : > { %7569 = vmatprep.mubr.msk.f32.mxu0 %vm9239_vm2, %v9240_v59  ;;  %7575 = vmatpush3.bf16.msra.mxu0 %v8162_v10  ;;  %v8167_v10 = vld [vmem:[#allocation23 + $0x104] ss:$16 sps:$4 sm:$0xff]  }
0x1b7c   : > { %7671 = vmatprep.subr.bf16.mxu0 %v9238_v58 }
0x1b7e   : > { %7570 = vmatmul.mubr.msk.f32.gmra.mrb[84].mxu0 %vm1552_vm5, %v4624_v56 }
0x1b9d   : > { %v4907_v31 = vpop.xlane.xlu0 %4906 }
0x1b9e   : > { %v4912_v4 = vsub.f32 %v4900_v40, %v4907_v31 }
0x1ba0   : > { %v4916_v57 = vmul.f32 1.442695, %v4912_v4 }
0x1ba1   : > { %v4904_v8 = vpop.xlane.xlu1 %4903  ;;  %v4910_v63 = vpop.xlane.xlu0 %4909 }
0x1ba2   : > { %8441 = vpow2.f32 %v4916_v57  ;;  %v4911_v19 = vsub.f32 %v4899_v36, %v4904_v8  ;;  %v4913_v13 = vsub.f32 %v4901_v43, %v4910_v63 }
0x1ba4   : > { %v4914_v26 = vmul.f32 1.442695, %v4911_v19  ;;  %v4918_v23 = vmul.f32 1.442695, %v4913_v13 }
0x1ba6   : > { %8443 = vpow2.f32 %v4914_v26 }
0x1ba7   : > { %8445 = vpow2.f32 %v4918_v23 }
0x1bac   : > { %v8442_v12 = vpop.eup %8441 }
0x1bad   : > { %v4923_v15 = vsel %vm1552_vm5, %v8442_v12, 0.0 }
0x1bae   : > { %4924 = vadd.xlane.f32.xlu0 %v4923_v15 }
0x1bb0   : > { %v8444_v20 = vpop.eup %8443 }
0x1bb1   : > { %v4920_v22 = vsel %vm1552_vm5, %v8444_v20, 0.0  ;;  %v8446_v25 = vpop.eup %8445 }
0x1bb2   : > { %4921 = vadd.xlane.f32.xlu1 %v4920_v22  ;;  %v4926_v7 = vsel %vm1559_vm6, %v8446_v25, 0.0 }
0x1bb6   : > { %4927 = vadd.xlane.f32.xlu1 %v4926_v7 }
0x1bc4   : > { %7998 = vrot.lane.b32.xlu0 %v10367_v30, %s9243_s30 }
0x1bc7   : > { %4939 = vrot.lane.b32.xlu1 %v10375_v6, %s9243_s30 }
0x1c3b   : > { %v4925_v11 = vpop.xlane.xlu0 %4924 }
0x1c3f   : > { %v4922_v29 = vpop.xlane.xlu1 %4921  ;;  %v7999_v32 = vpop.permute.xlu0 %7998 }
0x1c40   : > { %8447 = vrcp.f32 %v4922_v29  ;;  %v8001_v38 = vunpack.i.h.bf16 %v7999_v32  ;;  %v8000_v37 = vunpack.i.l.bf16 %v7999_v32  ;;  %v8171_v29 = vld [vmem:[#allocation23 + $0x120] ss:$16 sps:$4 sm:$0xff]  }
0x1c41   : > { %8449 = vrcp.f32 %v4925_v11  ;;  %v8168_v11 = vld [vmem:[#allocation23 + $0x108] ss:$16 sps:$4 sm:$0xff]  }
0x1c42   : > { %v7672_v36 = vpack.c.bf16 %v8001_v38, %v8000_v37 }
0x1c43   : > { %v4928_v39 = vpop.xlane.xlu1 %4927 }
0x1c44   : > { %8451 = vrcp.f32 %v4928_v39 }
0x1c47   : > { %v4940_v43 = vpop.permute.xlu1 %4939 }
0x1c49   : > { %v4710_v27 = vpop.f32.mrb[80].mxu0 }
0x1c4a   : > { %v7565_v14 = vpop.f32.mrb[81].mxu0  ;;  %v8448_v58 = vpop.eup %8447 }
0x1c4b   : > { %v4932_v51 = vmul.f32 %v8448_v58, %v8444_v20  ;;  %v8450_v42 = vpop.eup %8449  ;;  %v8174_v14 = vld [vmem:[#allocation23 + $0x128] ss:$16 sps:$4 sm:$0xff]  }
0x1c4c   : > { %v4933_v41 = vmul.f32 %v8450_v42, %v8442_v12  ;;  %v8182_v42 = vld [vmem:[#allocation23 + $0x14c] ss:$16 sps:$4 sm:$0xff]  }
0x1c4d   : > { %v4715_v34 = vpop.f32.mrb[82].mxu0 }
0x1c4e   : > { %v4724_v53 = vpack.c.bf16 %v4715_v34, %v4710_v27  ;;  %v7568_v30 = vpop.f32.mrb[83].mxu0  ;;  %v8452_v45 = vpop.eup %8451  ;;  %v8173_v27 = vld [vmem:[#allocation23 + $0x124] ss:$16 sps:$4 sm:$0xff]  }
0x1c4f   : > { %v4934_v54 = vmul.f32 %v8452_v45, %v8446_v25  ;;  %v8180_v45 = vld [vmem:[#allocation23 + $0x148] ss:$16 sps:$4 sm:$0xff]  }
0x1c50   : > { %7576 = vmatprep.mubr.msk.bf16.mxu0 %vm1450_vm3, %v4724_v53 }
0x1c51   : > { %v4720_v6 = vpop.f32.mrb[84].mxu0 }
0x1c52   : > { %v4725_v48 = vpack.c.bf16 %v4720_v6, %v4720_v6  ;;  %v7571_v40 = vpop.f32.mrb[85].mxu0 }
0x1c54   : > { %7577 = vmatmul.mubr.msk.bf16.vlgmr.msra.gmra.mrb[88].mxu0 %vm1450_vm3, %v4725_v48 }
0x1c55   : > { %7673 = vmatpush3.bf16.msra.mxu0 %v7672_v36  ;;  %7601 = vmatprep.mubr.msk.f32.mxu0 %vm9239_vm2, %v9240_v59 }
0x1c56   : > { %7599 = vmatprep.subr.mxu0 %v9240_v59 }
0x1c59   : > { %7600 = vmatpush3.msk.msra.mxu0 %vm1050_vm1, %v4940_v43 }
0x1c5a   : > { %5394 = vmatprep.subr.bf16.mxu0 %v8167_v10 }
0x1c5c   : > { %7602 = vmatmul.mubr.msk.f32.vlgmr.msra.gmra.mrb[86].mxu0 %vm1552_vm5, %v4932_v51  ;;  %v8179_v51 = vld [vmem:[#allocation23 + $0x144] ss:$16 sps:$4 sm:$0xff]  }
0x1c5d   : > { %7604 = vmatprep.mubr.msk.f32.mxu0 %vm9239_vm2, %v9240_v59 }
0x1c60   : > { %7605 = vmatmul.mubr.msk.f32.gmra.mrb[92].mxu0 %vm1552_vm5, %v4933_v41  ;;  %v8177_v41 = vld [vmem:[#allocation23 + $0x140] ss:$16 sps:$4 sm:$0xff]  }
0x1c61   : > { %7607 = vmatprep.mubr.msk.f32.mxu0 %vm9239_vm2, %v9240_v59 }
0x1c64   : > { %7608 = vmatmul.mubr.msk.f32.gmra.mrb[94].mxu0 %vm1552_vm5, %v4934_v54  ;;  %v8185_v54 = vld [vmem:[#allocation23 + $0x164] ss:$16 sps:$4 sm:$0xff]  }
0x1c65   : > { %5426 = vmatprep.mubr.bf16.mxu0 %v9237_v24 }
0x1d27   : > { %v7578_v46 = vpop.f32.mrb[88].mxu0 }
0x1d28   : > { %v4794_v44 = vadd.f32 %v7578_v46, %v10519_v21  ;;  %v4778_v60 = vpop.f32.mrb[89].mxu0  ;;  %v8186_v46 = vld [vmem:[#allocation23 + $0x168] ss:$16 sps:$4 sm:$0xff]  }
0x1d29   : > { %v4792_v50 = vadd.f32 %v4778_v60, %v10521_v47  ;;  %v7579_v18 = vpop.f32.mrb[90].mxu0  ;;  %v8194_v60 = vld [vmem:[#allocation23 + $0x18c] ss:$16 sps:$4 sm:$0xff]  }
0x1d2a   : > { %v4781_v1 = vpop.f32.mrb[91].mxu0  ;;  %v8192_v18 = vld [vmem:[#allocation23 + $0x188] ss:$16 sps:$4 sm:$0xff]  }
0x1d2b   : > { %v4793_v59 = vadd.f32 %v4781_v1, %v10523_v55  ;;  %v6862_v55 = vld [vmem:[#allocation19 + $0x1] ss:$0 sm:$0xff]  ;;  %v8197_v1 = vld [vmem:[#allocation23 + $0x1a4] ss:$16 sps:$4 sm:$0xff]  }
0x1d2f   : > { %v5020_v2 = vpop.f32.mrb[86].mxu0 }
0x1d30   : > { %v7603_v49 = vpop.f32.mrb[87].mxu0 }
0x1d31   : > { %v8198_v49 = vld [vmem:[#allocation23 + $0x1a8] ss:$16 sps:$4 sm:$0xff]  }
0x1d33   : > { %v5025_v52 = vpop.f32.mrb[92].mxu0 }
0x1d34   : > { %v5034_v56 = vpack.c.bf16 %v5025_v52, %v5020_v2  ;;  %v7606_v31 = vpop.f32.mrb[93].mxu0  ;;  %v8195_v2 = vld [vmem:[#allocation23 + $0x1a0] ss:$16 sps:$4 sm:$0xff]   ;;  %v8203_v52 = vld [vmem:[#allocation23 + $0x1c4] ss:$16 sps:$4 sm:$0xff]  }
0x1d35   : > { %v8201_v31 = vld [vmem:[#allocation23 + $0x1c0] ss:$16 sps:$4 sm:$0xff]  }
0x1d36   : > { %7614 = vmatprep.mubr.msk.bf16.mxu1 %vm1450_vm3, %v5034_v56  ;;  %v8206_v56 = vld [vmem:[#allocation23 + $0x1cc] ss:$16 sps:$4 sm:$0xff]  }
0x1d37   : > { %v5030_v4 = vpop.f32.mrb[94].mxu0 }
0x1d38   : > { %v5035_v57 = vpack.c.bf16 %v5030_v4, %v5030_v4  ;;  %v7609_v8 = vpop.f32.mrb[95].mxu0  ;;  %v8204_v4 = vld [vmem:[#allocation23 + $0x1c8] ss:$16 sps:$4 sm:$0xff]  }
0x1d39   : > { %v8209_v8 = vld [vmem:[#allocation23 + $0x1e4] ss:$16 sps:$4 sm:$0xff]  }
0x1d3a   : > { %7615 = vmatmul.mubr.msk.bf16.vlgmr.msra.gmra.mrb[88].mxu1 %vm1450_vm3, %v5035_v57  ;;  %v8207_v57 = vld [vmem:[#allocation23 + $0x1e0] ss:$16 sps:$4 sm:$0xff]  }
0x1d3b   : > { %5477 = vmatprep.mubr.bf16.mxu1 %v9237_v24 }
0x1e0d   : > { %v7616_v21 = vpop.f32.mrb[88].mxu1 }
0x1e0e   : > { %v5104_v47 = vadd.f32 %v7616_v21, %v4794_v44  ;;  %v5088_v63 = vpop.f32.mrb[89].mxu1  ;;  %v8191_v44 = vld [vmem:[#allocation23 + $0x184] ss:$16 sps:$4 sm:$0xff]   ;;  %v8210_v21 = vld [vmem:[#allocation23 + $0x1e8] ss:$16 sps:$4 sm:$0xff]  }
0x1e0f   : > { %v5102_v19 = vadd.f32 %v5088_v63, %v4792_v50  ;;  %v7617_v13 = vpop.f32.mrb[90].mxu1  ;;  %v8189_v50 = vld [vmem:[#allocation23 + $0x180] ss:$16 sps:$4 sm:$0xff]  }
0x1e10   : > { %v5091_v26 = vpop.f32.mrb[91].mxu1  ;;  %v5107_v15 = vadd.f32 %v5104_v47, %v10327_v35  ;;  %v8170_v35 = vld [vmem:[#allocation23 + $0x10c] ss:$16 sps:$4 sm:$0xff]  }
0x1e11   : > { %v5105_v23 = vadd.f32 %v5102_v19, %v10319_v9  ;;  %v5103_v12 = vadd.f32 %v5091_v26, %v4793_v59  ;;  %v8165_v9 = vld [vmem:[#allocation23 + $0x100] ss:$16 sps:$4 sm:$0xff]   ;;  %5445 = vmatprep.subr.bf16.mxu1 %v8170_v35  ;;  %v8200_v59 = vld [vmem:[#allocation23 + $0x1ac] ss:$16 sps:$4 sm:$0xff]  }
0x1e12   : > { %v10583_v7 = vadd.f32 %v6862_v55, %v5107_v15  ;;  %5395 = vmatpush1.bf16.msra.mxu0 %v8165_v9  ;;  %5446 = vmatpush1.bf16.msra.mxu1 %v8168_v11  ;;  %v8212_v47 = vld [vmem:[#allocation23 + $0x1ec] ss:$16 sps:$4 sm:$0xff]  }
0x1e13   : > { %v5106_v20 = vadd.f32 %v5103_v12, %v10323_v5  ;;  %v10578_v22 = vadd.f32 %v6862_v55, %v5105_v23  ;;  %v8176_v5 = vld [vmem:[#allocation23 + $0x12c] ss:$16 sps:$4 sm:$0xff]   ;;  %5396 = vmatprep.subr.bf16.mxu0 %v8173_v27 }
0x1e14   : > { %v5127_v16 = vsel %vm1050_vm1, %v10583_v7, 0.0  ;;  %5447 = vmatprep.subr.bf16.mxu1 %v8176_v5  ;;  %v6863_v9 = vld [vmem:[#allocation20 + $0x1] ss:$0 sm:$0xff]  ;;  %v6864_v5 = vld [vmem:[#allocation22 + $0x1] ss:$0 sm:$0xff] }
0x1e15   : > { %5123 = vadd.xlane.f32.xlu1 %v10578_v22  ;;  %v10581_v25 = vadd.f32 %v6862_v55, %v5106_v20 }
0x1e16   : > { %5397 = vmatpush1.bf16.msra.mxu0 %v8171_v29  ;;  %5448 = vmatpush1.bf16.msra.mxu1 %v8174_v14 }
0x1e17   : > { %5125 = vadd.xlane.f32.xlu0 %v10581_v25  ;;  %5398 = vmatprep.subr.bf16.mxu0 %v8179_v51  ;;  %v8219_v51 = vld [vmem:[#allocation26 + $0x108] sm:$0xff]  }
0x1e18   : > { %5449 = vmatprep.subr.bf16.mxu1 %v8182_v42  ;;  %v8220_v42 = vld [vmem:[#allocation26 + $0x188] sm:$0xff]  }
0x1e1a   : > { %5399 = vmatpush1.bf16.msra.mxu0 %v8177_v41  ;;  %5450 = vmatpush1.bf16.msra.mxu1 %v8180_v45  ;;  %v8221_v41 = vld [vmem:[#allocation26 + $0x150] sm:$0xff]  }
0x1e1b   : > { %5128 = vadd.xlane.f32.xlu0 %v5127_v16  ;;  %5400 = vmatprep.subr.bf16.mxu0 %v8185_v54  ;;  %v8222_v45 = vld [vmem:[#allocation26 + $0x1d0] sm:$0xff]  }
0x1e1c   : > { %5451 = vmatprep.subr.bf16.mxu1 %v8188_v17  ;;  %v8223_v54 = vld [vmem:[#allocation26 + $0x110] sm:$0xff]  }
0x1e1d   : > { %v8224_v17 = vld [vmem:[#allocation26 + $0x190] sm:$0xff]  }
0x1e1e   : > { %5401 = vmatpush1.bf16.msra.mxu0 %v8183_v28  ;;  %5452 = vmatpush1.bf16.msra.mxu1 %v8186_v46  ;;  %v8225_v28 = vld [vmem:[#allocation26 + $0x158] sm:$0xff]  }
0x1e1f   : > { %5402 = vmatprep.subr.bf16.mxu0 %v8191_v44  ;;  %5453 = vmatprep.subr.bf16.mxu1 %v8194_v60  ;;  %v8226_v46 = vld [vmem:[#allocation26 + $0x1d8] sm:$0xff]  }
0x1e20   : > { %v8227_v44 = vld [vmem:[#allocation26 + $0x118] sm:$0xff]  }
0x1e21   : > { %v8228_v60 = vld [vmem:[#allocation26 + $0x198] sm:$0xff]  }
0x1e22   : > { %5403 = vmatpush1.bf16.msra.mxu0 %v8189_v50  ;;  %5454 = vmatpush1.bf16.msra.mxu1 %v8192_v18  ;;  %v8229_v50 = vld [vmem:[#allocation26 + $0x160] sm:$0xff]  }
0x1e23   : > { %5404 = vmatprep.subr.bf16.mxu0 %v8197_v1  ;;  %5455 = vmatprep.subr.bf16.mxu1 %v8200_v59  ;;  %v8230_v18 = vld [vmem:[#allocation26 + $0x1e0] sm:$0xff]  }
0x1e24   : > { %v8231_v1 = vld [vmem:[#allocation26 + $0x120] sm:$0xff]  }
0x1e25   : > { %v8232_v59 = vld [vmem:[#allocation26 + $0x1a0] sm:$0xff]  }
0x1e26   : > { %5405 = vmatpush1.bf16.msra.mxu0 %v8195_v2  ;;  %5456 = vmatpush1.bf16.msra.mxu1 %v8198_v49  ;;  %v8233_v2 = vld [vmem:[#allocation26 + $0x168] sm:$0xff]  }
0x1e27   : > { %5406 = vmatprep.subr.bf16.mxu0 %v8203_v52  ;;  %5457 = vmatprep.subr.bf16.mxu1 %v8206_v56  ;;  %v8234_v49 = vld [vmem:[#allocation26 + $0x1e8] sm:$0xff]  }
0x1e28   : > { %v8235_v52 = vld [vmem:[#allocation26 + $0x128] sm:$0xff]  }
0x1e29   : > { %v8236_v56 = vld [vmem:[#allocation26 + $0x1a8] sm:$0xff]  }
0x1e2a   : > { %5407 = vmatpush1.bf16.msra.mxu0 %v8201_v31  ;;  %5458 = vmatpush1.bf16.msra.mxu1 %v8204_v4  ;;  %v8237_v31 = vld [vmem:[#allocation26 + $0x170] sm:$0xff]  }
0x1e2b   : > { %5408 = vmatprep.subr.bf16.mxu0 %v8209_v8  ;;  %5459 = vmatprep.subr.bf16.mxu1 %v8212_v47  ;;  %v8238_v4 = vld [vmem:[#allocation26 + $0x1f0] sm:$0xff]   ;;  %v8242_v47 = vld [vmem:[#allocation26 + $0x1f8] sm:$0xff]  }
0x1e2c   : > { %v8240_v8 = vld [vmem:[#allocation26 + $0x1b0] sm:$0xff]  }
0x1e2e   : > { %5409 = vmatpush1.bf16.msra.mxu0 %v8207_v57  ;;  %5460 = vmatpush1.bf16.msra.mxu1 %v8210_v21  ;;  %v8239_v57 = vld [vmem:[#allocation26 + $0x130] sm:$0xff]   ;;  %v8241_v21 = vld [vmem:[#allocation26 + $0x178] sm:$0xff]  }
0x1ea2   : > { %v5124_v32 = vpop.xlane.xlu1 %5123 }
0x1ea3   : > { %v5130_v34 = vmul.f32 0.0078125, %v5124_v32 }
0x1ea4   : > { %v5126_v53 = vpop.xlane.xlu0 %5125 }
0x1ea5   : > { %v10589_v30 = vsub.f32 %v10578_v22, %v5130_v34  ;;  %v5131_v38 = vmul.f32 0.0078125, %v5126_v53 }
0x1ea7   : > { %v10592_v37 = vsub.f32 %v10581_v25, %v5131_v38  ;;  %v5136_v6 = vmul.f32 %v10589_v30, %v10589_v30 }
0x1ea8   : > { %v5129_v39 = vpop.xlane.xlu0 %5128 }
0x1ea9   : > { %v5132_v48 = vmul.f32 0.0078125, %v5129_v39  ;;  %5139 = vadd.xlane.f32.xlu1 %v5136_v6  ;;  %v5137_v40 = vmul.f32 %v10592_v37, %v10592_v37 }
0x1eab   : > { %v10599_v36 = vsub.f32 %v10583_v7, %v5132_v48  ;;  %5141 = vadd.xlane.f32.xlu0 %v5137_v40  ;;  %v8214_v48 = vld [vmem:[#allocation26 + $0x1c0] sm:$0xff]  }
0x1eac   : > { %v8215_v40 = vld [vmem:[#allocation26 + $0x100] sm:$0xff]   ;;  %7214 = vmatprep.subr.bf16.mxu1 %v8214_v48 }
0x1ead   : > { %v5138_v58 = vmul.f32 %v10599_v36, %v10599_v36 }
0x1eaf   : > { %v5143_v43 = vsel %vm1050_vm1, %v5138_v58, 0.0  ;;  %v8216_v58 = vld [vmem:[#allocation26 + $0x180] sm:$0xff]  }
0x1eb0   : > { %5144 = vadd.xlane.f32.xlu1 %v5143_v43  ;;  %v8218_v43 = vld [vmem:[#allocation26 + $0x1c8] sm:$0xff]  }
0x1f36   : > { %v5140_v63 = vpop.xlane.xlu1 %5139 }
0x1f37   : > { %v5146_v19 = vmul.f32 0.0078125, %v5140_v63  ;;  %v8243_v63 = vld [vmem:[#allocation26 + $0x138] sm:$0xff]  }
0x1f38   : > { %v5142_v13 = vpop.xlane.xlu0 %5141 }
0x1f39   : > { %v5149_v55 = vadd.f32 1e-05, %v5146_v19  ;;  %v5147_v26 = vmul.f32 0.0078125, %v5142_v13  ;;  %v8244_v19 = vld [vmem:[#allocation26 + $0x1b8] sm:$0xff]  }
0x1f3a   : > { %v5212_v13 = vld [vmem:[#allocation25 + $0x4] sm:$0xf] }
0x1f3b   : > { %8453 = vrsqrt.f32 %v5149_v55  ;;  %v5150_v23 = vadd.f32 1e-05, %v5147_v26  ;;  %v5217_v55 = vrot.slane %v5212_v13, %v10009_v3  ;;  %v5225_v26 = vrot.slane %v5212_v13, %v10005_v0 }
0x1f3d   : > { %8455 = vrsqrt.f32 %v5150_v23  ;;  %v5145_v12 = vpop.xlane.xlu1 %5144  ;;  %v5221_v23 = vrot.slane %v5212_v13, %v10002_v62 }
0x1f3e   : > { %v5148_v15 = vmul.f32 0.0078125, %v5145_v12  ;;  %v5229_v12 = vrot.slane %v5212_v13, %v2794_v33 }
0x1f40   : > { %v5151_v20 = vadd.f32 1e-05, %v5148_v15 }
0x1f42   : > { %8457 = vrsqrt.f32 %v5151_v20 }
0x1f45   : > { %v8454_v16 = vpop.eup %8453 }
0x1f46   : > { %v5155_v10 = vmul.f32 %v8454_v16, %v10589_v30 }
0x1f47   : > { %v8456_v11 = vpop.eup %8455 }
0x1f48   : > { %v5164_v35 = vmul.f32 %v6863_v9, %v5155_v10  ;;  %v5156_v27 = vmul.f32 %v8456_v11, %v10592_v37  ;;  %v8213_v37 = vld [vmem:[#allocation26 + $0x140] sm:$0xff]  }
0x1f49   : > { %7186 = vmatprep.subr.bf16.mxu0 %v8213_v37 }
0x1f4a   : > { %v5165_v29 = vmul.f32 %v6863_v9, %v5156_v27  ;;  %v5173_v32 = vadd.f32 %v6864_v5, %v5164_v35 }
0x1f4c   : > { %v8458_v14 = vpop.eup %8457  ;;  %v5174_v34 = vadd.f32 %v6864_v5, %v5165_v29 }
0x1f4d   : > { %v5157_v53 = vmul.f32 %v8458_v14, %v10599_v36  ;;  %v8217_v36 = vld [vmem:[#allocation26 + $0x148] sm:$0xff]  }
0x1f4e   : > { %v5176_v38 = vpack.c.bf16 %v5174_v34, %v5173_v32 }
0x1f4f   : > { %v5166_v6 = vmul.f32 %v6863_v9, %v5157_v53 }
0x1f50   : > { %5427 = vmatmul.mubr.bf16.vlgmr.msra.gmra.mrb[96].mxu0 %v5176_v38  ;;  %5478 = vmatmul.mubr.bf16.vlgmr.msra.gmra.mrb[92].mxu1 %v5176_v38 }
0x1f51   : > { %5436 = vmatprep.mubr.bf16.mxu0 %v9237_v24  ;;  %5487 = vmatprep.mubr.bf16.mxu1 %v9237_v24  ;;  %v5175_v30 = vadd.f32 %v6864_v5, %v5166_v6 }
0x1f52   : > { %7187 = vmatpush3.bf16.msra.mxu0 %v8215_v40  ;;  %7215 = vmatpush3.bf16.msra.mxu1 %v8216_v58 }
0x1f53   : > { %v5177_v39 = vpack.c.bf16 %v5175_v30, %v5175_v30  ;;  %7188 = vmatprep.subr.bf16.mxu0 %v8217_v36  ;;  %7216 = vmatprep.subr.bf16.mxu1 %v8218_v43 }
0x1f56   : > { %7189 = vmatpush3.bf16.msra.mxu0 %v8219_v51  ;;  %7217 = vmatpush3.bf16.msra.mxu1 %v8220_v42 }
0x1f57   : > { %7190 = vmatprep.subr.bf16.mxu0 %v8221_v41  ;;  %7218 = vmatprep.subr.bf16.mxu1 %v8222_v45 }
0x1f58   : > { %5437 = vmatmul.mubr.bf16.gmra.mrb[100].mxu0 %v5177_v39  ;;  %5488 = vmatmul.mubr.bf16.gmra.mrb[96].mxu1 %v5177_v39 }
0x1f5a   : > { %7191 = vmatpush3.bf16.msra.mxu0 %v8223_v54  ;;  %7219 = vmatpush3.bf16.msra.mxu1 %v8224_v17 }
0x1f5b   : > { %7192 = vmatprep.subr.bf16.mxu0 %v8225_v28  ;;  %7220 = vmatprep.subr.bf16.mxu1 %v8226_v46 }
0x1f5e   : > { %7193 = vmatpush3.bf16.msra.mxu0 %v8227_v44  ;;  %7221 = vmatpush3.bf16.msra.mxu1 %v8228_v60 }
0x1f5f   : > { %7194 = vmatprep.subr.bf16.mxu0 %v8229_v50  ;;  %7222 = vmatprep.subr.bf16.mxu1 %v8230_v18 }
0x1f62   : > { %7195 = vmatpush3.bf16.msra.mxu0 %v8231_v1  ;;  %7223 = vmatpush3.bf16.msra.mxu1 %v8232_v59 }
0x1f63   : > { %7196 = vmatprep.subr.bf16.mxu0 %v8233_v2  ;;  %7224 = vmatprep.subr.bf16.mxu1 %v8234_v49 }
0x1f66   : > { %7197 = vmatpush3.bf16.msra.mxu0 %v8235_v52  ;;  %7225 = vmatpush3.bf16.msra.mxu1 %v8236_v56 }
0x1f67   : > { %7198 = vmatprep.subr.bf16.mxu0 %v8237_v31  ;;  %7226 = vmatprep.subr.bf16.mxu1 %v8238_v4 }
0x1f6a   : > { %7199 = vmatpush3.bf16.msra.mxu0 %v8239_v57  ;;  %7227 = vmatpush3.bf16.msra.mxu1 %v8240_v8 }
0x1f6b   : > { %7200 = vmatprep.subr.bf16.mxu0 %v8241_v21  ;;  %7228 = vmatprep.subr.bf16.mxu1 %v8242_v47 }
0x1f6e   : > { %7201 = vmatpush3.bf16.msra.mxu0 %v8243_v63  ;;  %7229 = vmatpush3.bf16.msra.mxu1 %v8244_v19 }
0x2023   : > { %v5428_v15 = vpop.f32.mrb[96].mxu0  ;;  %v5479_v20 = vpop.f32.mrb[92].mxu1 }
0x2024   : > { %v10614_v16 = vadd.f32 %v5428_v15, %v5217_v55  ;;  %v10616_v9 = vadd.f32 %v5479_v20, %v5225_v26  ;;  %v5430_v10 = vpop.f32.mrb[97].mxu0  ;;  %v5481_v11 = vpop.f32.mrb[93].mxu1 }
0x2025   : > { %v10618_v35 = vadd.f32 %v5430_v10, %v5221_v23  ;;  %v10620_v27 = vadd.f32 %v5481_v11, %v5229_v12  ;;  %v5432_v5 = vpop.f32.mrb[98].mxu0  ;;  %v5483_v29 = vpop.f32.mrb[94].mxu1 }
0x2026   : > { %v6897_v0 = vmul.f32 -1.702, %v10614_v16  ;;  %v6899_v14 = vmul.f32 -1.702, %v10616_v9  ;;  %v10624_v61 = vadd.f32 %v5432_v5, %v5217_v55  ;;  %v10626_v33 = vadd.f32 %v5483_v29, %v5225_v26  ;;  %v5434_v32 = vpop.f32.mrb[99].mxu0  ;;  %v5485_v34 = vpop.f32.mrb[95].mxu1 }
0x2027   : > { %v6898_v53 = vmul.f32 -1.702, %v10618_v35  ;;  %v6900_v38 = vmul.f32 -1.702, %v10620_v27  ;;  %v10630_v6 = vadd.f32 %v5434_v32, %v5221_v23  ;;  %v10632_v30 = vadd.f32 %v5485_v34, %v5229_v12 }
0x2028   : > { %v5520_v39 = vmul.f32 1.442695, %v6897_v0  ;;  %v5524_v37 = vmul.f32 1.442695, %v6899_v14  ;;  %v6901_v48 = vmul.f32 -1.702, %v10624_v61 }
0x2029   : > { %v5522_v40 = vmul.f32 1.442695, %v6898_v53  ;;  %v5526_v58 = vmul.f32 1.442695, %v6900_v38  ;;  %v6903_v36 = vmul.f32 -1.702, %v10626_v33 }
0x202a   : > { %8459 = vpow2.f32 %v5520_v39  ;;  %v5528_v43 = vmul.f32 1.442695, %v6901_v48  ;;  %v6902_v51 = vmul.f32 -1.702, %v10630_v6  ;;  %v6904_v42 = vmul.f32 -1.702, %v10632_v30 }
0x202b   : > { %8461 = vpow2.f32 %v5524_v37  ;;  %v5532_v41 = vmul.f32 1.442695, %v6903_v36  ;;  %v5438_v45 = vpop.f32.mrb[100].mxu0  ;;  %v5489_v54 = vpop.f32.mrb[96].mxu1 }
0x202c   : > { %8463 = vpow2.f32 %v5522_v40  ;;  %v5530_v17 = vmul.f32 1.442695, %v6902_v51  ;;  %v5534_v28 = vmul.f32 1.442695, %v6904_v42  ;;  %v10638_v46 = vadd.f32 %v5438_v45, %v5217_v55  ;;  %v5440_v44 = vpop.f32.mrb[101].mxu0  ;;  %v5491_v60 = vpop.f32.mrb[97].mxu1 }
0x202d   : > { %8465 = vpow2.f32 %v5526_v58  ;;  %v10640_v50 = vadd.f32 %v5489_v54, %v5225_v26  ;;  %v10642_v18 = vadd.f32 %v5440_v44, %v5221_v23  ;;  %v10644_v1 = vadd.f32 %v5491_v60, %v5229_v12  ;;  %v5442_v59 = vpop.f32.mrb[102].mxu0  ;;  %v5493_v2 = vpop.f32.mrb[98].mxu1 }
0x202e   : > { %8467 = vpow2.f32 %v5528_v43  ;;  %v6905_v49 = vmul.f32 -1.702, %v10638_v46  ;;  %v5443_v52 = vpop.f32.mrb[103].mxu0  ;;  %v5494_v56 = vpop.f32.mrb[99].mxu1 }
0x202f   : > { %8469 = vpow2.f32 %v5532_v41  ;;  %v6907_v31 = vmul.f32 -1.702, %v10640_v50  ;;  %v6906_v4 = vmul.f32 -1.702, %v10642_v18  ;;  %v6908_v57 = vmul.f32 -1.702, %v10644_v1 }
0x2030   : > { %8471 = vpow2.f32 %v5530_v17  ;;  %v5536_v8 = vmul.f32 1.442695, %v6905_v49 }
0x2031   : > { %8473 = vpow2.f32 %v5534_v28  ;;  %v5540_v21 = vmul.f32 1.442695, %v6907_v31  ;;  %v5538_v47 = vmul.f32 1.442695, %v6906_v4  ;;  %v5542_v63 = vmul.f32 1.442695, %v6908_v57 }
0x2032   : > { %8475 = vpow2.f32 %v5536_v8 }
0x2033   : > { %8477 = vpow2.f32 %v5540_v21 }
0x2034   : > { %v8460_v19 = vpop.eup %8459  ;;  %8479 = vpow2.f32 %v5538_v47 }
0x2035   : > { %v8462_v13 = vpop.eup %8461  ;;  %v5544_v55 = vadd.f32 1.0, %v8460_v19  ;;  %8481 = vpow2.f32 %v5542_v63 }
0x2036   : > { %v8464_v26 = vpop.eup %8463  ;;  %v5546_v23 = vadd.f32 1.0, %v8462_v13 }
0x2037   : > { %v8466_v12 = vpop.eup %8465  ;;  %8483 = vrcp.f32 %v5544_v55  ;;  %v5545_v15 = vadd.f32 1.0, %v8464_v26  ;;  %v8245_v55 = vld [vmem:[#allocation29] ss:$8 sps:$4 sm:$0xff]   ;;  %v8248_v26 = vld [vmem:[#allocation29 + $0x10] ss:$8 sps:$4 sm:$0xff]  }
0x2038   : > { %v8468_v20 = vpop.eup %8467  ;;  %8485 = vrcp.f32 %v5546_v23  ;;  %v5547_v10 = vadd.f32 1.0, %v8466_v12  ;;  %v8251_v23 = vld [vmem:[#allocation29 + $0x20] ss:$8 sps:$4 sm:$0xff]   ;;  %v8254_v12 = vld [vmem:[#allocation29 + $0x30] ss:$8 sps:$4 sm:$0xff]  }
0x2039   : > { %v8470_v11 = vpop.eup %8469  ;;  %8487 = vrcp.f32 %v5545_v15  ;;  %v5548_v5 = vadd.f32 1.0, %v8468_v20  ;;  %v8259_v15 = vld [vmem:[#allocation29 + $0x44] ss:$8 sps:$4 sm:$0xff]   ;;  %v8257_v20 = vld [vmem:[#allocation29 + $0x40] ss:$8 sps:$4 sm:$0xff]  }
0x203a   : > { %v8472_v29 = vpop.eup %8471  ;;  %8489 = vrcp.f32 %v5547_v10  ;;  %v5550_v0 = vadd.f32 1.0, %v8470_v11  ;;  %v8260_v10 = vld [vmem:[#allocation29 + $0x50] ss:$8 sps:$4 sm:$0xff]   ;;  %v8265_v11 = vld [vmem:[#allocation29 + $0x64] ss:$8 sps:$4 sm:$0xff]  }
0x203b   : > { %v8474_v14 = vpop.eup %8473  ;;  %8491 = vrcp.f32 %v5548_v5  ;;  %v5549_v32 = vadd.f32 1.0, %v8472_v29  ;;  %v8263_v5 = vld [vmem:[#allocation29 + $0x60] ss:$8 sps:$4 sm:$0xff]   ;;  %v8268_v29 = vld [vmem:[#allocation29 + $0x74] ss:$8 sps:$4 sm:$0xff]  }
0x203c   : > { %v8476_v34 = vpop.eup %8475  ;;  %8493 = vrcp.f32 %v5550_v0  ;;  %v5551_v53 = vadd.f32 1.0, %v8474_v14  ;;  %v8266_v0 = vld [vmem:[#allocation29 + $0x70] ss:$8 sps:$4 sm:$0xff]   ;;  %v8269_v14 = vld [vmem:[#allocation32 + $0x40] sm:$0xff]  }
0x203d   : > { %v8478_v38 = vpop.eup %8477  ;;  %8495 = vrcp.f32 %v5549_v32  ;;  %v5552_v39 = vadd.f32 1.0, %v8476_v34  ;;  %v8270_v32 = vld [vmem:[#allocation32] sm:$0xff]   ;;  %v8271_v34 = vld [vmem:[#allocation32 + $0x48] sm:$0xff]   ;;  %7242 = vmatprep.subr.bf16.mxu1 %v8269_v14 }
0x203e   : > { %v8480_v37 = vpop.eup %8479  ;;  %8497 = vrcp.f32 %v5551_v53  ;;  %v5554_v40 = vadd.f32 1.0, %v8478_v38  ;;  %v8272_v53 = vld [vmem:[#allocation32 + $0x8] sm:$0xff]   ;;  %v8273_v38 = vld [vmem:[#allocation32 + $0x50] sm:$0xff]  }
0x203f   : > { %v8482_v48 = vpop.eup %8481  ;;  %v5553_v58 = vadd.f32 1.0, %v8480_v37  ;;  %8499 = vrcp.f32 %v5552_v39  ;;  %v8274_v39 = vld [vmem:[#allocation32 + $0x10] sm:$0xff]   ;;  %v8275_v37 = vld [vmem:[#allocation32 + $0x58] sm:$0xff]  }
0x2040   : > { %v5555_v36 = vadd.f32 1.0, %v8482_v48  ;;  %v8276_v48 = vld [vmem:[#allocation32 + $0x18] sm:$0xff]  }
0x2041   : > { %v8484_v43 = vpop.eup %8483  ;;  %8501 = vrcp.f32 %v5553_v58  ;;  %v8278_v58 = vld [vmem:[#allocation32 + $0x20] sm:$0xff]  }
0x2042   : > { %v8486_v51 = vpop.eup %8485  ;;  %8503 = vrcp.f32 %v5555_v36  ;;  %v5580_v17 = vmul.f32 %v8484_v43, %v10614_v16  ;;  %v8279_v36 = vld [vmem:[#allocation32 + $0x68] sm:$0xff]  }
0x2043   : > { %v8488_v42 = vpop.eup %8487  ;;  %8505 = vrcp.f32 %v5554_v40  ;;  %v5582_v60 = vmul.f32 %v8486_v51, %v10616_v9  ;;  %v8277_v40 = vld [vmem:[#allocation32 + $0x60] sm:$0xff]   ;;  %v8280_v43 = vld [vmem:[#allocation32 + $0x28] sm:$0xff]   ;;  %v8281_v51 = vld [vmem:[#allocation32 + $0x70] sm:$0xff]  }
0x2044   : > { %v8490_v41 = vpop.eup %8489  ;;  %v5581_v49 = vmul.f32 %v8488_v42, %v10618_v35 }
0x2045   : > { %v8492_v45 = vpop.eup %8491  ;;  %v5583_v31 = vmul.f32 %v8490_v41, %v10620_v27 }
0x2046   : > { %v8494_v54 = vpop.eup %8493  ;;  %v5584_v28 = vmul.f32 %v8492_v45, %v10624_v61  ;;  %v6909_v45 = vld [vmem:[#allocation28 + $0x1] ss:$0 sm:$0xff] }
0x2047   : > { %v8496_v44 = vpop.eup %8495  ;;  %v5586_v59 = vmul.f32 %v8494_v54, %v10626_v33 }
0x2048   : > { %v8498_v2 = vpop.eup %8497  ;;  %v5592_v52 = vpack.c.bf16 %v5584_v28, %v5580_v17  ;;  %v5585_v56 = vmul.f32 %v8496_v44, %v10630_v6 }
0x2049   : > { %v5594_v4 = vpack.c.bf16 %v5586_v59, %v5582_v60  ;;  %v5587_v57 = vmul.f32 %v8498_v2, %v10632_v30  ;;  %v8500_v8 = vpop.eup %8499 }
0x204a   : > { %v5593_v16 = vpack.c.bf16 %v5585_v56, %v5581_v49  ;;  %v5588_v27 = vmul.f32 %v8500_v8, %v10638_v46  ;;  %v8253_v46 = vld [vmem:[#allocation29 + $0x24] ss:$8 sps:$4 sm:$0xff]  }
0x204b   : > { %v8502_v21 = vpop.eup %8501  ;;  %v5595_v61 = vpack.c.bf16 %v5587_v57, %v5583_v31 }
0x204c   : > { %v8504_v47 = vpop.eup %8503  ;;  %v5589_v9 = vmul.f32 %v8502_v21, %v10642_v18  ;;  %5897 = vmatprep.mubr.bf16.mxu0 %v5593_v16  ;;  %v5596_v19 = vpack.c.bf16 %v5588_v27, %v5588_v27  ;;  %v8247_v18 = vld [vmem:[#allocation29 + $0x4] ss:$8 sps:$4 sm:$0xff]  }
0x204d   : > { %v8506_v33 = vpop.eup %8505  ;;  %v5591_v63 = vmul.f32 %v8504_v47, %v10644_v1  ;;  %5945 = vmatprep.mubr.bf16.mxu1 %v5595_v61  ;;  %5898 = vmatmul.mubr.bf16.vlgmr.msra.gmra.mrb[104].mxu0 %v5592_v52  ;;  %v8250_v1 = vld [vmem:[#allocation29 + $0x14] ss:$8 sps:$4 sm:$0xff]  }
0x204e   : > { %v5597_v35 = vpack.c.bf16 %v5589_v9, %v5589_v9  ;;  %5946 = vmatmul.mubr.bf16.vlgmr.msra.gmra.mrb[100].mxu1 %v5594_v4  ;;  %v5590_v30 = vmul.f32 %v8506_v33, %v10640_v50  ;;  %6084 = vmatprep.subr.bf16.mxu0 %v8247_v18  ;;  %v8256_v50 = vld [vmem:[#allocation29 + $0x34] ss:$8 sps:$4 sm:$0xff]  }
0x204f   : > { %v5599_v6 = vpack.c.bf16 %v5591_v63, %v5591_v63  ;;  %6085 = vmatpush1.bf16.msra.mxu0 %v8245_v55  ;;  %7243 = vmatpush3.bf16.msra.mxu1 %v8270_v32 }
0x2050   : > { %5905 = vmatprep.mubr.bf16.mxu0 %v5597_v35  ;;  %v5598_v13 = vpack.c.bf16 %v5590_v30, %v5590_v30  ;;  %6086 = vmatprep.subr.bf16.mxu0 %v8250_v1 }
0x2051   : > { %5953 = vmatprep.mubr.bf16.mxu1 %v5599_v6  ;;  %7244 = vmatprep.subr.bf16.mxu1 %v8271_v34 }
0x2053   : > { %6087 = vmatpush1.bf16.msra.mxu0 %v8248_v26  ;;  %7245 = vmatpush3.bf16.msra.mxu1 %v8272_v53 }
0x2054   : > { %6088 = vmatprep.subr.bf16.mxu0 %v8253_v46  ;;  %7246 = vmatprep.subr.bf16.mxu1 %v8273_v38 }
0x2055   : > { %5906 = vmatmul.mubr.bf16.gmra.mrb[108].mxu0 %v5596_v19 }
0x2056   : > { %5954 = vmatmul.mubr.bf16.gmra.mrb[104].mxu1 %v5598_v13  ;;  %6116 = vmatprep.mubr.bf16.mxu0 %v9237_v24  ;;  %v8262_v24 = vld [vmem:[#allocation29 + $0x54] ss:$8 sps:$4 sm:$0xff]  }
0x2057   : > { %6089 = vmatpush1.bf16.msra.mxu0 %v8251_v23  ;;  %7247 = vmatpush3.bf16.msra.mxu1 %v8274_v39 }
0x2058   : > { %6090 = vmatprep.subr.bf16.mxu0 %v8256_v50  ;;  %7248 = vmatprep.subr.bf16.mxu1 %v8275_v37 }
0x205b   : > { %6091 = vmatpush1.bf16.msra.mxu0 %v8254_v12  ;;  %7249 = vmatpush3.bf16.msra.mxu1 %v8276_v48 }
0x205c   : > { %6092 = vmatprep.subr.bf16.mxu0 %v8259_v15  ;;  %7250 = vmatprep.subr.bf16.mxu1 %v8277_v40 }
0x205f   : > { %6093 = vmatpush1.bf16.msra.mxu0 %v8257_v20  ;;  %7251 = vmatpush3.bf16.msra.mxu1 %v8278_v58 }
0x2060   : > { %6094 = vmatprep.subr.bf16.mxu0 %v8262_v24  ;;  %7252 = vmatprep.subr.bf16.mxu1 %v8279_v36  ;;  %v6159_v36 = vld [vmem:[#allocation34] sm:$0x1] }
0x2063   : > { %6095 = vmatpush1.bf16.msra.mxu0 %v8260_v10  ;;  %7253 = vmatpush3.bf16.msra.mxu1 %v8280_v43 }
0x2064   : > { %6096 = vmatprep.subr.bf16.mxu0 %v8265_v11  ;;  %7254 = vmatprep.subr.bf16.mxu1 %v8281_v51  ;;  %v8282_v11 = vld [vmem:[#allocation32 + $0x30] sm:$0xff]  }
0x2067   : > { %6097 = vmatpush1.bf16.msra.mxu0 %v8263_v5  ;;  %7255 = vmatpush3.bf16.msra.mxu1 %v8282_v11  ;;  %v8283_v5 = vld [vmem:[#allocation32 + $0x78] sm:$0xff]  }
0x2068   : > { %6098 = vmatprep.subr.bf16.mxu0 %v8268_v29  ;;  %v8284_v29 = vld [vmem:[#allocation32 + $0x38] sm:$0xff]   ;;  %7256 = vmatprep.subr.bf16.mxu1 %v8283_v5 }
0x206b   : > { %6099 = vmatpush1.bf16.msra.mxu0 %v8266_v0  ;;  %7257 = vmatpush3.bf16.msra.mxu1 %v8284_v29 }
0x2120   : > { %v7202_v42 = vpop.f32.mrb[104].mxu0 }
0x2121   : > { %v7230_v41 = vpop.f32.mrb[100].mxu1  ;;  %v7203_v54 = vpop.f32.mrb[105].mxu0 }
0x2122   : > { %v7204_v17 = vadd.f32 %v7203_v54, %v7202_v42  ;;  %v7231_v28 = vpop.f32.mrb[101].mxu1  ;;  %v7205_v44 = vpop.f32.mrb[106].mxu0 }
0x2123   : > { %v7232_v60 = vadd.f32 %v7231_v28, %v7230_v41  ;;  %v7233_v59 = vpop.f32.mrb[102].mxu1  ;;  %v7206_v2 = vpop.f32.mrb[107].mxu0 }
0x2124   : > { %v5900_v49 = vadd.f32 %v7204_v17, %v6909_v45  ;;  %v7207_v52 = vadd.f32 %v7206_v2, %v7205_v44  ;;  %v7234_v56 = vpop.f32.mrb[103].mxu1 }
0x2125   : > { %v7235_v31 = vadd.f32 %v7234_v56, %v7233_v59 }
0x2126   : > { %v5948_v4 = vadd.f32 %v7232_v60, %v5900_v49  ;;  %v5903_v57 = vadd.f32 %v7207_v52, %v6909_v45 }
0x2128   : > { %v5951_v8 = vadd.f32 %v7235_v31, %v5903_v57  ;;  %v7208_v16 = vpop.f32.mrb[108].mxu0  ;;  %v5961_v47 = vadd.f32 %v5948_v4, %v10578_v22 }
0x2129   : > { %v7236_v21 = vpop.f32.mrb[104].mxu1  ;;  %v7209_v61 = vpop.f32.mrb[109].mxu0 }
0x212a   : > { %v5962_v9 = vadd.f32 %v5951_v8, %v10581_v25  ;;  %v7210_v33 = vadd.f32 %v7209_v61, %v7208_v16  ;;  %v7237_v63 = vpop.f32.mrb[105].mxu1  ;;  %v7211_v35 = vpop.f32.mrb[110].mxu0 }
0x212b   : > { %v7238_v27 = vadd.f32 %v7237_v63, %v7236_v21  ;;  %v7239_v6 = vpop.f32.mrb[106].mxu1  ;;  %v7212_v30 = vpop.f32.mrb[111].mxu0 }
0x212c   : > { %v5964_v19 = vadd.f32 %v5962_v9, %v5961_v47  ;;  %v5908_v13 = vadd.f32 %v7210_v33, %v6909_v45  ;;  %v7240_v18 = vpop.f32.mrb[107].mxu1 }
0x212e   : > { %v5956_v55 = vadd.f32 %v7238_v27, %v5908_v13 }
0x2130   : > { %v5963_v1 = vadd.f32 %v5956_v55, %v10583_v7  ;;  %v5992_v7 = vld [vmem:[#allocation31] sm:$0x3] }
0x2131   : > { %v6077_v0 = vrot.slane %v5992_v7, %v10009_v3  ;;  %v6081_v14 = vrot.slane %v5992_v7, %v10002_v62 }
0x2132   : > { %v5965_v26 = vsel %vm1050_vm1, %v5963_v1, 0.0 }
0x2133   : > { %v5966_v46 = vadd.f32 %v5965_v26, %v5964_v19 }
0x2135   : > { %v5967_v23 = vrot.slane %v5966_v46, 4 }
0x2137   : > { %v5968_v50 = vadd.f32 %v5967_v23, %v5966_v46 }
0x2139   : > { %v5969_v22 = vrot.slane %v5968_v50, 2 }
0x213b   : > { %v5970_v12 = vadd.f32 %v5969_v22, %v5968_v50 }
0x213d   : > { %v5971_v25 = vrot.slane %v5970_v12, 1 }
0x213f   : > { %v5972_v15 = vadd.f32 %v5971_v25, %v5970_v12 }
0x2141   : > { %v5973_v20 = vsub.f32 %v5972_v15, %v5961_v47 }
0x2143   : > { %v5974_v24 = vmul.f32 0.0625, %v5973_v20 }
0x2145   : > { %v5975_v10 = vpack.c.bf16 %v5974_v24, %v5974_v24 }
0x2147   : > { %6117 = vmatmul.mubr.bf16.vlgmr.msra.gmra.mrb[112].mxu0 %v5975_v10 }
0x221a   : > { %v6118_v32 = vpop.f32.mrb[112].mxu0 }
0x221b   : > { %v6119_v34 = vadd.f32 %v6118_v32, %v6077_v0  ;;  %v6120_v53 = vpop.f32.mrb[113].mxu0 }
0x221c   : > { %v6121_v38 = vadd.f32 %v6120_v53, %v6081_v14  ;;  %v6122_v39 = vpop.f32.mrb[114].mxu0 }
0x221d   : > { %v6123_v37 = vpop.f32.mrb[115].mxu0  ;;  %v6125_v40 = vpack.c.bf16 %v6119_v34, %v6119_v34 }
0x221e   : > { %v6126_v48 = vpack.c.bf16 %v6121_v38, %v6121_v38 }
0x2220   : > { %6288 = vmatprep.mubr.bf16.mxu1 %v6126_v48 }
0x2221   : > { %6289 = vmatmul.mubr.bf16.vlgmr.msra.gmra.mrb[108].mxu1 %v6125_v40 }
0x22f4   : > { %v7258_v58 = vpop.f32.mrb[108].mxu1 }
0x22f5   : > { %v7259_v43 = vpop.f32.mrb[109].mxu1 }
0x22f6   : > { %v7260_v3 = vadd.f32 %v7259_v43, %v7258_v58  ;;  %v7261_v62 = vpop.f32.mrb[110].mxu1 }
0x22f7   : > { %v7262_v51 = vpop.f32.mrb[111].mxu1 }
0x22f8   : > { %v6291_v42 = vadd.f32 %v7260_v3, %v6159_v36 }
0x22fa   : > { %6296 = vst [vmem:[%s955_s21] sm:$0x1] %v6291_v42 }
0x22fb   : > { %9110 = shalt.err (!%p9107_p8)
}
0x22fc   : > { %s9111_s19 = scalar_lea.hbm %s10674_s17, 16  ;;  %s9115_s30 = scalar_lea.hbm %s10865_s15, 32 }
0x22fd   : > { %p9112_p6 = scmp.ne.s32.totalorder %s10674_s17, %s9111_s19  ;;  %p9116_p3 = scmp.lt.u32.totalorder %s10674_s17, %s10865_s15 }
0x22fe   : > { %p9117_p5 = scmp.lt.u32.totalorder %s9115_s30, %s9111_s19  ;;  %p9119_p7 = scmp.lt.u32.totalorder %s9111_s19, %s10674_s17 }
0x22ff   : > { %p9113_p10 = pnand %p9112_p6, %p10866_p4 }
0x2300   : > { %p9118_p9 = por %p9117_p5, %p9116_p3 }
0x2301   : > { %p9114_p11 = pneg %p9113_p10 }
0x2302   : > { %p9120_p12 = por %p9119_p7, %p9118_p9 }
0x2304   : > { %p9121_p1 = pnand %p9120_p12, %p9114_p11 }
0x2306   : > { %9124 = shalt.err (!%p9121_p1)
}
0x2307   : > { %7759 = dma.vmem_to_hbm [thread:$0]  (%p10866_p4), %s10676_s5, 16, %s10674_s17, %s6298_s0  }
0x2308 PF: > { %s10867_s11 = sld [smem:[#allocation48_spill]]  ;;  %s10868_s18 = sld [smem:[#allocation51_spill]] }
0x2309   : > { %p10869_p13 = scmp.ne.s32.totalorder %s10835_s22, 0 }
0x230e   : > { %s6322_s20 = sand.u32 1, %s10867_s11   ;;  %p10870_p0 = scmp.ge.s32.totalorder %s10868_s18, 2 }
0x230f   : > { %s6323_s26 = scalar_lea.sflag [#allocation4], %s6322_s20 }
0x2310   : > { %p7827_p2 = pnand %p10870_p0, %p10869_p13 }
0x2312   : > { %9186 = dma.done.wait (!%p7827_p2), %s6323_s26, 16  }
0x2313   : > { %9188 = vsyncadd (!%p7827_p2), %s6323_s26, 4294967280  ;;  %s10871_s2 = sld [smem:[#allocation49_spill]]  ;;  %s10872_s13 = sld [smem:[#allocation50_spill]] }
0x2314   : > { %s10873_s19 = smov %s9843_s25  ;;  %p44_p8 = scmp.ge.s32.totalorder %s9831_s27, 4  }
0x2315   : > { %s10875_s26 = smov %s10873_s19 }
0x2316   :  { %46 = sbr.rel (!%p44_p8) target bundleno = 34 (0x22), region = 241 }
0x2319   : > { %s10874_s25 = smov %s10872_s13 }
0x231d   :  { %6327 = vsyncpa [#allocation3], 1 }
0x231e   :  { %6329 = vsyncpa [#allocation3 + $0x1], 1 }
0x231f   :  { %6330 = vsyncpa [#allocation6], 1 }
0x2320   :  { %6331 = vsyncpa [#allocation9], 1 }
0x2321   :  { %6332 = vsyncpa [#allocation12], 1 }
0x2322   :  { %6333 = vsyncpa [#allocation15], 1 }
0x2323   :  { %6334 = vsyncpa [#allocation18], 1 }
0x2324   :  { %6335 = vsyncpa [#allocation21], 1 }
0x2325   :  { %6336 = vsyncpa [#allocation24], 1 }
0x2326   :  { %6337 = vsyncpa [#allocation27], 1 }
0x2327   :  { %6338 = vsyncpa [#allocation30], 1 }
0x2328   :  { %6339 = vsyncpa [#allocation33], 1 }
0x2329   :  { %6340 = vsyncpa [#allocation4], 1 }
0x232a   :  { %6342 = vsyncpa [#allocation4 + $0x1], 1 }

</bundles_post_ra>
